<compile_context>
chip_gen: v7x
topology: tpu7x:2x2x1
jax: 0.10.0
libtpu: 0.0.40
codegen_flags: <defaults>
</compile_context>

<pallas_src>
import jax
import jax.numpy as jnp
from jax import lax
from jax.experimental import pallas as pl
from jax.experimental.pallas import tpu as pltpu


def lstm_model_kernel(x_ref, wih_ref, whh_ref, b_ref, wfc_ref, bfc_ref,
                      out_ref, gx_ref, hs_ref):
    """Fused LSTM + FC + softmax(dim=time).

    x_ref   : [Bp, T, I]    (batch_first, batch padded to a sublane multiple)
    wih_ref : [I, 4H]       (W_ih transposed, PyTorch gate order i,f,g,o)
    whh_ref : [H, 4H]       (W_hh transposed)
    b_ref   : [1, 4H]       (b_ih + b_hh fused)
    wfc_ref : [H, Op]       (fc weight transposed, output dim padded to 128)
    bfc_ref : [1, Op]
    out_ref : [Bp, T, Op]   softmax over the T axis (== torch Softmax(dim=1))
    gx_ref  : [Bp, T, 4H]   VMEM scratch: hoisted input projection
    hs_ref  : [Bp, T, H]    VMEM scratch: per-step hidden states
    """
    Bp, T, I = x_ref.shape
    H = whh_ref.shape[0]
    Op = wfc_ref.shape[1]

    # ---- Prologue: hoisted input projection for ALL timesteps (one matmul).
    x_flat = x_ref[...].reshape(Bp * T, I)                       # sublane merge
    gx = (jnp.dot(x_flat, wih_ref[...], preferred_element_type=jnp.float32)
          + b_ref[...])                                          # [Bp*T, 4H]
    gx_ref[...] = gx.reshape(Bp, T, 4 * H)

    whh = whh_ref[...]                                           # [H, 4H] stays resident

    h = jnp.zeros((Bp, H), jnp.float32)
    c = jnp.zeros((Bp, H), jnp.float32)

    # ---- Recurrence: fully unrolled, only h @ W_hh on the serial chain.
    for t in range(T):
        gates = gx_ref[:, t, :] + jnp.dot(h, whh,
                                          preferred_element_type=jnp.float32)
        i_g = jax.nn.sigmoid(gates[:, 0 * H:1 * H])
        f_g = jax.nn.sigmoid(gates[:, 1 * H:2 * H])
        g_g = jnp.tanh(gates[:, 2 * H:3 * H])
        o_g = jax.nn.sigmoid(gates[:, 3 * H:4 * H])
        c = f_g * c + i_g * g_g
        h = o_g * jnp.tanh(c)
        hs_ref[:, t, :] = h

    # ---- Epilogue: one FC matmul over all timesteps, softmax over time,
    #      single lane-dense unmasked store.
    hs = hs_ref[...].reshape(Bp * T, H)
    logits = (jnp.dot(hs, wfc_ref[...], preferred_element_type=jnp.float32)
              + bfc_ref[...]).reshape(Bp, T, Op)
    m = jnp.max(logits, axis=1, keepdims=True)
    e = jnp.exp(logits - m)
    s = jnp.sum(e, axis=1, keepdims=True)
    out_ref[...] = e / s


def lstm_model_forward(x, params):
    """x: [B, T, input_size] float32. Returns [B, T, output_size]."""
    w_ih, w_hh, b_ih, b_hh, w_fc, b_fc = (
        params["w_ih"], params["w_hh"], params["b_ih"],
        params["b_hh"], params["w_fc"], params["b_fc"])
    B, T, I = x.shape
    H = w_hh.shape[1]
    O = w_fc.shape[0]

    Bp = ((B + 7) // 8) * 8          # pad batch to a sublane multiple
    Op = ((O + 127) // 128) * 128    # pad FC output to a lane multiple

    # Glue: zero-pad batch & output dims, pre-transpose weights, fuse biases.
    # No time<->batch transposes; the kernel consumes batch_first directly.
    x_p = jnp.pad(x.astype(jnp.float32), ((0, Bp - B), (0, 0), (0, 0)))
    wih_t = jnp.transpose(w_ih).astype(jnp.float32)              # [I, 4H]
    whh_t = jnp.transpose(w_hh).astype(jnp.float32)              # [H, 4H]
    b = (b_ih + b_hh).reshape(1, 4 * H).astype(jnp.float32)      # [1, 4H]
    wfc_p = jnp.pad(jnp.transpose(w_fc).astype(jnp.float32),
                    ((0, 0), (0, Op - O)))                       # [H, Op]
    bfc_p = jnp.pad(b_fc.reshape(1, O).astype(jnp.float32),
                    ((0, 0), (0, Op - O)))                       # [1, Op]

    vmem = pl.BlockSpec(memory_space=pltpu.MemorySpace.VMEM)
    out_p = pl.pallas_call(
        lstm_model_kernel,
        out_shape=jax.ShapeDtypeStruct((Bp, T, Op), jnp.float32),
        in_specs=[vmem] * 6,
        out_specs=vmem,
        scratch_shapes=[pltpu.VMEM((Bp, T, 4 * H), jnp.float32),   # gx
                        pltpu.VMEM((Bp, T, H), jnp.float32)],      # h history
    )(x_p, wih_t, whh_t, b, wfc_p, bfc_p)

    return out_p[:B, :, :O]                                      # [B, T, O]


def reference_forward(x, params):
    """Pure-JAX reference matching PyTorch LSTMModel.forward semantics."""
    w_ih, w_hh, b_ih, b_hh, w_fc, b_fc = (
        params["w_ih"], params["w_hh"], params["b_ih"],
        params["b_hh"], params["w_fc"], params["b_fc"])
    B, T, I = x.shape
    H = w_hh.shape[1]

    def cell(carry, x_t):
        h, c = carry
        gates = x_t @ w_ih.T + b_ih + h @ w_hh.T + b_hh
        i_g = jax.nn.sigmoid(gates[:, 0 * H:1 * H])
        f_g = jax.nn.sigmoid(gates[:, 1 * H:2 * H])
        g_g = jnp.tanh(gates[:, 2 * H:3 * H])
        o_g = jax.nn.sigmoid(gates[:, 3 * H:4 * H])
        c = f_g * c + i_g * g_g
        h = o_g * jnp.tanh(c)
        return (h, c), h

    init = (jnp.zeros((B, H)), jnp.zeros((B, H)))
    _, hs = lax.scan(cell, init, jnp.transpose(x, (1, 0, 2)))    # [T, B, H]
    lstm_out = jnp.transpose(hs, (1, 0, 2))                      # [B, T, H]
    y = lstm_out @ w_fc.T + b_fc                                 # [B, T, O]
    return jax.nn.softmax(y, axis=1)                             # dim=1 == time


def init_params(key, input_size, hidden_size, output_size):
    ks = jax.random.split(key, 6)
    k = 1.0 / jnp.sqrt(hidden_size)
    u = lambda kk, shape: jax.random.uniform(kk, shape, jnp.float32, -k, k)
    return {
        "w_ih": u(ks[0], (4 * hidden_size, input_size)),
        "w_hh": u(ks[1], (4 * hidden_size, hidden_size)),
        "b_ih": u(ks[2], (4 * hidden_size,)),
        "b_hh": u(ks[3], (4 * hidden_size,)),
        "w_fc": u(ks[4], (output_size, hidden_size)),
        "b_fc": u(ks[5], (output_size,)),
    }


if __name__ == "__main__":
    B, T = 2, 8
    input_size, hidden_size, output_size = 16, 32, 8

    key = jax.random.PRNGKey(0)
    kx, kp = jax.random.split(key)
    x = jax.random.normal(kx, (B, T, input_size), jnp.float32)
    params = init_params(kp, input_size, hidden_size, output_size)

    out = jax.block_until_ready(jax.jit(lstm_model_forward)(x, params))

    ref = jax.block_until_ready(reference_forward(x, params))
    assert out.shape == (B, T, output_size)
    assert jnp.allclose(out, ref, atol=1e-5, rtol=1e-5), (
        f"max abs err {jnp.max(jnp.abs(out - ref))}")

    print("KERNEL_OK")
</pallas_src>

<mosaic_0001>
module attributes {stable_mosaic.version = 11 : i64} {
  func.func @lstm_model_kernel(%arg0: memref<8x8x16xf32, #tpu.memory_space<vmem>>, %arg1: memref<16x128xf32, #tpu.memory_space<vmem>>, %arg2: memref<32x128xf32, #tpu.memory_space<vmem>>, %arg3: memref<1x128xf32, #tpu.memory_space<vmem>>, %arg4: memref<32x128xf32, #tpu.memory_space<vmem>>, %arg5: memref<1x128xf32, #tpu.memory_space<vmem>>, %arg6: memref<8x8x128xf32, #tpu.memory_space<vmem>>, %arg7: memref<8x8x128xf32, #tpu.memory_space<vmem>>, %arg8: memref<8x8x32xf32, #tpu.memory_space<vmem>>) attributes {dimension_semantics = [], scalar_prefetch = 0 : i64, scratch_operands = 2 : i64, tpu.core_type = #tpu.core_type<tc>} {
    %c0 = arith.constant 0 : index
    %c0_0 = arith.constant 0 : index
    %c0_1 = arith.constant 0 : index
    %0 = vector.load %arg0[%c0, %c0_0, %c0_1] : memref<8x8x16xf32, #tpu.memory_space<vmem>>, vector<8x8x16xf32>
    %1 = vector.shape_cast %0 : vector<8x8x16xf32> to vector<64x16xf32>
    %c0_2 = arith.constant 0 : index
    %c0_3 = arith.constant 0 : index
    %2 = vector.load %arg1[%c0_2, %c0_3] : memref<16x128xf32, #tpu.memory_space<vmem>>, vector<16x128xf32>
    %cst = arith.constant dense<0.000000e+00> : vector<64x128xf32>
    %3 = tpu.matmul %1, %2, %cst {dimension_numbers = #tpu.dot_dimension_numbers<[1], [0], [0], [1], [0, 0, 1, 1], [], []>} : vector<64x16xf32>, vector<16x128xf32>, vector<64x128xf32> -> vector<64x128xf32>
    %c0_4 = arith.constant 0 : index
    %c0_5 = arith.constant 0 : index
    %4 = vector.load %arg3[%c0_4, %c0_5] : memref<1x128xf32, #tpu.memory_space<vmem>>, vector<1x128xf32>
    %5 = vector.broadcast %4 : vector<1x128xf32> to vector<64x128xf32>
    %6 = arith.addf %3, %5 : vector<64x128xf32>
    %7 = vector.shape_cast %6 : vector<64x128xf32> to vector<8x8x128xf32>
    %c0_6 = arith.constant 0 : index
    %c0_7 = arith.constant 0 : index
    %c0_8 = arith.constant 0 : index
    %8 = vector.load %arg7[%c0_6, %c0_7, %c0_8] : memref<8x8x128xf32, #tpu.memory_space<vmem>>, vector<8x8x128xf32>
    tpu.vector_store %arg7[%c0_6, %c0_7, %c0_8], %7 {strides = array<i32>} : memref<8x8x128xf32, #tpu.memory_space<vmem>>, vector<8x8x128xf32>,
    %c0_9 = arith.constant 0 : index
    %c0_10 = arith.constant 0 : index
    %9 = vector.load %arg2[%c0_9, %c0_10] : memref<32x128xf32, #tpu.memory_space<vmem>>, vector<32x128xf32>
    %cst_11 = arith.constant 0.000000e+00 : f32
    %10 = vector.broadcast %cst_11 : f32 to vector<8x32xf32>
    %cst_12 = arith.constant 0.000000e+00 : f32
    %11 = vector.broadcast %cst_12 : f32 to vector<8x32xf32>
    %c0_13 = arith.constant 0 : index
    %c0_14 = arith.constant 0 : index
    %c0_15 = arith.constant 0 : index
    %12 = vector.load %arg7[%c0_13, %c0_14, %c0_15] : memref<8x8x128xf32, #tpu.memory_space<vmem>>, vector<8x1x128xf32>
    %13 = vector.shape_cast %12 : vector<8x1x128xf32> to vector<8x128xf32>
    %cst_16 = arith.constant dense<0.000000e+00> : vector<8x128xf32>
    %14 = tpu.matmul %10, %9, %cst_16 {dimension_numbers = #tpu.dot_dimension_numbers<[1], [0], [0], [1], [0, 0, 1, 1], [], []>} : vector<8x32xf32>, vector<32x128xf32>, vector<8x128xf32> -> vector<8x128xf32>
    %15 = arith.addf %13, %14 : vector<8x128xf32>
    %16 = vector.extract_strided_slice %15 {offsets = [0, 0], sizes = [8, 32], strides = [1, 1]} : vector<8x128xf32> to vector<8x32xf32>
    %17 = arith.negf %16 : vector<8x32xf32>
    %18 = math.exp %17 : vector<8x32xf32>
    %cst_17 = arith.constant 1.000000e+00 : f32
    %19 = vector.broadcast %cst_17 : f32 to vector<8x32xf32>
    %20 = arith.addf %19, %18 : vector<8x32xf32>
    %21 = arith.divf %19, %20 : vector<8x32xf32>
    %22 = vector.extract_strided_slice %15 {offsets = [0, 32], sizes = [8, 32], strides = [1, 1]} : vector<8x128xf32> to vector<8x32xf32>
    %23 = arith.negf %22 : vector<8x32xf32>
    %24 = math.exp %23 : vector<8x32xf32>
    %cst_18 = arith.constant 1.000000e+00 : f32
    %25 = vector.broadcast %cst_18 : f32 to vector<8x32xf32>
    %26 = arith.addf %25, %24 : vector<8x32xf32>
    %27 = arith.divf %25, %26 : vector<8x32xf32>
    %28 = vector.extract_strided_slice %15 {offsets = [0, 64], sizes = [8, 32], strides = [1, 1]} : vector<8x128xf32> to vector<8x32xf32>
    %29 = math.tanh %28 : vector<8x32xf32>
    %30 = vector.extract_strided_slice %15 {offsets = [0, 96], sizes = [8, 32], strides = [1, 1]} : vector<8x128xf32> to vector<8x32xf32>
    %31 = arith.negf %30 : vector<8x32xf32>
    %32 = math.exp %31 : vector<8x32xf32>
    %cst_19 = arith.constant 1.000000e+00 : f32
    %33 = vector.broadcast %cst_19 : f32 to vector<8x32xf32>
    %34 = arith.addf %33, %32 : vector<8x32xf32>
    %35 = arith.divf %33, %34 : vector<8x32xf32>
    %36 = arith.mulf %27, %11 : vector<8x32xf32>
    %37 = arith.mulf %21, %29 : vector<8x32xf32>
    %38 = arith.addf %36, %37 : vector<8x32xf32>
    %39 = math.tanh %38 : vector<8x32xf32>
    %40 = arith.mulf %35, %39 : vector<8x32xf32>
    %c0_20 = arith.constant 0 : index
    %c0_21 = arith.constant 0 : index
    %c0_22 = arith.constant 0 : index
    %41 = vector.load %arg8[%c0_20, %c0_21, %c0_22] : memref<8x8x32xf32, #tpu.memory_space<vmem>>, vector<8x1x32xf32>
    %42 = vector.shape_cast %41 : vector<8x1x32xf32> to vector<8x32xf32>
    %43 = vector.shape_cast %40 : vector<8x32xf32> to vector<8x1x32xf32>
    tpu.vector_store %arg8[%c0_20, %c0_21, %c0_22], %43 {strides = array<i32>} : memref<8x8x32xf32, #tpu.memory_space<vmem>>, vector<8x1x32xf32>,
    %c0_23 = arith.constant 0 : index
    %c1 = arith.constant 1 : index
    %c0_24 = arith.constant 0 : index
    %44 = vector.load %arg7[%c0_23, %c1, %c0_24] : memref<8x8x128xf32, #tpu.memory_space<vmem>>, vector<8x1x128xf32>
    %45 = vector.shape_cast %44 : vector<8x1x128xf32> to vector<8x128xf32>
    %cst_25 = arith.constant dense<0.000000e+00> : vector<8x128xf32>
    %46 = tpu.matmul %40, %9, %cst_25 {dimension_numbers = #tpu.dot_dimension_numbers<[1], [0], [0], [1], [0, 0, 1, 1], [], []>} : vector<8x32xf32>, vector<32x128xf32>, vector<8x128xf32> -> vector<8x128xf32>
    %47 = arith.addf %45, %46 : vector<8x128xf32>
    %48 = vector.extract_strided_slice %47 {offsets = [0, 0], sizes = [8, 32], strides = [1, 1]} : vector<8x128xf32> to vector<8x32xf32>
    %49 = arith.negf %48 : vector<8x32xf32>
    %50 = math.exp %49 : vector<8x32xf32>
    %cst_26 = arith.constant 1.000000e+00 : f32
    %51 = vector.broadcast %cst_26 : f32 to vector<8x32xf32>
    %52 = arith.addf %51, %50 : vector<8x32xf32>
    %53 = arith.divf %51, %52 : vector<8x32xf32>
    %54 = vector.extract_strided_slice %47 {offsets = [0, 32], sizes = [8, 32], strides = [1, 1]} : vector<8x128xf32> to vector<8x32xf32>
    %55 = arith.negf %54 : vector<8x32xf32>
    %56 = math.exp %55 : vector<8x32xf32>
    %cst_27 = arith.constant 1.000000e+00 : f32
    %57 = vector.broadcast %cst_27 : f32 to vector<8x32xf32>
    %58 = arith.addf %57, %56 : vector<8x32xf32>
    %59 = arith.divf %57, %58 : vector<8x32xf32>
    %60 = vector.extract_strided_slice %47 {offsets = [0, 64], sizes = [8, 32], strides = [1, 1]} : vector<8x128xf32> to vector<8x32xf32>
    %61 = math.tanh %60 : vector<8x32xf32>
    %62 = vector.extract_strided_slice %47 {offsets = [0, 96], sizes = [8, 32], strides = [1, 1]} : vector<8x128xf32> to vector<8x32xf32>
    %63 = arith.negf %62 : vector<8x32xf32>
    %64 = math.exp %63 : vector<8x32xf32>
    %cst_28 = arith.constant 1.000000e+00 : f32
    %65 = vector.broadcast %cst_28 : f32 to vector<8x32xf32>
    %66 = arith.addf %65, %64 : vector<8x32xf32>
    %67 = arith.divf %65, %66 : vector<8x32xf32>
    %68 = arith.mulf %59, %38 : vector<8x32xf32>
    %69 = arith.mulf %53, %61 : vector<8x32xf32>
    %70 = arith.addf %68, %69 : vector<8x32xf32>
    %71 = math.tanh %70 : vector<8x32xf32>
    %72 = arith.mulf %67, %71 : vector<8x32xf32>
    %c0_29 = arith.constant 0 : index
    %c1_30 = arith.constant 1 : index
    %c0_31 = arith.constant 0 : index
    %73 = vector.load %arg8[%c0_29, %c1_30, %c0_31] : memref<8x8x32xf32, #tpu.memory_space<vmem>>, vector<8x1x32xf32>
    %74 = vector.shape_cast %73 : vector<8x1x32xf32> to vector<8x32xf32>
    %75 = vector.shape_cast %72 : vector<8x32xf32> to vector<8x1x32xf32>
    tpu.vector_store %arg8[%c0_29, %c1_30, %c0_31], %75 {strides = array<i32>} : memref<8x8x32xf32, #tpu.memory_space<vmem>>, vector<8x1x32xf32>,
    %c0_32 = arith.constant 0 : index
    %c2 = arith.constant 2 : index
    %c0_33 = arith.constant 0 : index
    %76 = vector.load %arg7[%c0_32, %c2, %c0_33] : memref<8x8x128xf32, #tpu.memory_space<vmem>>, vector<8x1x128xf32>
    %77 = vector.shape_cast %76 : vector<8x1x128xf32> to vector<8x128xf32>
    %cst_34 = arith.constant dense<0.000000e+00> : vector<8x128xf32>
    %78 = tpu.matmul %72, %9, %cst_34 {dimension_numbers = #tpu.dot_dimension_numbers<[1], [0], [0], [1], [0, 0, 1, 1], [], []>} : vector<8x32xf32>, vector<32x128xf32>, vector<8x128xf32> -> vector<8x128xf32>
    %79 = arith.addf %77, %78 : vector<8x128xf32>
    %80 = vector.extract_strided_slice %79 {offsets = [0, 0], sizes = [8, 32], strides = [1, 1]} : vector<8x128xf32> to vector<8x32xf32>
    %81 = arith.negf %80 : vector<8x32xf32>
    %82 = math.exp %81 : vector<8x32xf32>
    %cst_35 = arith.constant 1.000000e+00 : f32
    %83 = vector.broadcast %cst_35 : f32 to vector<8x32xf32>
    %84 = arith.addf %83, %82 : vector<8x32xf32>
    %85 = arith.divf %83, %84 : vector<8x32xf32>
    %86 = vector.extract_strided_slice %79 {offsets = [0, 32], sizes = [8, 32], strides = [1, 1]} : vector<8x128xf32> to vector<8x32xf32>
    %87 = arith.negf %86 : vector<8x32xf32>
    %88 = math.exp %87 : vector<8x32xf32>
    %cst_36 = arith.constant 1.000000e+00 : f32
    %89 = vector.broadcast %cst_36 : f32 to vector<8x32xf32>
    %90 = arith.addf %89, %88 : vector<8x32xf32>
    %91 = arith.divf %89, %90 : vector<8x32xf32>
    %92 = vector.extract_strided_slice %79 {offsets = [0, 64], sizes = [8, 32], strides = [1, 1]} : vector<8x128xf32> to vector<8x32xf32>
    %93 = math.tanh %92 : vector<8x32xf32>
    %94 = vector.extract_strided_slice %79 {offsets = [0, 96], sizes = [8, 32], strides = [1, 1]} : vector<8x128xf32> to vector<8x32xf32>
    %95 = arith.negf %94 : vector<8x32xf32>
    %96 = math.exp %95 : vector<8x32xf32>
    %cst_37 = arith.constant 1.000000e+00 : f32
    %97 = vector.broadcast %cst_37 : f32 to vector<8x32xf32>
    %98 = arith.addf %97, %96 : vector<8x32xf32>
    %99 = arith.divf %97, %98 : vector<8x32xf32>
    %100 = arith.mulf %91, %70 : vector<8x32xf32>
    %101 = arith.mulf %85, %93 : vector<8x32xf32>
    %102 = arith.addf %100, %101 : vector<8x32xf32>
    %103 = math.tanh %102 : vector<8x32xf32>
    %104 = arith.mulf %99, %103 : vector<8x32xf32>
    %c0_38 = arith.constant 0 : index
    %c2_39 = arith.constant 2 : index
    %c0_40 = arith.constant 0 : index
    %105 = vector.load %arg8[%c0_38, %c2_39, %c0_40] : memref<8x8x32xf32, #tpu.memory_space<vmem>>, vector<8x1x32xf32>
    %106 = vector.shape_cast %105 : vector<8x1x32xf32> to vector<8x32xf32>
    %107 = vector.shape_cast %104 : vector<8x32xf32> to vector<8x1x32xf32>
    tpu.vector_store %arg8[%c0_38, %c2_39, %c0_40], %107 {strides = array<i32>} : memref<8x8x32xf32, #tpu.memory_space<vmem>>, vector<8x1x32xf32>,
    %c0_41 = arith.constant 0 : index
    %c3 = arith.constant 3 : index
    %c0_42 = arith.constant 0 : index
    %108 = vector.load %arg7[%c0_41, %c3, %c0_42] : memref<8x8x128xf32, #tpu.memory_space<vmem>>, vector<8x1x128xf32>
    %109 = vector.shape_cast %108 : vector<8x1x128xf32> to vector<8x128xf32>
    %cst_43 = arith.constant dense<0.000000e+00> : vector<8x128xf32>
    %110 = tpu.matmul %104, %9, %cst_43 {dimension_numbers = #tpu.dot_dimension_numbers<[1], [0], [0], [1], [0, 0, 1, 1], [], []>} : vector<8x32xf32>, vector<32x128xf32>, vector<8x128xf32> -> vector<8x128xf32>
    %111 = arith.addf %109, %110 : vector<8x128xf32>
    %112 = vector.extract_strided_slice %111 {offsets = [0, 0], sizes = [8, 32], strides = [1, 1]} : vector<8x128xf32> to vector<8x32xf32>
    %113 = arith.negf %112 : vector<8x32xf32>
    %114 = math.exp %113 : vector<8x32xf32>
    %cst_44 = arith.constant 1.000000e+00 : f32
    %115 = vector.broadcast %cst_44 : f32 to vector<8x32xf32>
    %116 = arith.addf %115, %114 : vector<8x32xf32>
    %117 = arith.divf %115, %116 : vector<8x32xf32>
    %118 = vector.extract_strided_slice %111 {offsets = [0, 32], sizes = [8, 32], strides = [1, 1]} : vector<8x128xf32> to vector<8x32xf32>
    %119 = arith.negf %118 : vector<8x32xf32>
    %120 = math.exp %119 : vector<8x32xf32>
    %cst_45 = arith.constant 1.000000e+00 : f32
    %121 = vector.broadcast %cst_45 : f32 to vector<8x32xf32>
    %122 = arith.addf %121, %120 : vector<8x32xf32>
    %123 = arith.divf %121, %122 : vector<8x32xf32>
    %124 = vector.extract_strided_slice %111 {offsets = [0, 64], sizes = [8, 32], strides = [1, 1]} : vector<8x128xf32> to vector<8x32xf32>
    %125 = math.tanh %124 : vector<8x32xf32>
    %126 = vector.extract_strided_slice %111 {offsets = [0, 96], sizes = [8, 32], strides = [1, 1]} : vector<8x128xf32> to vector<8x32xf32>
    %127 = arith.negf %126 : vector<8x32xf32>
    %128 = math.exp %127 : vector<8x32xf32>
    %cst_46 = arith.constant 1.000000e+00 : f32
    %129 = vector.broadcast %cst_46 : f32 to vector<8x32xf32>
    %130 = arith.addf %129, %128 : vector<8x32xf32>
    %131 = arith.divf %129, %130 : vector<8x32xf32>
    %132 = arith.mulf %123, %102 : vector<8x32xf32>
    %133 = arith.mulf %117, %125 : vector<8x32xf32>
    %134 = arith.addf %132, %133 : vector<8x32xf32>
    %135 = math.tanh %134 : vector<8x32xf32>
    %136 = arith.mulf %131, %135 : vector<8x32xf32>
    %c0_47 = arith.constant 0 : index
    %c3_48 = arith.constant 3 : index
    %c0_49 = arith.constant 0 : index
    %137 = vector.load %arg8[%c0_47, %c3_48, %c0_49] : memref<8x8x32xf32, #tpu.memory_space<vmem>>, vector<8x1x32xf32>
    %138 = vector.shape_cast %137 : vector<8x1x32xf32> to vector<8x32xf32>
    %139 = vector.shape_cast %136 : vector<8x32xf32> to vector<8x1x32xf32>
    tpu.vector_store %arg8[%c0_47, %c3_48, %c0_49], %139 {strides = array<i32>} : memref<8x8x32xf32, #tpu.memory_space<vmem>>, vector<8x1x32xf32>,
    %c0_50 = arith.constant 0 : index
    %c4 = arith.constant 4 : index
    %c0_51 = arith.constant 0 : index
    %140 = vector.load %arg7[%c0_50, %c4, %c0_51] : memref<8x8x128xf32, #tpu.memory_space<vmem>>, vector<8x1x128xf32>
    %141 = vector.shape_cast %140 : vector<8x1x128xf32> to vector<8x128xf32>
    %cst_52 = arith.constant dense<0.000000e+00> : vector<8x128xf32>
    %142 = tpu.matmul %136, %9, %cst_52 {dimension_numbers = #tpu.dot_dimension_numbers<[1], [0], [0], [1], [0, 0, 1, 1], [], []>} : vector<8x32xf32>, vector<32x128xf32>, vector<8x128xf32> -> vector<8x128xf32>
    %143 = arith.addf %141, %142 : vector<8x128xf32>
    %144 = vector.extract_strided_slice %143 {offsets = [0, 0], sizes = [8, 32], strides = [1, 1]} : vector<8x128xf32> to vector<8x32xf32>
    %145 = arith.negf %144 : vector<8x32xf32>
    %146 = math.exp %145 : vector<8x32xf32>
    %cst_53 = arith.constant 1.000000e+00 : f32
    %147 = vector.broadcast %cst_53 : f32 to vector<8x32xf32>
    %148 = arith.addf %147, %146 : vector<8x32xf32>
    %149 = arith.divf %147, %148 : vector<8x32xf32>
    %150 = vector.extract_strided_slice %143 {offsets = [0, 32], sizes = [8, 32], strides = [1, 1]} : vector<8x128xf32> to vector<8x32xf32>
    %151 = arith.negf %150 : vector<8x32xf32>
    %152 = math.exp %151 : vector<8x32xf32>
    %cst_54 = arith.constant 1.000000e+00 : f32
    %153 = vector.broadcast %cst_54 : f32 to vector<8x32xf32>
    %154 = arith.addf %153, %152 : vector<8x32xf32>
    %155 = arith.divf %153, %154 : vector<8x32xf32>
    %156 = vector.extract_strided_slice %143 {offsets = [0, 64], sizes = [8, 32], strides = [1, 1]} : vector<8x128xf32> to vector<8x32xf32>
    %157 = math.tanh %156 : vector<8x32xf32>
    %158 = vector.extract_strided_slice %143 {offsets = [0, 96], sizes = [8, 32], strides = [1, 1]} : vector<8x128xf32> to vector<8x32xf32>
    %159 = arith.negf %158 : vector<8x32xf32>
    %160 = math.exp %159 : vector<8x32xf32>
    %cst_55 = arith.constant 1.000000e+00 : f32
    %161 = vector.broadcast %cst_55 : f32 to vector<8x32xf32>
    %162 = arith.addf %161, %160 : vector<8x32xf32>
    %163 = arith.divf %161, %162 : vector<8x32xf32>
    %164 = arith.mulf %155, %134 : vector<8x32xf32>
    %165 = arith.mulf %149, %157 : vector<8x32xf32>
    %166 = arith.addf %164, %165 : vector<8x32xf32>
    %167 = math.tanh %166 : vector<8x32xf32>
    %168 = arith.mulf %163, %167 : vector<8x32xf32>
    %c0_56 = arith.constant 0 : index
    %c4_57 = arith.constant 4 : index
    %c0_58 = arith.constant 0 : index
    %169 = vector.load %arg8[%c0_56, %c4_57, %c0_58] : memref<8x8x32xf32, #tpu.memory_space<vmem>>, vector<8x1x32xf32>
    %170 = vector.shape_cast %169 : vector<8x1x32xf32> to vector<8x32xf32>
    %171 = vector.shape_cast %168 : vector<8x32xf32> to vector<8x1x32xf32>
    tpu.vector_store %arg8[%c0_56, %c4_57, %c0_58], %171 {strides = array<i32>} : memref<8x8x32xf32, #tpu.memory_space<vmem>>, vector<8x1x32xf32>,
    %c0_59 = arith.constant 0 : index
    %c5 = arith.constant 5 : index
    %c0_60 = arith.constant 0 : index
    %172 = vector.load %arg7[%c0_59, %c5, %c0_60] : memref<8x8x128xf32, #tpu.memory_space<vmem>>, vector<8x1x128xf32>
    %173 = vector.shape_cast %172 : vector<8x1x128xf32> to vector<8x128xf32>
    %cst_61 = arith.constant dense<0.000000e+00> : vector<8x128xf32>
    %174 = tpu.matmul %168, %9, %cst_61 {dimension_numbers = #tpu.dot_dimension_numbers<[1], [0], [0], [1], [0, 0, 1, 1], [], []>} : vector<8x32xf32>, vector<32x128xf32>, vector<8x128xf32> -> vector<8x128xf32>
    %175 = arith.addf %173, %174 : vector<8x128xf32>
    %176 = vector.extract_strided_slice %175 {offsets = [0, 0], sizes = [8, 32], strides = [1, 1]} : vector<8x128xf32> to vector<8x32xf32>
    %177 = arith.negf %176 : vector<8x32xf32>
    %178 = math.exp %177 : vector<8x32xf32>
    %cst_62 = arith.constant 1.000000e+00 : f32
    %179 = vector.broadcast %cst_62 : f32 to vector<8x32xf32>
    %180 = arith.addf %179, %178 : vector<8x32xf32>
    %181 = arith.divf %179, %180 : vector<8x32xf32>
    %182 = vector.extract_strided_slice %175 {offsets = [0, 32], sizes = [8, 32], strides = [1, 1]} : vector<8x128xf32> to vector<8x32xf32>
    %183 = arith.negf %182 : vector<8x32xf32>
    %184 = math.exp %183 : vector<8x32xf32>
    %cst_63 = arith.constant 1.000000e+00 : f32
    %185 = vector.broadcast %cst_63 : f32 to vector<8x32xf32>
    %186 = arith.addf %185, %184 : vector<8x32xf32>
    %187 = arith.divf %185, %186 : vector<8x32xf32>
    %188 = vector.extract_strided_slice %175 {offsets = [0, 64], sizes = [8, 32], strides = [1, 1]} : vector<8x128xf32> to vector<8x32xf32>
    %189 = math.tanh %188 : vector<8x32xf32>
    %190 = vector.extract_strided_slice %175 {offsets = [0, 96], sizes = [8, 32], strides = [1, 1]} : vector<8x128xf32> to vector<8x32xf32>
    %191 = arith.negf %190 : vector<8x32xf32>
    %192 = math.exp %191 : vector<8x32xf32>
    %cst_64 = arith.constant 1.000000e+00 : f32
    %193 = vector.broadcast %cst_64 : f32 to vector<8x32xf32>
    %194 = arith.addf %193, %192 : vector<8x32xf32>
    %195 = arith.divf %193, %194 : vector<8x32xf32>
    %196 = arith.mulf %187, %166 : vector<8x32xf32>
    %197 = arith.mulf %181, %189 : vector<8x32xf32>
    %198 = arith.addf %196, %197 : vector<8x32xf32>
    %199 = math.tanh %198 : vector<8x32xf32>
    %200 = arith.mulf %195, %199 : vector<8x32xf32>
    %c0_65 = arith.constant 0 : index
    %c5_66 = arith.constant 5 : index
    %c0_67 = arith.constant 0 : index
    %201 = vector.load %arg8[%c0_65, %c5_66, %c0_67] : memref<8x8x32xf32, #tpu.memory_space<vmem>>, vector<8x1x32xf32>
    %202 = vector.shape_cast %201 : vector<8x1x32xf32> to vector<8x32xf32>
    %203 = vector.shape_cast %200 : vector<8x32xf32> to vector<8x1x32xf32>
    tpu.vector_store %arg8[%c0_65, %c5_66, %c0_67], %203 {strides = array<i32>} : memref<8x8x32xf32, #tpu.memory_space<vmem>>, vector<8x1x32xf32>,
    %c0_68 = arith.constant 0 : index
    %c6 = arith.constant 6 : index
    %c0_69 = arith.constant 0 : index
    %204 = vector.load %arg7[%c0_68, %c6, %c0_69] : memref<8x8x128xf32, #tpu.memory_space<vmem>>, vector<8x1x128xf32>
    %205 = vector.shape_cast %204 : vector<8x1x128xf32> to vector<8x128xf32>
    %cst_70 = arith.constant dense<0.000000e+00> : vector<8x128xf32>
    %206 = tpu.matmul %200, %9, %cst_70 {dimension_numbers = #tpu.dot_dimension_numbers<[1], [0], [0], [1], [0, 0, 1, 1], [], []>} : vector<8x32xf32>, vector<32x128xf32>, vector<8x128xf32> -> vector<8x128xf32>
    %207 = arith.addf %205, %206 : vector<8x128xf32>
    %208 = vector.extract_strided_slice %207 {offsets = [0, 0], sizes = [8, 32], strides = [1, 1]} : vector<8x128xf32> to vector<8x32xf32>
    %209 = arith.negf %208 : vector<8x32xf32>
    %210 = math.exp %209 : vector<8x32xf32>
    %cst_71 = arith.constant 1.000000e+00 : f32
    %211 = vector.broadcast %cst_71 : f32 to vector<8x32xf32>
    %212 = arith.addf %211, %210 : vector<8x32xf32>
    %213 = arith.divf %211, %212 : vector<8x32xf32>
    %214 = vector.extract_strided_slice %207 {offsets = [0, 32], sizes = [8, 32], strides = [1, 1]} : vector<8x128xf32> to vector<8x32xf32>
    %215 = arith.negf %214 : vector<8x32xf32>
    %216 = math.exp %215 : vector<8x32xf32>
    %cst_72 = arith.constant 1.000000e+00 : f32
    %217 = vector.broadcast %cst_72 : f32 to vector<8x32xf32>
    %218 = arith.addf %217, %216 : vector<8x32xf32>
    %219 = arith.divf %217, %218 : vector<8x32xf32>
    %220 = vector.extract_strided_slice %207 {offsets = [0, 64], sizes = [8, 32], strides = [1, 1]} : vector<8x128xf32> to vector<8x32xf32>
    %221 = math.tanh %220 : vector<8x32xf32>
    %222 = vector.extract_strided_slice %207 {offsets = [0, 96], sizes = [8, 32], strides = [1, 1]} : vector<8x128xf32> to vector<8x32xf32>
    %223 = arith.negf %222 : vector<8x32xf32>
    %224 = math.exp %223 : vector<8x32xf32>
    %cst_73 = arith.constant 1.000000e+00 : f32
    %225 = vector.broadcast %cst_73 : f32 to vector<8x32xf32>
    %226 = arith.addf %225, %224 : vector<8x32xf32>
    %227 = arith.divf %225, %226 : vector<8x32xf32>
    %228 = arith.mulf %219, %198 : vector<8x32xf32>
    %229 = arith.mulf %213, %221 : vector<8x32xf32>
    %230 = arith.addf %228, %229 : vector<8x32xf32>
    %231 = math.tanh %230 : vector<8x32xf32>
    %232 = arith.mulf %227, %231 : vector<8x32xf32>
    %c0_74 = arith.constant 0 : index
    %c6_75 = arith.constant 6 : index
    %c0_76 = arith.constant 0 : index
    %233 = vector.load %arg8[%c0_74, %c6_75, %c0_76] : memref<8x8x32xf32, #tpu.memory_space<vmem>>, vector<8x1x32xf32>
    %234 = vector.shape_cast %233 : vector<8x1x32xf32> to vector<8x32xf32>
    %235 = vector.shape_cast %232 : vector<8x32xf32> to vector<8x1x32xf32>
    tpu.vector_store %arg8[%c0_74, %c6_75, %c0_76], %235 {strides = array<i32>} : memref<8x8x32xf32, #tpu.memory_space<vmem>>, vector<8x1x32xf32>,
    %c0_77 = arith.constant 0 : index
    %c7 = arith.constant 7 : index
    %c0_78 = arith.constant 0 : index
    %236 = vector.load %arg7[%c0_77, %c7, %c0_78] : memref<8x8x128xf32, #tpu.memory_space<vmem>>, vector<8x1x128xf32>
    %237 = vector.shape_cast %236 : vector<8x1x128xf32> to vector<8x128xf32>
    %cst_79 = arith.constant dense<0.000000e+00> : vector<8x128xf32>
    %238 = tpu.matmul %232, %9, %cst_79 {dimension_numbers = #tpu.dot_dimension_numbers<[1], [0], [0], [1], [0, 0, 1, 1], [], []>} : vector<8x32xf32>, vector<32x128xf32>, vector<8x128xf32> -> vector<8x128xf32>
    %239 = arith.addf %237, %238 : vector<8x128xf32>
    %240 = vector.extract_strided_slice %239 {offsets = [0, 0], sizes = [8, 32], strides = [1, 1]} : vector<8x128xf32> to vector<8x32xf32>
    %241 = arith.negf %240 : vector<8x32xf32>
    %242 = math.exp %241 : vector<8x32xf32>
    %cst_80 = arith.constant 1.000000e+00 : f32
    %243 = vector.broadcast %cst_80 : f32 to vector<8x32xf32>
    %244 = arith.addf %243, %242 : vector<8x32xf32>
    %245 = arith.divf %243, %244 : vector<8x32xf32>
    %246 = vector.extract_strided_slice %239 {offsets = [0, 32], sizes = [8, 32], strides = [1, 1]} : vector<8x128xf32> to vector<8x32xf32>
    %247 = arith.negf %246 : vector<8x32xf32>
    %248 = math.exp %247 : vector<8x32xf32>
    %cst_81 = arith.constant 1.000000e+00 : f32
    %249 = vector.broadcast %cst_81 : f32 to vector<8x32xf32>
    %250 = arith.addf %249, %248 : vector<8x32xf32>
    %251 = arith.divf %249, %250 : vector<8x32xf32>
    %252 = vector.extract_strided_slice %239 {offsets = [0, 64], sizes = [8, 32], strides = [1, 1]} : vector<8x128xf32> to vector<8x32xf32>
    %253 = math.tanh %252 : vector<8x32xf32>
    %254 = vector.extract_strided_slice %239 {offsets = [0, 96], sizes = [8, 32], strides = [1, 1]} : vector<8x128xf32> to vector<8x32xf32>
    %255 = arith.negf %254 : vector<8x32xf32>
    %256 = math.exp %255 : vector<8x32xf32>
    %cst_82 = arith.constant 1.000000e+00 : f32
    %257 = vector.broadcast %cst_82 : f32 to vector<8x32xf32>
    %258 = arith.addf %257, %256 : vector<8x32xf32>
    %259 = arith.divf %257, %258 : vector<8x32xf32>
    %260 = arith.mulf %251, %230 : vector<8x32xf32>
    %261 = arith.mulf %245, %253 : vector<8x32xf32>
    %262 = arith.addf %260, %261 : vector<8x32xf32>
    %263 = math.tanh %262 : vector<8x32xf32>
    %264 = arith.mulf %259, %263 : vector<8x32xf32>
    %c0_83 = arith.constant 0 : index
    %c7_84 = arith.constant 7 : index
    %c0_85 = arith.constant 0 : index
    %265 = vector.load %arg8[%c0_83, %c7_84, %c0_85] : memref<8x8x32xf32, #tpu.memory_space<vmem>>, vector<8x1x32xf32>
    %266 = vector.shape_cast %265 : vector<8x1x32xf32> to vector<8x32xf32>
    %267 = vector.shape_cast %264 : vector<8x32xf32> to vector<8x1x32xf32>
    tpu.vector_store %arg8[%c0_83, %c7_84, %c0_85], %267 {strides = array<i32>} : memref<8x8x32xf32, #tpu.memory_space<vmem>>, vector<8x1x32xf32>,
    %c0_86 = arith.constant 0 : index
    %c0_87 = arith.constant 0 : index
    %c0_88 = arith.constant 0 : index
    %268 = vector.load %arg8[%c0_86, %c0_87, %c0_88] : memref<8x8x32xf32, #tpu.memory_space<vmem>>, vector<8x8x32xf32>
    %269 = vector.shape_cast %268 : vector<8x8x32xf32> to vector<64x32xf32>
    %c0_89 = arith.constant 0 : index
    %c0_90 = arith.constant 0 : index
    %270 = vector.load %arg4[%c0_89, %c0_90] : memref<32x128xf32, #tpu.memory_space<vmem>>, vector<32x128xf32>
    %cst_91 = arith.constant dense<0.000000e+00> : vector<64x128xf32>
    %271 = tpu.matmul %269, %270, %cst_91 {dimension_numbers = #tpu.dot_dimension_numbers<[1], [0], [0], [1], [0, 0, 1, 1], [], []>} : vector<64x32xf32>, vector<32x128xf32>, vector<64x128xf32> -> vector<64x128xf32>
    %c0_92 = arith.constant 0 : index
    %c0_93 = arith.constant 0 : index
    %272 = vector.load %arg5[%c0_92, %c0_93] : memref<1x128xf32, #tpu.memory_space<vmem>>, vector<1x128xf32>
    %273 = vector.broadcast %272 : vector<1x128xf32> to vector<64x128xf32>
    %274 = arith.addf %271, %273 : vector<64x128xf32>
    %275 = vector.shape_cast %274 : vector<64x128xf32> to vector<8x8x128xf32>
    %cst_94 = arith.constant dense<0xFF800000> : vector<8x128xf32>
    %276 = vector.multi_reduction <maximumf>, %275, %cst_94 [1] : vector<8x8x128xf32> to vector<8x128xf32>
    %277 = vector.shape_cast %276 : vector<8x128xf32> to vector<8x1x128xf32>
    %278 = vector.broadcast %277 : vector<8x1x128xf32> to vector<8x8x128xf32>
    %279 = arith.subf %275, %278 : vector<8x8x128xf32>
    %280 = math.exp %279 : vector<8x8x128xf32>
    %cst_95 = arith.constant dense<0.000000e+00> : vector<8x128xf32>
    %281 = vector.multi_reduction <add>, %280, %cst_95 [1] : vector<8x8x128xf32> to vector<8x128xf32>
    %282 = vector.shape_cast %281 : vector<8x128xf32> to vector<8x1x128xf32>
    %283 = vector.broadcast %282 : vector<8x1x128xf32> to vector<8x8x128xf32>
    %284 = arith.divf %280, %283 : vector<8x8x128xf32>
    %c0_96 = arith.constant 0 : index
    %c0_97 = arith.constant 0 : index
    %c0_98 = arith.constant 0 : index
    %285 = vector.load %arg6[%c0_96, %c0_97, %c0_98] : memref<8x8x128xf32, #tpu.memory_space<vmem>>, vector<8x8x128xf32>
    tpu.vector_store %arg6[%c0_96, %c0_97, %c0_98], %284 {strides = array<i32>} : memref<8x8x128xf32, #tpu.memory_space<vmem>>, vector<8x8x128xf32>,
    return
  }
}

</mosaic_0001>

<bundles_post_ra>
// kernel: lstm_model_forward.1
= control target key start
LH: loop header
LB: loop body
LE: loop exit
PB: predicated region body
PF: predicated region fallthrough
CT: control target
= control target key end

     0   :  { %vm40_vm0 = vcmask 130048   ;;  %v5555_v10 = vmov 0.0|0.0   ;;  %vm4175_vm1 = vmmov 0   ;;  %v5556_v18 = vmov 0.0   ;;  %s4178_s24 = smov 32   ;;  %s5548_s1 = inlined_call_operand.vmem [shape: f32[16,128], index: 1, kind: input, shape index: {}]   ;;  %s5549_s0 = inlined_call_operand.vmem [shape: f32[8,8,16], index: 0, kind: input, shape index: {}]   ;;  %s5550_s2 = inlined_call_operand.vmem [shape: f32[32,128], index: 2, kind: input, shape index: {}]   ;;  %s5551_s3 = inlined_call_operand.vmem [shape: f32[1,128], index: 3, kind: input, shape index: {}]   ;;  %s5552_s4 = inlined_call_operand.vmem [shape: f32[32,128], index: 4, kind: input, shape index: {}]   ;;  %s5553_s5 = inlined_call_operand.vmem [shape: f32[1,128], index: 5, kind: input, shape index: {}]   ;;  %s5554_s6 = inlined_call_operand.vmem [shape: f32[8,8,128], index: 6, kind: output, shape index: {}]  }
   0x1   :  { %v31_v0 = vld [vmem:[%s5548_s1] sm:$0xff]  ;;  %v32_v1 = vld [vmem:[%s5548_s1 + $0x8] sm:$0xff]  ;;  %v25_v11 = vld [vmem:[%s5549_s0 + $0x10] sm:$0xff]  ;;  %vm530_vm2 = vcmask 1041409   ;;  %vm533_vm3 = vcmask 1042434   ;;  %vm536_vm4 = vcmask 1043459  }
   0x2   :  { %v23_v2 = vld [vmem:[%s5549_s0] sm:$0xff]  ;;  %v3563_v3 = vpack.c.bf16 %v32_v1, %v31_v0  ;;  %v179_v6 = vld [vmem:[%s5550_s2 + $0x8] sm:$0xff]  ;;  %v180_v12 = vld [vmem:[%s5550_s2 + $0x10] sm:$0xff]  ;;  %vm539_vm5 = vcmask 1044484   ;;  %vm542_vm6 = vcmask 1045509   ;;  %vm545_vm7 = vcmask 1046534  }
   0x3   :  { %3443 = vmatprep.mubr.msk.f32.mxu0 %vm40_vm0, %v23_v2  ;;  %v27_v4 = vld [vmem:[%s5549_s0 + $0x20] sm:$0xff]  ;;  %v24_v7 = vld [vmem:[%s5549_s0 + $0x8] sm:$0xff]  ;;  %v181_v13 = vld [vmem:[%s5550_s2 + $0x18] sm:$0xff]  ;;  %vm548_vm8 = vcmask 1047559   ;;  %vm190_vm9 = vcmask 261120   ;;  %vm512_vm10 = vcmask 253952  }
   0x4   :  { %3449 = vmatprep.mubr.msk.f32.mxu1 %vm40_vm0, %v27_v4  ;;  %v178_v5 = vld [vmem:[%s5550_s2] sm:$0xff]  ;;  %3564 = vmatprep.subr.bf16.mxu0 %v3563_v3  ;;  %v28_v8 = vld [vmem:[%s5549_s0 + $0x28] sm:$0xff]  ;;  %v29_v14 = vld [vmem:[%s5549_s0 + $0x30] sm:$0xff]  ;;  %v4266_v17 = vpack.c.bf16 %v181_v13, %v180_v12 }
   0x5   :  { %3623 = vmatprep.subr.bf16.mxu1 %v3563_v3  ;;  %3566 = vmatpush3.bf16.msra.mxu0 %v3563_v3  ;;  %v4240_v9 = vpack.c.bf16 %v179_v6, %v178_v5  ;;  %v26_v15 = vld [vmem:[%s5549_s0 + $0x18] sm:$0xff]  ;;  %v3288_v19 = vld [vmem:[%s5551_s3] ss:$0 sm:$0xff]  ;;  %s4177_s3 = smov 64  }
   0x6   :  { %3624 = vmatpush3.bf16.msra.mxu1 %v3563_v3  ;;  %3579 = vmatprep.subr.bf16.mxu0 %v5555_v10  ;;  %v30_v16 = vld [vmem:[%s5549_s0 + $0x38] sm:$0xff] }
   0x7   :  { %3567 = vmatprep.subr.bf16.mxu1 %v5555_v10 }
   0x8   :  { %3444 = vmatmul.mubr.msk.f32.vlgmr.msra.gmra.mrb[0].mxu0 %vm40_vm0, %v24_v7 }
   0x9   :  { %3450 = vmatmul.mubr.msk.f32.vlgmr.msra.gmra.mrb[0].mxu1 %vm40_vm0, %v28_v8  ;;  %3446 = vmatprep.mubr.msk.f32.mxu0 %vm40_vm0, %v25_v11 }
   0xa   :  { %3569 = vmatpush3.bf16.msra.mxu1 %v4240_v9  ;;  %3452 = vmatprep.mubr.msk.f32.mxu1 %vm40_vm0, %v29_v14 }
   0xb   :  { %3570 = vmatprep.subr.bf16.mxu1 %v5555_v10  ;;  %3581 = vmatpush3.bf16.msra.mxu0 %v4240_v9 }
   0xc   :  { %3447 = vmatmul.mubr.msk.f32.gmra.mrb[2].mxu0 %vm40_vm0, %v26_v15  ;;  %3582 = vmatprep.subr.bf16.mxu0 %v5555_v10 }
   0xd   :  { %3453 = vmatmul.mubr.msk.f32.gmra.mrb[2].mxu1 %vm40_vm0, %v30_v16  ;;  %3485 = vmatprep.mubr.msk.f32.mxu0 %vm4175_vm1, %v5556_v18 }
   0xe   :  { %3572 = vmatpush3.bf16.msra.mxu1 %v4266_v17  ;;  %3463 = vmatprep.mubr.msk.f32.mxu1 %vm4175_vm1, %v5556_v18 }
   0xf   :  { %3573 = vmatprep.subr.bf16.mxu1 %v5555_v10  ;;  %3584 = vmatpush3.bf16.msra.mxu0 %v4266_v17 }
  0x10   :  { %3591 = vmatprep.subr.bf16.mxu0 %v5555_v10 }
  0x11   :  { %3464 = vmatmul.mubr.f32.vlgmr.msra.gmra.mrb[4].mxu1 %v5556_v18 }
  0x12   :  { %3575 = vmatpush3.bf16.msra.mxu1 %v4240_v9  ;;  %3474 = vmatprep.mubr.msk.f32.mxu1 %vm4175_vm1, %v5556_v18 }
  0x13   :  { %3576 = vmatprep.subr.bf16.mxu1 %v5555_v10 }
  0x16   :  { %3578 = vmatpush3.bf16.msra.mxu1 %v4266_v17 }
  0x17   :  { %3585 = vmatprep.subr.bf16.mxu1 %v5555_v10 }
  0xdb   :  { %v3445_v20 = vpop.f32.mrb[0].mxu0 }
  0xdc   :  { %v3451_v21 = vpop.f32.mrb[0].mxu1  ;;  %v137_v22 = vadd.f32 %v3445_v20, %v3288_v19  ;;  %v131_v24 = vpop.f32.mrb[1].mxu0 }
  0xdd   :  { %v157_v23 = vadd.f32 %v3451_v21, %v3288_v19  ;;  %v151_v25 = vpop.f32.mrb[1].mxu1  ;;  %v132_v26 = vadd.f32 %v3288_v19, %v131_v24 }
  0xde   :  { %v152_v27 = vadd.f32 %v3288_v19, %v151_v25  ;;  %171 = vst [vmem:[#allocation2 + $0x8] sm:$0xff] %v137_v22 }
  0xdf   :  { %175 = vst [vmem:[#allocation2 + $0x28] sm:$0xff] %v157_v23  ;;  %170 = vst [vmem:[#allocation2] sm:$0xff] %v132_v26  ;;  %v3448_v28 = vpop.f32.mrb[2].mxu0 }
  0xe0   :  { %174 = vst [vmem:[#allocation2 + $0x20] sm:$0xff] %v152_v27  ;;  %v3454_v29 = vpop.f32.mrb[2].mxu1  ;;  %v147_v30 = vadd.f32 %v3448_v28, %v3288_v19  ;;  %v141_v32 = vpop.f32.mrb[3].mxu0 }
  0xe1   :  { %v167_v31 = vadd.f32 %v3454_v29, %v3288_v19  ;;  %v161_v33 = vpop.f32.mrb[3].mxu1  ;;  %v142_v34 = vadd.f32 %v3288_v19, %v141_v32 }
  0xe2   :  { %v162_v35 = vadd.f32 %v3288_v19, %v161_v33  ;;  %173 = vst [vmem:[#allocation2 + $0x18] sm:$0xff] %v147_v30 }
  0xe3   :  { %177 = vst [vmem:[#allocation2 + $0x38] sm:$0xff] %v167_v31  ;;  %172 = vst [vmem:[#allocation2 + $0x10] sm:$0xff] %v142_v34 }
  0xe4   :  { %176 = vst [vmem:[#allocation2 + $0x30] sm:$0xff] %v162_v35  ;;  %v260_v36 = vpop.f32.mrb[4].mxu1 }
  0xe5   :  { %v3465_v37 = vpop.f32.mrb[5].mxu1  ;;  %v269_v38 = vrot.slane %v260_v36, 5  ;;  %v265_v40 = vrot.slane %v260_v36, 1  ;;  %v183_v41 = vld [vmem:[#allocation2 + $0x8] sm:$0x1]  ;;  %v268_v44 = vrot.slane %v260_v36, 4 }
  0xe6   :  { %v187_v39 = vld [vmem:[#allocation2 + $0x28] sm:$0x1]  ;;  %v182_v43 = vld [vmem:[#allocation2] sm:$0x1]  ;;  %v267_v49 = vrot.slane %v260_v36, 3  ;;  %v266_v52 = vrot.slane %v260_v36, 2 }
  0xe7   :  { %v285_v42 = vadd.f32 %v269_v38, %v187_v39  ;;  %v281_v45 = vadd.f32 %v265_v40, %v183_v41  ;;  %v186_v46 = vld [vmem:[#allocation2 + $0x20] sm:$0x1]  ;;  %v280_v47 = vadd.f32 %v260_v36, %v182_v43  ;;  %v271_v55 = vrot.slane %v260_v36, 7 }
  0xe8   :  { %v284_v50 = vadd.f32 %v268_v44, %v186_v46  ;;  %v270_v58 = vrot.slane %v260_v36, 6 }
  0xe9   :  { %3630 = vtanh.f32 %v285_v42  ;;  %v185_v48 = vld [vmem:[#allocation2 + $0x18] sm:$0x1]  ;;  %v3298_v5 = vmul.f32 -1.442695, %v281_v45  ;;  %v3297_v6 = vmul.f32 -1.442695, %v280_v47 }
  0xea   :  { %3632 = vtanh.f32 %v281_v45  ;;  %v184_v51 = vld [vmem:[#allocation2 + $0x10] sm:$0x1]  ;;  %v283_v53 = vadd.f32 %v267_v49, %v185_v48  ;;  %v189_v54 = vld [vmem:[#allocation2 + $0x38] sm:$0x1]  ;;  %v3301_v8 = vmul.f32 -1.442695, %v284_v50 }
  0xeb   :  { %3634 = vtanh.f32 %v280_v47  ;;  %v282_v56 = vadd.f32 %v266_v52, %v184_v51  ;;  %v188_v57 = vld [vmem:[#allocation2 + $0x30] sm:$0x1]  ;;  %v287_v59 = vadd.f32 %v271_v55, %v189_v54  ;;  %v3302_v14 = vmul.f32 -1.442695, %v285_v42 }
  0xec   :  { %3636 = vtanh.f32 %v284_v50  ;;  %v286_v61 = vadd.f32 %v270_v58, %v188_v57  ;;  %v3300_v7 = vmul.f32 -1.442695, %v283_v53 }
  0xed   :  { %3638 = vtanh.f32 %v283_v53  ;;  %v3299_v11 = vmul.f32 -1.442695, %v282_v56  ;;  %v3304_v19 = vmul.f32 -1.442695, %v287_v59 }
  0xee   :  { %3640 = vtanh.f32 %v282_v56  ;;  %v3303_v12 = vmul.f32 -1.442695, %v286_v61 }
  0xef   :  { %3642 = vtanh.f32 %v287_v59 }
  0xf0   :  { %3644 = vtanh.f32 %v286_v61 }
  0xf1   :  { %3646 = vpow2.f32 %v3298_v5 }
  0xf2   :  { %3648 = vpow2.f32 %v3297_v6 }
  0xf3   :  { %v3631_v60 = vpop.eup %3630  ;;  %3650 = vpow2.f32 %v3300_v7 }
  0xf4   :  { %370 = vrot.lane.b32.xlu1 %v3631_v60, %s4177_s3  ;;  %v3633_v62 = vpop.eup %3632  ;;  %3652 = vpow2.f32 %v3301_v8 }
  0xf5   :  { %362 = vrot.lane.b32.xlu0 %v3633_v62, %s4177_s3  ;;  %v3635_v63 = vpop.eup %3634  ;;  %3654 = vpow2.f32 %v3299_v11 }
  0xf6   :  { %v3637_v0 = vpop.eup %3636  ;;  %3656 = vpow2.f32 %v3303_v12 }
  0xf7   :  { %v3639_v1 = vpop.eup %3638  ;;  %3658 = vpow2.f32 %v3302_v14 }
  0xf8   :  { %360 = vrot.lane.b32.xlu1 %v3635_v63, %s4177_s3  ;;  %v3641_v2 = vpop.eup %3640 }
  0xf9   :  { %368 = vrot.lane.b32.xlu0 %v3637_v0, %s4177_s3  ;;  %v3643_v3 = vpop.eup %3642 }
  0xfa   :  { %v3645_v4 = vpop.eup %3644 }
  0xfb   :  { %v3647_v13 = vpop.eup %3646 }
  0xfc   :  { %366 = vrot.lane.b32.xlu1 %v3639_v1, %s4177_s3  ;;  %v3649_v15 = vpop.eup %3648  ;;  %v313_v16 = vadd.f32 1.0, %v3647_v13 }
  0xfd   :  { %364 = vrot.lane.b32.xlu0 %v3641_v2, %s4177_s3  ;;  %v312_v20 = vadd.f32 1.0, %v3649_v15  ;;  %v3651_v21 = vpop.eup %3650 }
  0xfe   :  { %3660 = vrcp.f32 %v313_v16  ;;  %v3653_v22 = vpop.eup %3652  ;;  %v315_v23 = vadd.f32 1.0, %v3651_v21 }
  0xff   :  { %3662 = vpow2.f32 %v3304_v19  ;;  %v3655_v24 = vpop.eup %3654  ;;  %v316_v25 = vadd.f32 1.0, %v3653_v22 }
 0x100   :  { %374 = vrot.lane.b32.xlu1 %v3643_v3, %s4177_s3  ;;  %3664 = vrcp.f32 %v312_v20  ;;  %v3657_v26 = vpop.eup %3656  ;;  %v314_v27 = vadd.f32 1.0, %v3655_v24 }
 0x101   :  { %372 = vrot.lane.b32.xlu0 %v3645_v4, %s4177_s3  ;;  %3666 = vrcp.f32 %v315_v23  ;;  %v3659_v28 = vpop.eup %3658  ;;  %v318_v30 = vadd.f32 1.0, %v3657_v26 }
 0x102   :  { %3668 = vrcp.f32 %v316_v25  ;;  %v317_v32 = vadd.f32 1.0, %v3659_v28 }
 0x103   :  { %3670 = vrcp.f32 %v314_v27 }
 0x104   :  { %3672 = vrcp.f32 %v318_v30 }
 0x105   :  { %3674 = vrcp.f32 %v317_v32 }
 0x108   :  { %v4300_v31 = vpop.eup %3660 }
 0x109   :  { %v3663_v34 = vpop.eup %3662  ;;  %v345_v57 = vmul.f32 0.0, %v4300_v31 }
 0x10a   :  { %v4303_v36 = vpop.eup %3664  ;;  %v319_v40 = vadd.f32 1.0, %v3663_v34 }
 0x10b   :  { %v4307_v41 = vpop.eup %3666  ;;  %v344_v60 = vmul.f32 0.0, %v4303_v36 }
 0x10c   :  { %v4311_v44 = vpop.eup %3668  ;;  %3676 = vrcp.f32 %v319_v40  ;;  %v347_v63 = vmul.f32 0.0, %v4307_v41 }
 0x10d   :  { %v4315_v47 = vpop.eup %3670  ;;  %v348_v2 = vmul.f32 0.0, %v4311_v44 }
 0x10e   :  { %v4319_v49 = vpop.eup %3672  ;;  %v346_v5 = vmul.f32 0.0, %v4315_v47 }
 0x10f   :  { %v4323_v52 = vpop.eup %3674  ;;  %v350_v8 = vmul.f32 0.0, %v4319_v49 }
 0x110   :  { %v349_v14 = vmul.f32 0.0, %v4323_v52 }
 0x116   :  { %v4328_v55 = vpop.eup %3676 }
 0x117   :  { %v351_v20 = vmul.f32 0.0, %v4328_v55 }
 0x166   :  { %v371_v29 = vpop.permute.xlu1 %370 }
 0x167   :  { %v363_v33 = vpop.permute.xlu0 %362  ;;  %v389_v53 = vmul.f32 %v4323_v52, %v371_v29 }
 0x168   :  { %v385_v35 = vmul.f32 %v4300_v31, %v363_v33 }
 0x16a   :  { %v361_v37 = vpop.permute.xlu1 %360  ;;  %402 = vrot.lane.b32.xlu0 %v385_v35, %s4178_s24 }
 0x16b   :  { %v384_v38 = vmul.f32 %v4303_v36, %v361_v37  ;;  %v369_v39 = vpop.permute.xlu0 %368 }
 0x16c   :  { %v388_v46 = vmul.f32 %v4311_v44, %v369_v39 }
 0x16e   :  { %v367_v42 = vpop.permute.xlu1 %366  ;;  %400 = vrot.lane.b32.xlu0 %v384_v38, %s4178_s24 }
 0x16f   :  { %v387_v43 = vmul.f32 %v4307_v41, %v367_v42  ;;  %v365_v45 = vpop.permute.xlu0 %364 }
 0x170   :  { %v386_v48 = vmul.f32 %v4315_v47, %v365_v45 }
 0x171   :  { %406 = vrot.lane.b32.xlu1 %v387_v43, %s4178_s24 }
 0x172   :  { %408 = vrot.lane.b32.xlu0 %v388_v46, %s4178_s24  ;;  %v375_v54 = vpop.permute.xlu1 %374 }
 0x173   :  { %v373_v50 = vpop.permute.xlu0 %372  ;;  %v391_v56 = vmul.f32 %v4328_v55, %v375_v54 }
 0x174   :  { %v390_v51 = vmul.f32 %v4319_v49, %v373_v50 }
 0x175   :  { %404 = vrot.lane.b32.xlu1 %v386_v48, %s4178_s24 }
 0x176   :  { %412 = vrot.lane.b32.xlu0 %v390_v51, %s4178_s24 }
 0x179   :  { %410 = vrot.lane.b32.xlu1 %v389_v53, %s4178_s24 }
 0x17d   :  { %414 = vrot.lane.b32.xlu1 %v391_v56, %s4178_s24 }
 0x1dc   :  { %v403_v58 = vpop.permute.xlu0 %402 }
 0x1dd   :  { %v4333_v59 = vadd.f32 %v403_v58, %v345_v57 }
 0x1df   :  { %3678 = vtanh.f32 %v4333_v59 }
 0x1e0   :  { %v401_v61 = vpop.permute.xlu0 %400 }
 0x1e1   :  { %v4337_v62 = vadd.f32 %v401_v61, %v344_v60 }
 0x1e3   :  { %v407_v0 = vpop.permute.xlu1 %406  ;;  %3680 = vtanh.f32 %v4337_v62 }
 0x1e4   :  { %v4341_v1 = vadd.f32 %v407_v0, %v347_v63  ;;  %v409_v3 = vpop.permute.xlu0 %408  ;;  %v521_v63 = vld [vmem:[#allocation2 + $0x1] sm:$0x1] }
 0x1e5   :  { %v4345_v4 = vadd.f32 %v409_v3, %v348_v2 }
 0x1e6   :  { %3682 = vtanh.f32 %v4341_v1 }
 0x1e7   :  { %v405_v6 = vpop.permute.xlu1 %404  ;;  %3684 = vtanh.f32 %v4345_v4 }
 0x1e8   :  { %v4349_v7 = vadd.f32 %v405_v6, %v346_v5  ;;  %v413_v11 = vpop.permute.xlu0 %412  ;;  %v522_v6 = vld [vmem:[#allocation2 + $0x9] sm:$0x1] }
 0x1e9   :  { %v3679_v12 = vpop.eup %3678  ;;  %v4353_v13 = vadd.f32 %v413_v11, %v350_v8  ;;  %v523_v8 = vld [vmem:[#allocation2 + $0x11] sm:$0x1] }
 0x1ea   :  { %3686 = vtanh.f32 %v4349_v7  ;;  %450 = vrot.lane.b32.xlu0 %v3679_v12, %s4177_s3 }
 0x1eb   :  { %v411_v15 = vpop.permute.xlu1 %410  ;;  %3688 = vtanh.f32 %v4353_v13 }
 0x1ec   :  { %v4358_v16 = vadd.f32 %v411_v15, %v349_v14 }
 0x1ed   :  { %v3681_v19 = vpop.eup %3680 }
 0x1ee   :  { %3690 = vtanh.f32 %v4358_v16  ;;  %448 = vrot.lane.b32.xlu0 %v3681_v19, %s4177_s3  ;;  %v525_v19 = vld [vmem:[#allocation2 + $0x21] sm:$0x1] }
 0x1ef   :  { %v415_v21 = vpop.permute.xlu1 %414 }
 0x1f0   :  { %v3683_v22 = vpop.eup %3682  ;;  %v4363_v23 = vadd.f32 %v415_v21, %v351_v20  ;;  %v524_v20 = vld [vmem:[#allocation2 + $0x19] sm:$0x1] }
 0x1f1   :  { %454 = vrot.lane.b32.xlu1 %v3683_v22, %s4177_s3  ;;  %v3685_v24 = vpop.eup %3684 }
 0x1f2   :  { %3692 = vtanh.f32 %v4363_v23  ;;  %456 = vrot.lane.b32.xlu0 %v3685_v24, %s4177_s3 }
 0x1f4   :  { %v3687_v25 = vpop.eup %3686 }
 0x1f5   :  { %452 = vrot.lane.b32.xlu1 %v3687_v25, %s4177_s3  ;;  %v3689_v26 = vpop.eup %3688 }
 0x1f6   :  { %460 = vrot.lane.b32.xlu0 %v3689_v26, %s4177_s3 }
 0x1f8   :  { %v3691_v27 = vpop.eup %3690 }
 0x1f9   :  { %458 = vrot.lane.b32.xlu1 %v3691_v27, %s4177_s3  ;;  %v527_v27 = vld [vmem:[#allocation2 + $0x31] sm:$0x1] }
 0x1fc   :  { %v3693_v28 = vpop.eup %3692 }
 0x1fd   :  { %462 = vrot.lane.b32.xlu1 %v3693_v28, %s4177_s3  ;;  %v526_v28 = vld [vmem:[#allocation2 + $0x29] sm:$0x1] }
 0x25c   :  { %v451_v29 = vpop.permute.xlu0 %450 }
 0x25d   :  { %v4373_v33 = vmul.f32 %v4300_v31, %v451_v29 }
 0x25f   :  { %v529_v42 = vrot.slane %v4373_v33, 7 }
 0x260   :  { %v449_v30 = vpop.permute.xlu0 %448 }
 0x261   :  { %v4376_v35 = vmul.f32 %v4303_v36, %v449_v30 }
 0x263   :  { %v455_v32 = vpop.permute.xlu1 %454  ;;  %v531_v36 = vsel %vm530_vm2, %v529_v42, %v4376_v35 }
 0x264   :  { %v457_v34 = vpop.permute.xlu0 %456  ;;  %v4379_v37 = vmul.f32 %v4307_v41, %v455_v32 }
 0x265   :  { %v4382_v39 = vmul.f32 %v4311_v44, %v457_v34  ;;  %v528_v34 = vld [vmem:[#allocation2 + $0x39] sm:$0x1] }
 0x266   :  { %v535_v41 = vrot.slane %v4379_v37, 5 }
 0x267   :  { %v453_v38 = vpop.permute.xlu1 %452  ;;  %v538_v44 = vrot.slane %v4382_v39, 4 }
 0x268   :  { %v4385_v40 = vmul.f32 %v4315_v47, %v453_v38  ;;  %v461_v43 = vpop.permute.xlu0 %460 }
 0x269   :  { %v4399_v50 = vmul.f32 %v4319_v49, %v461_v43 }
 0x26a   :  { %v532_v31 = vrot.slane %v4385_v40, 6 }
 0x26b   :  { %v459_v45 = vpop.permute.xlu1 %458  ;;  %5580 = vst [vmem:[#allocation5_spill] sm:$0xff] %v4399_v50 }
 0x26c   :  { %v534_v46 = vsel %vm533_vm3, %v532_v31, %v531_v36  ;;  %v4395_v47 = vmul.f32 %v4323_v52, %v459_v45  ;;  %v544_v52 = vrot.slane %v4399_v50, 2 }
 0x26d   :  { %v537_v48 = vsel %vm536_vm4, %v535_v41, %v534_v46 }
 0x26e   :  { %5579 = vst [vmem:[#allocation4_spill] sm:$0xff] %v4395_v47  ;;  %v541_v51 = vrot.slane %v4395_v47, 3  ;;  %v540_v53 = vsel %vm539_vm5, %v538_v44, %v537_v48 }
 0x26f   :  { %v463_v54 = vpop.permute.xlu1 %462 }
 0x270   :  { %v4404_v56 = vmul.f32 %v4328_v55, %v463_v54  ;;  %v543_v57 = vsel %vm542_vm6, %v541_v51, %v540_v53 }
 0x271   :  { %v546_v49 = vsel %vm545_vm7, %v544_v52, %v543_v57 }
 0x272   :  { %5581 = vst [vmem:[#allocation6_spill] sm:$0xff] %v4404_v56  ;;  %v547_v58 = vrot.slane %v4404_v56, 1 }
 0x274   :  { %v549_v60 = vsel %vm548_vm8, %v547_v58, %v546_v49 }
 0x275   :  { %550 = vrot.lane.b32.xlu0 %v549_v60, %s4178_s24 }
 0x2e7   :  { %v551_v61 = vpop.permute.xlu0 %550 }
 0x2e8   :  { %3475 = vmatmul.mubr.msk.f32.vlgmr.msra.gmra.mrb[6].mxu1 %vm190_vm9, %v551_v61 }
 0x2e9   :  { %3587 = vmatpush3.bf16.msra.mxu1 %v4240_v9  ;;  %3496 = vmatprep.mubr.msk.f32.mxu1 %vm4175_vm1, %v5556_v18 }
 0x2ea   :  { %3588 = vmatprep.subr.bf16.mxu1 %v5555_v10 }
 0x2ed   :  { %3590 = vmatpush3.bf16.msra.mxu1 %v4266_v17 }
 0x2ee   :  { %3597 = vmatprep.subr.bf16.mxu1 %v5555_v10 }
 0x3bb   :  { %v620_v55 = vpop.f32.mrb[6].mxu1 }
 0x3bc   :  { %v3476_v0 = vpop.f32.mrb[7].mxu1  ;;  %v640_v2 = vadd.f32 %v620_v55, %v521_v63  ;;  %v625_v3 = vrot.slane %v620_v55, 1  ;;  %v626_v5 = vrot.slane %v620_v55, 2  ;;  %v628_v11 = vrot.slane %v620_v55, 4 }
 0x3bd   :  { %v627_v14 = vrot.slane %v620_v55, 3  ;;  %v630_v21 = vrot.slane %v620_v55, 6  ;;  %v629_v25 = vrot.slane %v620_v55, 5  ;;  %v631_v30 = vrot.slane %v620_v55, 7 }
 0x3be   :  { %3694 = vtanh.f32 %v640_v2  ;;  %v641_v12 = vadd.f32 %v625_v3, %v522_v6  ;;  %v642_v15 = vadd.f32 %v626_v5, %v523_v8  ;;  %v644_v22 = vadd.f32 %v628_v11, %v525_v19 }
 0x3bf   :  { %v643_v26 = vadd.f32 %v627_v14, %v524_v20  ;;  %v646_v29 = vadd.f32 %v630_v21, %v527_v27  ;;  %v645_v32 = vadd.f32 %v629_v25, %v526_v28  ;;  %v647_v38 = vadd.f32 %v631_v30, %v528_v34 }
 0x3c0   :  { %3696 = vtanh.f32 %v641_v12  ;;  %v3306_v46 = vmul.f32 -1.442695, %v640_v2  ;;  %v3307_v48 = vmul.f32 -1.442695, %v641_v12  ;;  %v3308_v51 = vmul.f32 -1.442695, %v642_v15 }
 0x3c1   :  { %3698 = vtanh.f32 %v642_v15  ;;  %v3310_v53 = vmul.f32 -1.442695, %v644_v22  ;;  %v3309_v57 = vmul.f32 -1.442695, %v643_v26  ;;  %v3312_v52 = vmul.f32 -1.442695, %v646_v29 }
 0x3c2   :  { %3700 = vtanh.f32 %v644_v22  ;;  %v3311_v49 = vmul.f32 -1.442695, %v645_v32  ;;  %v3313_v60 = vmul.f32 -1.442695, %v647_v38 }
 0x3c3   :  { %3702 = vtanh.f32 %v643_v26 }
 0x3c4   :  { %3704 = vtanh.f32 %v646_v29 }
 0x3c5   :  { %3706 = vtanh.f32 %v645_v32 }
 0x3c6   :  { %3708 = vtanh.f32 %v647_v38 }
 0x3c7   :  { %3710 = vpow2.f32 %v3306_v46 }
 0x3c8   :  { %v3695_v24 = vpop.eup %3694  ;;  %3712 = vpow2.f32 %v3307_v48 }
 0x3c9   :  { %720 = vrot.lane.b32.xlu1 %v3695_v24, %s4177_s3  ;;  %3714 = vpow2.f32 %v3308_v51 }
 0x3ca   :  { %v3697_v42 = vpop.eup %3696  ;;  %3716 = vpow2.f32 %v3310_v53 }
 0x3cb   :  { %v3699_v31 = vpop.eup %3698  ;;  %3718 = vpow2.f32 %v3309_v57 }
 0x3cc   :  { %724 = vrot.lane.b32.xlu0 %v3699_v31, %s4177_s3  ;;  %v3701_v43 = vpop.eup %3700  ;;  %3720 = vpow2.f32 %v3312_v52 }
 0x3cd   :  { %722 = vrot.lane.b32.xlu1 %v3697_v42, %s4177_s3  ;;  %v3703_v36 = vpop.eup %3702 }
 0x3ce   :  { %v3705_v41 = vpop.eup %3704 }
 0x3cf   :  { %v3707_v45 = vpop.eup %3706 }
 0x3d0   :  { %726 = vrot.lane.b32.xlu0 %v3703_v36, %s4177_s3  ;;  %v3709_v44 = vpop.eup %3708 }
 0x3d1   :  { %728 = vrot.lane.b32.xlu1 %v3701_v43, %s4177_s3  ;;  %v3711_v54 = vpop.eup %3710 }
 0x3d2   :  { %v672_v58 = vadd.f32 1.0, %v3711_v54  ;;  %v3713_v61 = vpop.eup %3712 }
 0x3d3   :  { %v3715_v55 = vpop.eup %3714  ;;  %v673_v63 = vadd.f32 1.0, %v3713_v61 }
 0x3d4   :  { %730 = vrot.lane.b32.xlu0 %v3707_v45, %s4177_s3  ;;  %3722 = vrcp.f32 %v672_v58  ;;  %v3717_v0 = vpop.eup %3716  ;;  %v674_v2 = vadd.f32 1.0, %v3715_v55 }
 0x3d5   :  { %732 = vrot.lane.b32.xlu1 %v3705_v41, %s4177_s3  ;;  %3724 = vpow2.f32 %v3311_v49  ;;  %v3719_v3 = vpop.eup %3718  ;;  %v676_v6 = vadd.f32 1.0, %v3717_v0 }
 0x3d6   :  { %3726 = vpow2.f32 %v3313_v60  ;;  %v3721_v5 = vpop.eup %3720  ;;  %v675_v12 = vadd.f32 1.0, %v3719_v3 }
 0x3d7   :  { %3728 = vrcp.f32 %v673_v63  ;;  %v678_v19 = vadd.f32 1.0, %v3721_v5 }
 0x3d8   :  { %734 = vrot.lane.b32.xlu0 %v3709_v44, %s4177_s3  ;;  %3730 = vrcp.f32 %v674_v2 }
 0x3d9   :  { %3732 = vrcp.f32 %v676_v6 }
 0x3da   :  { %3734 = vrcp.f32 %v675_v12 }
 0x3db   :  { %3736 = vrcp.f32 %v678_v19 }
 0x3de   :  { %v4427_v8 = vpop.eup %3722 }
 0x3df   :  { %v3725_v14 = vpop.eup %3724  ;;  %v704_v54 = vmul.f32 %v4427_v8, %v4337_v62 }
 0x3e0   :  { %v677_v20 = vadd.f32 1.0, %v3725_v14  ;;  %v3727_v21 = vpop.eup %3726 }
 0x3e1   :  { %v679_v22 = vadd.f32 1.0, %v3727_v21  ;;  %v4431_v24 = vpop.eup %3728 }
 0x3e2   :  { %3738 = vrcp.f32 %v677_v20  ;;  %v4433_v26 = vpop.eup %3730  ;;  %v705_v58 = vmul.f32 %v4431_v24, %v4333_v59 }
 0x3e3   :  { %3740 = vrcp.f32 %v679_v22  ;;  %v4438_v30 = vpop.eup %3732  ;;  %v706_v49 = vmul.f32 %v4433_v26, %v4349_v7 }
 0x3e4   :  { %v4441_v34 = vpop.eup %3734  ;;  %v708_v62 = vmul.f32 %v4438_v30, %v4345_v4 }
 0x3e5   :  { %v4446_v43 = vpop.eup %3736  ;;  %v707_v59 = vmul.f32 %v4441_v34, %v4341_v1 }
 0x3e6   :  { %v710_v6 = vmul.f32 %v4446_v43, %v4353_v13 }
 0x3ec   :  { %v4449_v41 = vpop.eup %3738 }
 0x3ed   :  { %v4455_v48 = vpop.eup %3740  ;;  %v709_v4 = vmul.f32 %v4449_v41, %v4358_v16 }
 0x43b   :  { %v721_v11 = vpop.permute.xlu1 %720 }
 0x43c   :  { %v744_v15 = vmul.f32 %v4427_v8, %v721_v11 }
 0x43e   :  { %760 = vrot.lane.b32.xlu1 %v744_v15, %s4178_s24  ;;  %v725_v27 = vpop.permute.xlu0 %724  ;;  %v711_v15 = vmul.f32 %v4455_v48, %v4363_v23 }
 0x43f   :  { %v723_v25 = vpop.permute.xlu1 %722  ;;  %v746_v29 = vmul.f32 %v4433_v26, %v725_v27 }
 0x440   :  { %v745_v28 = vmul.f32 %v4431_v24, %v723_v25 }
 0x441   :  { %764 = vrot.lane.b32.xlu0 %v746_v29, %s4178_s24 }
 0x442   :  { %762 = vrot.lane.b32.xlu1 %v745_v28, %s4178_s24  ;;  %v727_v38 = vpop.permute.xlu0 %726 }
 0x443   :  { %v729_v32 = vpop.permute.xlu1 %728  ;;  %v747_v31 = vmul.f32 %v4441_v34, %v727_v38 }
 0x444   :  { %v748_v42 = vmul.f32 %v4438_v30, %v729_v32 }
 0x445   :  { %766 = vrot.lane.b32.xlu0 %v747_v31, %s4178_s24 }
 0x446   :  { %768 = vrot.lane.b32.xlu1 %v748_v42, %s4178_s24  ;;  %v731_v45 = vpop.permute.xlu0 %730 }
 0x447   :  { %v733_v36 = vpop.permute.xlu1 %732  ;;  %v749_v46 = vmul.f32 %v4449_v41, %v731_v45 }
 0x448   :  { %v750_v44 = vmul.f32 %v4446_v43, %v733_v36 }
 0x449   :  { %770 = vrot.lane.b32.xlu0 %v749_v46, %s4178_s24 }
 0x44a   :  { %772 = vrot.lane.b32.xlu1 %v750_v44, %s4178_s24  ;;  %v735_v51 = vpop.permute.xlu0 %734 }
 0x44b   :  { %v751_v53 = vmul.f32 %v4455_v48, %v735_v51 }
 0x44d   :  { %774 = vrot.lane.b32.xlu0 %v751_v53, %s4178_s24 }
 0x4b0   :  { %v761_v57 = vpop.permute.xlu1 %760 }
 0x4b1   :  { %v4461_v52 = vadd.f32 %v761_v57, %v704_v54 }
 0x4b3   :  { %3742 = vtanh.f32 %v4461_v52  ;;  %v765_v61 = vpop.permute.xlu0 %764 }
 0x4b4   :  { %v763_v60 = vpop.permute.xlu1 %762  ;;  %v4470_v63 = vadd.f32 %v765_v61, %v706_v49 }
 0x4b5   :  { %v4468_v55 = vadd.f32 %v763_v60, %v705_v58 }
 0x4b7   :  { %3744 = vtanh.f32 %v4468_v55  ;;  %v767_v3 = vpop.permute.xlu0 %766 }
 0x4b8   :  { %3746 = vtanh.f32 %v4470_v63  ;;  %v769_v2 = vpop.permute.xlu1 %768  ;;  %v4481_v5 = vadd.f32 %v767_v3, %v707_v59 }
 0x4b9   :  { %v4478_v7 = vadd.f32 %v769_v2, %v708_v62 }
 0x4bb   :  { %3748 = vtanh.f32 %v4478_v7  ;;  %v771_v1 = vpop.permute.xlu0 %770 }
 0x4bc   :  { %3750 = vtanh.f32 %v4481_v5  ;;  %v773_v11 = vpop.permute.xlu1 %772  ;;  %v4491_v14 = vadd.f32 %v771_v1, %v709_v4  ;;  %v880_v4 = vld [vmem:[#allocation2 + $0x2] sm:$0x1] }
 0x4bd   :  { %v3743_v0 = vpop.eup %3742  ;;  %v4489_v12 = vadd.f32 %v773_v11, %v710_v6 }
 0x4be   :  { %808 = vrot.lane.b32.xlu1 %v3743_v0, %s4177_s3 }
 0x4bf   :  { %3752 = vtanh.f32 %v4489_v12  ;;  %v775_v13 = vpop.permute.xlu0 %774 }
 0x4c0   :  { %3754 = vtanh.f32 %v4491_v14  ;;  %v4497_v21 = vadd.f32 %v775_v13, %v711_v15  ;;  %v881_v13 = vld [vmem:[#allocation2 + $0xa] sm:$0x1] }
 0x4c1   :  { %v3745_v19 = vpop.eup %3744 }
 0x4c2   :  { %v3747_v20 = vpop.eup %3746  ;;  %810 = vrot.lane.b32.xlu1 %v3745_v19, %s4177_s3  ;;  %3756 = vtanh.f32 %v4497_v21 }
 0x4c3   :  { %812 = vrot.lane.b32.xlu0 %v3747_v20, %s4177_s3  ;;  %v882_v20 = vld [vmem:[#allocation2 + $0x12] sm:$0x1] }
 0x4c5   :  { %v3749_v16 = vpop.eup %3748 }
 0x4c6   :  { %v3751_v22 = vpop.eup %3750  ;;  %816 = vrot.lane.b32.xlu1 %v3749_v16, %s4177_s3 }
 0x4c7   :  { %814 = vrot.lane.b32.xlu0 %v3751_v22, %s4177_s3 }
 0x4c9   :  { %v3753_v25 = vpop.eup %3752 }
 0x4ca   :  { %v3755_v27 = vpop.eup %3754  ;;  %820 = vrot.lane.b32.xlu1 %v3753_v25, %s4177_s3 }
 0x4cb   :  { %818 = vrot.lane.b32.xlu0 %v3755_v27, %s4177_s3 }
 0x4cc   :  { %v3757_v23 = vpop.eup %3756 }
 0x4cf   :  { %822 = vrot.lane.b32.xlu0 %v3757_v23, %s4177_s3  ;;  %v884_v23 = vld [vmem:[#allocation2 + $0x22] sm:$0x1] }
 0x530   :  { %v809_v28 = vpop.permute.xlu1 %808 }
 0x531   :  { %v4514_v31 = vmul.f32 %v4427_v8, %v809_v28  ;;  %v883_v28 = vld [vmem:[#allocation2 + $0x1a] sm:$0x1] }
 0x534   :  { %v811_v29 = vpop.permute.xlu1 %810 }
 0x535   :  { %v813_v32 = vpop.permute.xlu0 %812  ;;  %v4508_v38 = vmul.f32 %v4431_v24, %v811_v29 }
 0x536   :  { %v4511_v42 = vmul.f32 %v4433_v26, %v813_v32 }
 0x537   :  { %v888_v36 = vrot.slane %v4508_v38, 7 }
 0x538   :  { %v817_v45 = vpop.permute.xlu1 %816  ;;  %v890_v44 = vrot.slane %v4511_v42, 6 }
 0x539   :  { %v889_v46 = vsel %vm530_vm2, %v888_v36, %v4514_v31  ;;  %v815_v51 = vpop.permute.xlu0 %814  ;;  %v4521_v53 = vmul.f32 %v4438_v30, %v817_v45 }
 0x53a   :  { %v4524_v24 = vmul.f32 %v4441_v34, %v815_v51  ;;  %v891_v26 = vsel %vm533_vm3, %v890_v44, %v889_v46  ;;  %v886_v46 = vld [vmem:[#allocation2 + $0x32] sm:$0x1]  ;;  %v885_v51 = vld [vmem:[#allocation2 + $0x2a] sm:$0x1] }
 0x53b   :  { %v894_v8 = vrot.slane %v4521_v53, 4 }
 0x53c   :  { %v892_v54 = vrot.slane %v4524_v24, 5  ;;  %v821_v57 = vpop.permute.xlu1 %820 }
 0x53d   :  { %v819_v58 = vpop.permute.xlu0 %818  ;;  %v4530_v49 = vmul.f32 %v4446_v43, %v821_v57  ;;  %v887_v57 = vld [vmem:[#allocation2 + $0x3a] sm:$0x1] }
 0x53e   :  { %v893_v60 = vsel %vm536_vm4, %v892_v54, %v891_v26  ;;  %v4534_v61 = vmul.f32 %v4449_v41, %v819_v58 }
 0x53f   :  { %5582 = vst [vmem:[#allocation7_spill] sm:$0xff] %v4530_v49  ;;  %v895_v30 = vsel %vm539_vm5, %v894_v8, %v893_v60  ;;  %v898_v34 = vrot.slane %v4530_v49, 2 }
 0x540   :  { %5583 = vst [vmem:[#allocation8_spill] sm:$0xff] %v4534_v61  ;;  %v896_v62 = vrot.slane %v4534_v61, 3 }
 0x541   :  { %v823_v0 = vpop.permute.xlu0 %822 }
 0x542   :  { %v4540_v59 = vmul.f32 %v4455_v48, %v823_v0  ;;  %v897_v2 = vsel %vm542_vm6, %v896_v62, %v895_v30 }
 0x543   :  { %v899_v43 = vsel %vm545_vm7, %v898_v34, %v897_v2 }
 0x544   :  { %5584 = vst [vmem:[#allocation9_spill] sm:$0xff] %v4540_v59  ;;  %v900_v3 = vrot.slane %v4540_v59, 1 }
 0x546   :  { %v901_v6 = vsel %vm548_vm8, %v900_v3, %v899_v43 }
 0x547   :  { %902 = vrot.lane.b32.xlu1 %v901_v6, %s4178_s24 }
 0x5b9   :  { %v903_v41 = vpop.permute.xlu1 %902 }
 0x5ba   :  { %3486 = vmatmul.mubr.msk.f32.vlgmr.msra.gmra.mrb[4].mxu0 %vm190_vm9, %v903_v41 }
 0x5bb   :  { %3593 = vmatpush3.bf16.msra.mxu0 %v4240_v9  ;;  %3507 = vmatprep.mubr.msk.f32.mxu0 %vm4175_vm1, %v5556_v18 }
 0x5bc   :  { %3594 = vmatprep.subr.bf16.mxu0 %v5555_v10 }
 0x5bf   :  { %3596 = vmatpush3.bf16.msra.mxu0 %v4266_v17 }
 0x5c0   :  { %3603 = vmatprep.subr.bf16.mxu0 %v5555_v10 }
 0x68d   :  { %v972_v48 = vpop.f32.mrb[4].mxu0 }
 0x68e   :  { %v3487_v11 = vpop.f32.mrb[5].mxu0  ;;  %v992_v1 = vadd.f32 %v972_v48, %v880_v4  ;;  %v977_v15 = vrot.slane %v972_v48, 1  ;;  %v978_v19 = vrot.slane %v972_v48, 2  ;;  %v980_v16 = vrot.slane %v972_v48, 4 }
 0x68f   :  { %v979_v25 = vrot.slane %v972_v48, 3  ;;  %v982_v29 = vrot.slane %v972_v48, 6  ;;  %v981_v45 = vrot.slane %v972_v48, 5  ;;  %v983_v8 = vrot.slane %v972_v48, 7 }
 0x690   :  { %3758 = vtanh.f32 %v992_v1  ;;  %v993_v22 = vadd.f32 %v977_v15, %v881_v13  ;;  %v994_v27 = vadd.f32 %v978_v19, %v882_v20  ;;  %v996_v32 = vadd.f32 %v980_v16, %v884_v23 }
 0x691   :  { %v995_v44 = vadd.f32 %v979_v25, %v883_v28  ;;  %v998_v26 = vadd.f32 %v982_v29, %v886_v46  ;;  %v997_v54 = vadd.f32 %v981_v45, %v885_v51  ;;  %v999_v58 = vadd.f32 %v983_v8, %v887_v57 }
 0x692   :  { %3760 = vtanh.f32 %v993_v22  ;;  %v3315_v3 = vmul.f32 -1.442695, %v992_v1  ;;  %v3316_v6 = vmul.f32 -1.442695, %v993_v22  ;;  %v3317_v41 = vmul.f32 -1.442695, %v994_v27 }
 0x693   :  { %3762 = vtanh.f32 %v994_v27  ;;  %v3319_v48 = vmul.f32 -1.442695, %v996_v32  ;;  %v3318_v11 = vmul.f32 -1.442695, %v995_v44  ;;  %v3321_v15 = vmul.f32 -1.442695, %v998_v26 }
 0x694   :  { %3764 = vtanh.f32 %v996_v32  ;;  %v3320_v13 = vmul.f32 -1.442695, %v997_v54  ;;  %v3322_v20 = vmul.f32 -1.442695, %v999_v58 }
 0x695   :  { %3766 = vtanh.f32 %v995_v44 }
 0x696   :  { %3768 = vtanh.f32 %v998_v26 }
 0x697   :  { %3770 = vtanh.f32 %v997_v54 }
 0x698   :  { %3772 = vtanh.f32 %v999_v58 }
 0x699   :  { %3774 = vpow2.f32 %v3315_v3 }
 0x69a   :  { %v3759_v36 = vpop.eup %3758  ;;  %3776 = vpow2.f32 %v3316_v6 }
 0x69b   :  { %1072 = vrot.lane.b32.xlu0 %v3759_v36, %s4177_s3  ;;  %3778 = vpow2.f32 %v3317_v41 }
 0x69c   :  { %v3761_v60 = vpop.eup %3760  ;;  %3780 = vpow2.f32 %v3319_v48 }
 0x69d   :  { %v3763_v30 = vpop.eup %3762  ;;  %3782 = vpow2.f32 %v3318_v11 }
 0x69e   :  { %1076 = vrot.lane.b32.xlu1 %v3763_v30, %s4177_s3  ;;  %v3765_v34 = vpop.eup %3764  ;;  %3784 = vpow2.f32 %v3321_v15 }
 0x69f   :  { %1074 = vrot.lane.b32.xlu0 %v3761_v60, %s4177_s3  ;;  %v3767_v62 = vpop.eup %3766 }
 0x6a0   :  { %v3769_v0 = vpop.eup %3768 }
 0x6a1   :  { %v3771_v2 = vpop.eup %3770 }
 0x6a2   :  { %1078 = vrot.lane.b32.xlu1 %v3767_v62, %s4177_s3  ;;  %v3773_v43 = vpop.eup %3772 }
 0x6a3   :  { %1080 = vrot.lane.b32.xlu0 %v3765_v34, %s4177_s3  ;;  %v3775_v4 = vpop.eup %3774 }
 0x6a4   :  { %v1024_v19 = vadd.f32 1.0, %v3775_v4  ;;  %v3777_v16 = vpop.eup %3776 }
 0x6a5   :  { %v3779_v25 = vpop.eup %3778  ;;  %v1025_v1 = vadd.f32 1.0, %v3777_v16 }
 0x6a6   :  { %1082 = vrot.lane.b32.xlu1 %v3771_v2, %s4177_s3  ;;  %3786 = vrcp.f32 %v1024_v19  ;;  %v3781_v22 = vpop.eup %3780  ;;  %v1026_v27 = vadd.f32 1.0, %v3779_v25 }
 0x6a7   :  { %1084 = vrot.lane.b32.xlu0 %v3769_v0, %s4177_s3  ;;  %3788 = vpow2.f32 %v3320_v13  ;;  %v3783_v23 = vpop.eup %3782  ;;  %v1028_v29 = vadd.f32 1.0, %v3781_v22 }
 0x6a8   :  { %3790 = vpow2.f32 %v3322_v20  ;;  %v3785_v28 = vpop.eup %3784  ;;  %v1027_v45 = vadd.f32 1.0, %v3783_v23 }
 0x6a9   :  { %3792 = vrcp.f32 %v1025_v1  ;;  %v1030_v51 = vadd.f32 1.0, %v3785_v28 }
 0x6aa   :  { %1086 = vrot.lane.b32.xlu1 %v3773_v43, %s4177_s3  ;;  %3794 = vrcp.f32 %v1026_v27 }
 0x6ab   :  { %3796 = vrcp.f32 %v1028_v29 }
 0x6ac   :  { %3798 = vrcp.f32 %v1027_v45 }
 0x6ad   :  { %3800 = vrcp.f32 %v1030_v51 }
 0x6b0   :  { %v4562_v32 = vpop.eup %3786 }
 0x6b1   :  { %v3789_v44 = vpop.eup %3788  ;;  %v1056_v1 = vmul.f32 %v4562_v32, %v4461_v52 }
 0x6b2   :  { %v1029_v26 = vadd.f32 1.0, %v3789_v44  ;;  %v3791_v8 = vpop.eup %3790 }
 0x6b3   :  { %v1031_v54 = vadd.f32 1.0, %v3791_v8  ;;  %v4566_v57 = vpop.eup %3792 }
 0x6b4   :  { %3802 = vrcp.f32 %v1029_v26  ;;  %v4568_v60 = vpop.eup %3794  ;;  %v1057_v23 = vmul.f32 %v4566_v57, %v4468_v55 }
 0x6b5   :  { %3804 = vrcp.f32 %v1031_v54  ;;  %v4573_v0 = vpop.eup %3796  ;;  %v1058_v28 = vmul.f32 %v4568_v60, %v4470_v63 }
 0x6b6   :  { %v4576_v43 = vpop.eup %3798  ;;  %v1060_v52 = vmul.f32 %v4573_v0, %v4478_v7 }
 0x6b7   :  { %v4581_v48 = vpop.eup %3800  ;;  %v1059_v55 = vmul.f32 %v4576_v43, %v4481_v5 }
 0x6b8   :  { %v1062_v54 = vmul.f32 %v4581_v48, %v4489_v12 }
 0x6be   :  { %v4584_v11 = vpop.eup %3802 }
 0x6bf   :  { %v4590_v20 = vpop.eup %3804  ;;  %v1061_v7 = vmul.f32 %v4584_v11, %v4491_v14 }
 0x70d   :  { %v1073_v36 = vpop.permute.xlu0 %1072 }
 0x70e   :  { %v1096_v46 = vmul.f32 %v4562_v32, %v1073_v36 }
 0x710   :  { %1112 = vrot.lane.b32.xlu0 %v1096_v46, %s4178_s24  ;;  %v1077_v30 = vpop.permute.xlu1 %1076 }
 0x711   :  { %v1075_v58 = vpop.permute.xlu0 %1074  ;;  %v1098_v62 = vmul.f32 %v4568_v60, %v1077_v30 }
 0x712   :  { %v1097_v34 = vmul.f32 %v4566_v57, %v1075_v58 }
 0x713   :  { %1116 = vrot.lane.b32.xlu1 %v1098_v62, %s4178_s24  ;;  %v1063_v62 = vmul.f32 %v4590_v20, %v4497_v21 }
 0x714   :  { %1114 = vrot.lane.b32.xlu0 %v1097_v34, %s4178_s24  ;;  %v1079_v3 = vpop.permute.xlu1 %1078 }
 0x715   :  { %v1081_v2 = vpop.permute.xlu0 %1080  ;;  %v1099_v41 = vmul.f32 %v4576_v43, %v1079_v3 }
 0x716   :  { %v1100_v6 = vmul.f32 %v4573_v0, %v1081_v2 }
 0x717   :  { %1118 = vrot.lane.b32.xlu1 %v1099_v41, %s4178_s24 }
 0x718   :  { %1120 = vrot.lane.b32.xlu0 %v1100_v6, %s4178_s24  ;;  %v1083_v15 = vpop.permute.xlu1 %1082 }
 0x719   :  { %v1085_v4 = vpop.permute.xlu0 %1084  ;;  %v1101_v13 = vmul.f32 %v4584_v11, %v1083_v15 }
 0x71a   :  { %v1102_v19 = vmul.f32 %v4581_v48, %v1085_v4 }
 0x71b   :  { %1122 = vrot.lane.b32.xlu1 %v1101_v13, %s4178_s24 }
 0x71c   :  { %1124 = vrot.lane.b32.xlu0 %v1102_v19, %s4178_s24  ;;  %v1087_v16 = vpop.permute.xlu1 %1086 }
 0x71d   :  { %v1103_v25 = vmul.f32 %v4590_v20, %v1087_v16 }
 0x71f   :  { %1126 = vrot.lane.b32.xlu1 %v1103_v25, %s4178_s24 }
 0x782   :  { %v1113_v22 = vpop.permute.xlu0 %1112 }
 0x783   :  { %v4596_v27 = vadd.f32 %v1113_v22, %v1056_v1 }
 0x785   :  { %3806 = vtanh.f32 %v4596_v27  ;;  %v1117_v36 = vpop.permute.xlu1 %1116 }
 0x786   :  { %v1115_v29 = vpop.permute.xlu0 %1114  ;;  %v4605_v44 = vadd.f32 %v1117_v36, %v1058_v28 }
 0x787   :  { %v4603_v45 = vadd.f32 %v1115_v29, %v1057_v23 }
 0x789   :  { %3808 = vtanh.f32 %v4603_v45  ;;  %v1119_v26 = vpop.permute.xlu1 %1118 }
 0x78a   :  { %3810 = vtanh.f32 %v4605_v44  ;;  %v1121_v51 = vpop.permute.xlu0 %1120  ;;  %v4616_v8 = vadd.f32 %v1119_v26, %v1059_v55 }
 0x78b   :  { %v4613_v63 = vadd.f32 %v1121_v51, %v1060_v52 }
 0x78d   :  { %3812 = vtanh.f32 %v4613_v63  ;;  %v1123_v5 = vpop.permute.xlu1 %1122 }
 0x78e   :  { %3814 = vtanh.f32 %v4616_v8  ;;  %v1125_v58 = vpop.permute.xlu0 %1124  ;;  %v4626_v34 = vadd.f32 %v1123_v5, %v1061_v7 }
 0x78f   :  { %v3807_v46 = vpop.eup %3806  ;;  %v4624_v30 = vadd.f32 %v1125_v58, %v1062_v54 }
 0x790   :  { %1160 = vrot.lane.b32.xlu0 %v3807_v46, %s4177_s3 }
 0x791   :  { %3816 = vtanh.f32 %v4624_v30  ;;  %v1127_v12 = vpop.permute.xlu1 %1126 }
 0x792   :  { %3818 = vtanh.f32 %v4626_v34  ;;  %v4632_v6 = vadd.f32 %v1127_v12, %v1063_v62 }
 0x793   :  { %v3809_v2 = vpop.eup %3808 }
 0x794   :  { %v3811_v3 = vpop.eup %3810  ;;  %1162 = vrot.lane.b32.xlu0 %v3809_v2, %s4177_s3  ;;  %3820 = vtanh.f32 %v4632_v6 }
 0x795   :  { %1164 = vrot.lane.b32.xlu1 %v3811_v3, %s4177_s3 }
 0x797   :  { %v3813_v14 = vpop.eup %3812 }
 0x798   :  { %v3815_v41 = vpop.eup %3814  ;;  %1168 = vrot.lane.b32.xlu0 %v3813_v14, %s4177_s3 }
 0x799   :  { %1166 = vrot.lane.b32.xlu1 %v3815_v41, %s4177_s3  ;;  %v1232_v41 = vld [vmem:[#allocation2 + $0x3] sm:$0x1] }
 0x79b   :  { %v3817_v4 = vpop.eup %3816 }
 0x79c   :  { %v3819_v15 = vpop.eup %3818  ;;  %1172 = vrot.lane.b32.xlu0 %v3817_v4, %s4177_s3 }
 0x79d   :  { %1170 = vrot.lane.b32.xlu1 %v3819_v15, %s4177_s3 }
 0x79e   :  { %v3821_v21 = vpop.eup %3820 }
 0x7a1   :  { %1174 = vrot.lane.b32.xlu1 %v3821_v21, %s4177_s3 }
 0x802   :  { %v1161_v19 = vpop.permute.xlu0 %1160 }
 0x803   :  { %v4649_v22 = vmul.f32 %v4562_v32, %v1161_v19 }
 0x806   :  { %v1163_v13 = vpop.permute.xlu0 %1162 }
 0x807   :  { %v1165_v16 = vpop.permute.xlu1 %1164  ;;  %v4643_v25 = vmul.f32 %v4566_v57, %v1163_v13  ;;  %v1233_v13 = vld [vmem:[#allocation2 + $0xb] sm:$0x1] }
 0x808   :  { %v4646_v1 = vmul.f32 %v4568_v60, %v1165_v16  ;;  %v1234_v16 = vld [vmem:[#allocation2 + $0x13] sm:$0x1] }
 0x809   :  { %v1240_v23 = vrot.slane %v4643_v25, 7 }
 0x80a   :  { %v1169_v28 = vpop.permute.xlu0 %1168  ;;  %v1242_v29 = vrot.slane %v4646_v1, 6 }
 0x80b   :  { %v1241_v36 = vsel %vm530_vm2, %v1240_v23, %v4649_v22  ;;  %v1167_v52 = vpop.permute.xlu1 %1166  ;;  %v4656_v46 = vmul.f32 %v4573_v0, %v1169_v28 }
 0x80c   :  { %v4659_v57 = vmul.f32 %v4576_v43, %v1167_v52  ;;  %v1243_v60 = vsel %vm533_vm3, %v1242_v29, %v1241_v36  ;;  %v1236_v52 = vld [vmem:[#allocation2 + $0x23] sm:$0x1] }
 0x80d   :  { %v1246_v32 = vrot.slane %v4656_v46, 4 }
 0x80e   :  { %v1244_v55 = vrot.slane %v4659_v57, 5  ;;  %v1173_v51 = vpop.permute.xlu0 %1172 }
 0x80f   :  { %v1171_v26 = vpop.permute.xlu1 %1170  ;;  %v4665_v54 = vmul.f32 %v4581_v48, %v1173_v51 }
 0x810   :  { %v1245_v7 = vsel %vm536_vm4, %v1244_v55, %v1243_v60  ;;  %v4669_v58 = vmul.f32 %v4584_v11, %v1171_v26  ;;  %v1235_v60 = vld [vmem:[#allocation2 + $0x1b] sm:$0x1] }
 0x811   :  { %5585 = vst [vmem:[#allocation10_spill] sm:$0xff] %v4665_v54  ;;  %v1247_v0 = vsel %vm539_vm5, %v1246_v32, %v1245_v7  ;;  %v1250_v43 = vrot.slane %v4665_v54, 2  ;;  %v2289_v54 = vld [vmem:[#allocation2 + $0xe] sm:$0x1] }
 0x812   :  { %5586 = vst [vmem:[#allocation11_spill] sm:$0xff] %v4669_v58  ;;  %v1248_v5 = vrot.slane %v4669_v58, 3 }
 0x813   :  { %v1175_v62 = vpop.permute.xlu1 %1174 }
 0x814   :  { %v4675_v2 = vmul.f32 %v4590_v20, %v1175_v62  ;;  %v1249_v12 = vsel %vm542_vm6, %v1248_v5, %v1247_v0  ;;  %v1238_v0 = vld [vmem:[#allocation2 + $0x33] sm:$0x1] }
 0x815   :  { %v1251_v48 = vsel %vm545_vm7, %v1250_v43, %v1249_v12  ;;  %v1237_v43 = vld [vmem:[#allocation2 + $0x2b] sm:$0x1] }
 0x816   :  { %5587 = vst [vmem:[#allocation12_spill] sm:$0xff] %v4675_v2  ;;  %v1252_v3 = vrot.slane %v4675_v2, 1 }
 0x818   :  { %v1253_v14 = vsel %vm548_vm8, %v1252_v3, %v1251_v48  ;;  %v1239_v48 = vld [vmem:[#allocation2 + $0x3b] sm:$0x1] }
 0x819   :  { %1254 = vrot.lane.b32.xlu0 %v1253_v14, %s4178_s24 }
 0x88b   :  { %v1255_v11 = vpop.permute.xlu0 %1254 }
 0x88c   :  { %3497 = vmatmul.mubr.msk.f32.vlgmr.msra.gmra.mrb[8].mxu1 %vm190_vm9, %v1255_v11 }
 0x88d   :  { %3599 = vmatpush3.bf16.msra.mxu1 %v4240_v9  ;;  %3518 = vmatprep.mubr.msk.f32.mxu1 %vm4175_vm1, %v5556_v18 }
 0x88e   :  { %3600 = vmatprep.subr.bf16.mxu1 %v5555_v10 }
 0x891   :  { %3602 = vmatpush3.bf16.msra.mxu1 %v4266_v17 }
 0x892   :  { %3609 = vmatprep.subr.bf16.mxu1 %v5555_v10 }
 0x95f   :  { %v1324_v20 = vpop.f32.mrb[8].mxu1 }
 0x960   :  { %v3498_v4 = vpop.f32.mrb[9].mxu1  ;;  %v1344_v15 = vadd.f32 %v1324_v20, %v1232_v41  ;;  %v1329_v21 = vrot.slane %v1324_v20, 1  ;;  %v1330_v19 = vrot.slane %v1324_v20, 2  ;;  %v1332_v23 = vrot.slane %v1324_v20, 4 }
 0x961   :  { %v1331_v29 = vrot.slane %v1324_v20, 3  ;;  %v1334_v32 = vrot.slane %v1324_v20, 6  ;;  %v1333_v26 = vrot.slane %v1324_v20, 5  ;;  %v1335_v62 = vrot.slane %v1324_v20, 7 }
 0x962   :  { %3822 = vtanh.f32 %v1344_v15  ;;  %v1345_v28 = vadd.f32 %v1329_v21, %v1233_v13  ;;  %v1346_v36 = vadd.f32 %v1330_v19, %v1234_v16  ;;  %v1348_v55 = vadd.f32 %v1332_v23, %v1236_v52 }
 0x963   :  { %v1347_v7 = vadd.f32 %v1331_v29, %v1235_v60  ;;  %v1350_v5 = vadd.f32 %v1334_v32, %v1238_v0  ;;  %v1349_v12 = vadd.f32 %v1333_v26, %v1237_v43  ;;  %v1351_v3 = vadd.f32 %v1335_v62, %v1239_v48 }
 0x964   :  { %3824 = vtanh.f32 %v1345_v28  ;;  %v3324_v13 = vmul.f32 -1.442695, %v1344_v15  ;;  %v3325_v16 = vmul.f32 -1.442695, %v1345_v28  ;;  %v3326_v23 = vmul.f32 -1.442695, %v1346_v36 }
 0x965   :  { %3826 = vtanh.f32 %v1346_v36  ;;  %v3328_v29 = vmul.f32 -1.442695, %v1348_v55  ;;  %v3327_v60 = vmul.f32 -1.442695, %v1347_v7  ;;  %v3330_v32 = vmul.f32 -1.442695, %v1350_v5 }
 0x966   :  { %3828 = vtanh.f32 %v1348_v55  ;;  %v3329_v26 = vmul.f32 -1.442695, %v1349_v12  ;;  %v3331_v0 = vmul.f32 -1.442695, %v1351_v3 }
 0x967   :  { %3830 = vtanh.f32 %v1347_v7 }
 0x968   :  { %3832 = vtanh.f32 %v1350_v5 }
 0x969   :  { %3834 = vtanh.f32 %v1349_v12 }
 0x96a   :  { %3836 = vtanh.f32 %v1351_v3 }
 0x96b   :  { %3838 = vpow2.f32 %v3324_v13 }
 0x96c   :  { %v3823_v51 = vpop.eup %3822  ;;  %3840 = vpow2.f32 %v3325_v16 }
 0x96d   :  { %1424 = vrot.lane.b32.xlu1 %v3823_v51, %s4177_s3  ;;  %3842 = vpow2.f32 %v3326_v23 }
 0x96e   :  { %v3825_v14 = vpop.eup %3824  ;;  %3844 = vpow2.f32 %v3328_v29 }
 0x96f   :  { %v3827_v11 = vpop.eup %3826  ;;  %3846 = vpow2.f32 %v3327_v60 }
 0x970   :  { %1428 = vrot.lane.b32.xlu0 %v3827_v11, %s4177_s3  ;;  %v3829_v41 = vpop.eup %3828  ;;  %3848 = vpow2.f32 %v3330_v32 }
 0x971   :  { %1426 = vrot.lane.b32.xlu1 %v3825_v14, %s4177_s3  ;;  %v3831_v4 = vpop.eup %3830 }
 0x972   :  { %v3833_v20 = vpop.eup %3832 }
 0x973   :  { %v3835_v21 = vpop.eup %3834 }
 0x974   :  { %1430 = vrot.lane.b32.xlu0 %v3831_v4, %s4177_s3  ;;  %v3837_v19 = vpop.eup %3836 }
 0x975   :  { %1432 = vrot.lane.b32.xlu1 %v3829_v41, %s4177_s3  ;;  %v3839_v52 = vpop.eup %3838 }
 0x976   :  { %v1376_v51 = vadd.f32 1.0, %v3839_v52  ;;  %v3841_v43 = vpop.eup %3840 }
 0x977   :  { %v3843_v62 = vpop.eup %3842  ;;  %v1377_v15 = vadd.f32 1.0, %v3841_v43 }
 0x978   :  { %1434 = vrot.lane.b32.xlu0 %v3835_v21, %s4177_s3  ;;  %3850 = vrcp.f32 %v1376_v51  ;;  %v3845_v28 = vpop.eup %3844  ;;  %v1378_v36 = vadd.f32 1.0, %v3843_v62 }
 0x979   :  { %1436 = vrot.lane.b32.xlu1 %v3833_v20, %s4177_s3  ;;  %3852 = vpow2.f32 %v3329_v26  ;;  %v3847_v48 = vpop.eup %3846  ;;  %v1380_v14 = vadd.f32 1.0, %v3845_v28 }
 0x97a   :  { %3854 = vpow2.f32 %v3331_v0  ;;  %v3849_v55 = vpop.eup %3848  ;;  %v1379_v11 = vadd.f32 1.0, %v3847_v48 }
 0x97b   :  { %3856 = vrcp.f32 %v1377_v15  ;;  %v1382_v3 = vadd.f32 1.0, %v3849_v55 }
 0x97c   :  { %1438 = vrot.lane.b32.xlu0 %v3837_v19, %s4177_s3  ;;  %3858 = vrcp.f32 %v1378_v36 }
 0x97d   :  { %3860 = vrcp.f32 %v1380_v14 }
 0x97e   :  { %3862 = vrcp.f32 %v1379_v11 }
 0x97f   :  { %3864 = vrcp.f32 %v1382_v3 }
 0x982   :  { %v4697_v7 = vpop.eup %3850 }
 0x983   :  { %v3853_v12 = vpop.eup %3852 }
 0x984   :  { %v1381_v4 = vadd.f32 1.0, %v3853_v12  ;;  %v3855_v20 = vpop.eup %3854  ;;  %v1408_v12 = vmul.f32 %v4697_v7, %v4596_v27 }
 0x985   :  { %v1383_v21 = vadd.f32 1.0, %v3855_v20  ;;  %v4701_v19 = vpop.eup %3856 }
 0x986   :  { %3866 = vrcp.f32 %v1381_v4  ;;  %v4703_v16 = vpop.eup %3858  ;;  %v1409_v4 = vmul.f32 %v4701_v19, %v4603_v45 }
 0x987   :  { %3868 = vrcp.f32 %v1383_v21  ;;  %v4708_v60 = vpop.eup %3860  ;;  %v1410_v20 = vmul.f32 %v4703_v16, %v4605_v44 }
 0x988   :  { %v4711_v51 = vpop.eup %3862  ;;  %v1412_v27 = vmul.f32 %v4708_v60, %v4613_v63 }
 0x989   :  { %v4716_v62 = vpop.eup %3864  ;;  %v1411_v45 = vmul.f32 %v4711_v51, %v4616_v8 }
 0x990   :  { %v4719_v28 = vpop.eup %3866 }
 0x991   :  { %v4725_v14 = vpop.eup %3868  ;;  %v1413_v63 = vmul.f32 %v4719_v28, %v4626_v34 }
 0x9df   :  { %v1425_v5 = vpop.permute.xlu1 %1424 }
 0x9e0   :  { %v1448_v41 = vmul.f32 %v4697_v7, %v1425_v5 }
 0x9e2   :  { %1464 = vrot.lane.b32.xlu1 %v1448_v41, %s4178_s24  ;;  %v1429_v23 = vpop.permute.xlu0 %1428 }
 0x9e3   :  { %v1427_v13 = vpop.permute.xlu1 %1426  ;;  %v1450_v52 = vmul.f32 %v4703_v16, %v1429_v23 }
 0x9e4   :  { %v1449_v29 = vmul.f32 %v4701_v19, %v1427_v13 }
 0x9e5   :  { %1468 = vrot.lane.b32.xlu0 %v1450_v52, %s4178_s24 }
 0x9e6   :  { %1466 = vrot.lane.b32.xlu1 %v1449_v29, %s4178_s24  ;;  %v1431_v26 = vpop.permute.xlu0 %1430 }
 0x9e7   :  { %v1433_v32 = vpop.permute.xlu1 %1432  ;;  %v1451_v43 = vmul.f32 %v4711_v51, %v1431_v26 }
 0x9e8   :  { %v1452_v0 = vmul.f32 %v4708_v60, %v1433_v32 }
 0x9e9   :  { %1470 = vrot.lane.b32.xlu0 %v1451_v43, %s4178_s24  ;;  %v1414_v43 = vmul.f32 %v4716_v62, %v4624_v30 }
 0x9ea   :  { %1472 = vrot.lane.b32.xlu1 %v1452_v0, %s4178_s24  ;;  %v1435_v36 = vpop.permute.xlu0 %1434 }
 0x9eb   :  { %v1437_v15 = vpop.permute.xlu1 %1436  ;;  %v1453_v55 = vmul.f32 %v4719_v28, %v1435_v36 }
 0x9ec   :  { %v1454_v48 = vmul.f32 %v4716_v62, %v1437_v15 }
 0x9ed   :  { %1474 = vrot.lane.b32.xlu0 %v1453_v55, %s4178_s24  ;;  %v1415_v55 = vmul.f32 %v4725_v14, %v4632_v6 }
 0x9ee   :  { %1476 = vrot.lane.b32.xlu1 %v1454_v48, %s4178_s24  ;;  %v1439_v5 = vpop.permute.xlu0 %1438 }
 0x9ef   :  { %v1455_v11 = vmul.f32 %v4725_v14, %v1439_v5 }
 0x9f1   :  { %1478 = vrot.lane.b32.xlu0 %v1455_v11, %s4178_s24 }
 0xa54   :  { %v1465_v41 = vpop.permute.xlu1 %1464 }
 0xa55   :  { %v4731_v3 = vadd.f32 %v1465_v41, %v1408_v12 }
 0xa57   :  { %3870 = vtanh.f32 %v4731_v3  ;;  %v1469_v13 = vpop.permute.xlu0 %1468 }
 0xa58   :  { %v1467_v21 = vpop.permute.xlu1 %1466  ;;  %v4740_v29 = vadd.f32 %v1469_v13, %v1410_v20 }
 0xa59   :  { %v4738_v23 = vadd.f32 %v1467_v21, %v1409_v4 }
 0xa5b   :  { %3872 = vtanh.f32 %v4738_v23  ;;  %v1471_v26 = vpop.permute.xlu0 %1470 }
 0xa5c   :  { %3874 = vtanh.f32 %v4740_v29  ;;  %v1473_v32 = vpop.permute.xlu1 %1472  ;;  %v4751_v0 = vadd.f32 %v1471_v26, %v1411_v45 }
 0xa5d   :  { %v4748_v44 = vadd.f32 %v1473_v32, %v1412_v27 }
 0xa5f   :  { %3876 = vtanh.f32 %v4748_v44  ;;  %v1475_v8 = vpop.permute.xlu0 %1474 }
 0xa60   :  { %3878 = vtanh.f32 %v4751_v0  ;;  %v1477_v15 = vpop.permute.xlu1 %1476  ;;  %v4761_v48 = vadd.f32 %v1475_v8, %v1413_v63 }
 0xa61   :  { %v3871_v52 = vpop.eup %3870  ;;  %v4759_v36 = vadd.f32 %v1477_v15, %v1414_v43 }
 0xa62   :  { %1512 = vrot.lane.b32.xlu1 %v3871_v52, %s4177_s3 }
 0xa63   :  { %3880 = vtanh.f32 %v4759_v36  ;;  %v1479_v30 = vpop.permute.xlu0 %1478 }
 0xa64   :  { %3882 = vtanh.f32 %v4761_v48  ;;  %v4767_v12 = vadd.f32 %v1479_v30, %v1415_v55 }
 0xa65   :  { %v3873_v5 = vpop.eup %3872 }
 0xa66   :  { %v3875_v11 = vpop.eup %3874  ;;  %1514 = vrot.lane.b32.xlu1 %v3873_v5, %s4177_s3  ;;  %3884 = vtanh.f32 %v4767_v12 }
 0xa67   :  { %1516 = vrot.lane.b32.xlu0 %v3875_v11, %s4177_s3 }
 0xa69   :  { %v3877_v34 = vpop.eup %3876 }
 0xa6a   :  { %v3879_v41 = vpop.eup %3878  ;;  %1520 = vrot.lane.b32.xlu1 %v3877_v34, %s4177_s3 }
 0xa6b   :  { %1518 = vrot.lane.b32.xlu0 %v3879_v41, %s4177_s3 }
 0xa6d   :  { %v3881_v4 = vpop.eup %3880 }
 0xa6e   :  { %v3883_v20 = vpop.eup %3882  ;;  %1524 = vrot.lane.b32.xlu1 %v3881_v4, %s4177_s3 }
 0xa6f   :  { %1522 = vrot.lane.b32.xlu0 %v3883_v20, %s4177_s3 }
 0xa70   :  { %v3885_v6 = vpop.eup %3884 }
 0xa73   :  { %1526 = vrot.lane.b32.xlu0 %v3885_v6, %s4177_s3 }
 0xad4   :  { %v1513_v21 = vpop.permute.xlu1 %1512 }
 0xad5   :  { %v4784_v32 = vmul.f32 %v4697_v7, %v1513_v21 }
 0xad8   :  { %v1515_v13 = vpop.permute.xlu1 %1514 }
 0xad9   :  { %v1517_v27 = vpop.permute.xlu0 %1516  ;;  %v4778_v52 = vmul.f32 %v4701_v19, %v1515_v13 }
 0xada   :  { %v4781_v45 = vmul.f32 %v4703_v16, %v1517_v27 }
 0xadb   :  { %v1592_v26 = vrot.slane %v4778_v52, 7 }
 0xadc   :  { %v1521_v43 = vpop.permute.xlu1 %1520  ;;  %v1594_v63 = vrot.slane %v4781_v45, 6 }
 0xadd   :  { %v1593_v15 = vsel %vm530_vm2, %v1592_v26, %v4784_v32  ;;  %v1519_v8 = vpop.permute.xlu0 %1518  ;;  %v4791_v55 = vmul.f32 %v4708_v60, %v1521_v43  ;;  %v1584_v43 = vld [vmem:[#allocation2 + $0x4] sm:$0x1] }
 0xade   :  { %v4794_v19 = vmul.f32 %v4711_v51, %v1519_v8  ;;  %v1595_v16 = vsel %vm533_vm3, %v1594_v63, %v1593_v15 }
 0xadf   :  { %v1598_v7 = vrot.slane %v4791_v55, 4 }
 0xae0   :  { %v1596_v5 = vrot.slane %v4794_v19, 5  ;;  %v1525_v30 = vpop.permute.xlu1 %1524 }
 0xae1   :  { %v1523_v11 = vpop.permute.xlu0 %1522  ;;  %v4800_v34 = vmul.f32 %v4716_v62, %v1525_v30 }
 0xae2   :  { %v1597_v41 = vsel %vm536_vm4, %v1596_v5, %v1595_v16  ;;  %v4804_v4 = vmul.f32 %v4719_v28, %v1523_v11  ;;  %v1586_v5 = vld [vmem:[#allocation2 + $0x14] sm:$0x1] }
 0xae3   :  { %5588 = vst [vmem:[#allocation13_spill] sm:$0xff] %v4800_v34  ;;  %v1599_v60 = vsel %vm539_vm5, %v1598_v7, %v1597_v41  ;;  %v1602_v51 = vrot.slane %v4800_v34, 2  ;;  %v1585_v7 = vld [vmem:[#allocation2 + $0xc] sm:$0x1] }
 0xae4   :  { %5589 = vst [vmem:[#allocation14_spill] sm:$0xff] %v4804_v4  ;;  %v1600_v20 = vrot.slane %v4804_v4, 3 }
 0xae5   :  { %v1527_v6 = vpop.permute.xlu0 %1526 }
 0xae6   :  { %v4810_v21 = vmul.f32 %v4725_v14, %v1527_v6  ;;  %v1601_v13 = vsel %vm542_vm6, %v1600_v20, %v1599_v60  ;;  %v1587_v20 = vld [vmem:[#allocation2 + $0x1c] sm:$0x1] }
 0xae7   :  { %v1603_v62 = vsel %vm545_vm7, %v1602_v51, %v1601_v13  ;;  %v1588_v51 = vld [vmem:[#allocation2 + $0x24] sm:$0x1] }
 0xae8   :  { %5590 = vst [vmem:[#allocation15_spill] sm:$0xff] %v4810_v21  ;;  %v1604_v27 = vrot.slane %v4810_v21, 1 }
 0xaea   :  { %v1605_v26 = vsel %vm548_vm8, %v1604_v27, %v1603_v62 }
 0xaeb   :  { %1606 = vrot.lane.b32.xlu1 %v1605_v26, %s4178_s24 }
 0xb5d   :  { %v1607_v28 = vpop.permute.xlu1 %1606 }
 0xb5e   :  { %3508 = vmatmul.mubr.msk.f32.vlgmr.msra.gmra.mrb[6].mxu0 %vm190_vm9, %v1607_v28  ;;  %v1590_v28 = vld [vmem:[#allocation2 + $0x34] sm:$0x1] }
 0xb5f   :  { %3605 = vmatpush3.bf16.msra.mxu0 %v4240_v9  ;;  %3529 = vmatprep.mubr.msk.f32.mxu0 %vm4175_vm1, %v5556_v18 }
 0xb60   :  { %3606 = vmatprep.subr.bf16.mxu0 %v5555_v10 }
 0xb63   :  { %3608 = vmatpush3.bf16.msra.mxu0 %v4266_v17 }
 0xc31   :  { %v1676_v14 = vpop.f32.mrb[6].mxu0 }
 0xc32   :  { %v3509_v63 = vpop.f32.mrb[7].mxu0  ;;  %v1696_v15 = vadd.f32 %v1676_v14, %v1584_v43  ;;  %v1681_v8 = vrot.slane %v1676_v14, 1  ;;  %v1682_v16 = vrot.slane %v1676_v14, 2  ;;  %v1684_v30 = vrot.slane %v1676_v14, 4  ;;  %v1589_v43 = vld [vmem:[#allocation2 + $0x2c] sm:$0x1] }
 0xc33   :  { %v1683_v41 = vrot.slane %v1676_v14, 3  ;;  %v1686_v6 = vrot.slane %v1676_v14, 6  ;;  %v1685_v27 = vrot.slane %v1676_v14, 5  ;;  %v1687_v10 = vrot.slane %v1676_v14, 7 }
 0xc34   :  { %3886 = vtanh.f32 %v1696_v15  ;;  %v1697_v11 = vadd.f32 %v1681_v8, %v1585_v7  ;;  %v1698_v60 = vadd.f32 %v1682_v16, %v1586_v5  ;;  %v1700_v13 = vadd.f32 %v1684_v30, %v1588_v51  ;;  %v1591_v8 = vld [vmem:[#allocation2 + $0x3c] sm:$0x1] }
 0xc35   :  { %v1699_v26 = vadd.f32 %v1683_v41, %v1587_v20  ;;  %v1702_v63 = vadd.f32 %v1686_v6, %v1590_v28  ;;  %v1701_v18 = vadd.f32 %v1685_v27, %v1589_v43  ;;  %v1703_v16 = vadd.f32 %v1687_v10, %v1591_v8 }
 0xc36   :  { %3888 = vtanh.f32 %v1697_v11  ;;  %v3333_v20 = vmul.f32 -1.442695, %v1696_v15  ;;  %v3334_v6 = vmul.f32 -1.442695, %v1697_v11  ;;  %v3337_v27 = vmul.f32 -1.442695, %v1700_v13 }
 0xc37   :  { %3890 = vtanh.f32 %v1698_v60  ;;  %v3336_v43 = vmul.f32 -1.442695, %v1699_v26  ;;  %v3339_v8 = vmul.f32 -1.442695, %v1702_v63 }
 0xc38   :  { %3892 = vtanh.f32 %v1700_v13 }
 0xc39   :  { %3894 = vtanh.f32 %v1699_v26 }
 0xc3a   :  { %3896 = vtanh.f32 %v1702_v63 }
 0xc3b   :  { %3898 = vtanh.f32 %v1701_v18 }
 0xc3c   :  { %3900 = vtanh.f32 %v1703_v16 }
 0xc3d   :  { %3902 = vpow2.f32 %v3333_v20 }
 0xc3e   :  { %v3887_v62 = vpop.eup %3886  ;;  %3904 = vpow2.f32 %v3334_v6 }
 0xc3f   :  { %1776 = vrot.lane.b32.xlu0 %v3887_v62, %s4177_s3  ;;  %v3335_v62 = vmul.f32 -1.442695, %v1698_v60 }
 0xc40   :  { %v3889_v7 = vpop.eup %3888 }
 0xc41   :  { %v3891_v5 = vpop.eup %3890  ;;  %3906 = vpow2.f32 %v3335_v62 }
 0xc42   :  { %1780 = vrot.lane.b32.xlu1 %v3891_v5, %s4177_s3  ;;  %v3893_v30 = vpop.eup %3892  ;;  %3908 = vpow2.f32 %v3337_v27  ;;  %v3338_v5 = vmul.f32 -1.442695, %v1701_v18 }
 0xc43   :  { %1778 = vrot.lane.b32.xlu0 %v3889_v7, %s4177_s3  ;;  %v3895_v41 = vpop.eup %3894  ;;  %3910 = vpow2.f32 %v3336_v43 }
 0xc44   :  { %v3897_v14 = vpop.eup %3896  ;;  %3912 = vpow2.f32 %v3339_v8 }
 0xc45   :  { %v3899_v51 = vpop.eup %3898 }
 0xc46   :  { %1782 = vrot.lane.b32.xlu1 %v3895_v41, %s4177_s3  ;;  %v3901_v10 = vpop.eup %3900 }
 0xc47   :  { %1784 = vrot.lane.b32.xlu0 %v3893_v30, %s4177_s3  ;;  %v3903_v28 = vpop.eup %3902  ;;  %v3340_v30 = vmul.f32 -1.442695, %v1703_v16 }
 0xc48   :  { %v1728_v7 = vadd.f32 1.0, %v3903_v28  ;;  %v3905_v41 = vpop.eup %3904 }
 0xc49   :  { %v1729_v15 = vadd.f32 1.0, %v3905_v41 }
 0xc4a   :  { %1786 = vrot.lane.b32.xlu1 %v3899_v51, %s4177_s3  ;;  %3914 = vrcp.f32 %v1728_v7 }
 0xc4b   :  { %1788 = vrot.lane.b32.xlu0 %v3897_v14, %s4177_s3  ;;  %3916 = vpow2.f32 %v3338_v5  ;;  %v3907_v14 = vpop.eup %3906 }
 0xc4c   :  { %3918 = vpow2.f32 %v3340_v30  ;;  %v3909_v11 = vpop.eup %3908  ;;  %v1730_v60 = vadd.f32 1.0, %v3907_v14 }
 0xc4d   :  { %v3911_v51 = vpop.eup %3910  ;;  %3920 = vrcp.f32 %v1729_v15 }
 0xc4e   :  { %1790 = vrot.lane.b32.xlu1 %v3901_v10, %s4177_s3  ;;  %v3913_v13 = vpop.eup %3912  ;;  %v1732_v10 = vadd.f32 1.0, %v3909_v11  ;;  %3922 = vrcp.f32 %v1730_v60  ;;  %v1731_v20 = vadd.f32 1.0, %v3911_v51 }
 0xc4f   :  { %v1734_v16 = vadd.f32 1.0, %v3913_v13 }
 0xc50   :  { %3924 = vrcp.f32 %v1732_v10 }
 0xc51   :  { %3926 = vrcp.f32 %v1731_v20 }
 0xc52   :  { %3928 = vrcp.f32 %v1734_v16 }
 0xc54   :  { %v4831_v26 = vpop.eup %3914 }
 0xc55   :  { %v3917_v18 = vpop.eup %3916 }
 0xc56   :  { %v1733_v62 = vadd.f32 1.0, %v3917_v18  ;;  %v3919_v27 = vpop.eup %3918 }
 0xc57   :  { %v1735_v28 = vadd.f32 1.0, %v3919_v27  ;;  %v4835_v43 = vpop.eup %3920 }
 0xc58   :  { %3930 = vrcp.f32 %v1733_v62  ;;  %v4837_v7 = vpop.eup %3922 }
 0xc59   :  { %3932 = vrcp.f32 %v1735_v28 }
 0xc5a   :  { %v4842_v14 = vpop.eup %3924 }
 0xc5b   :  { %v4845_v11 = vpop.eup %3926 }
 0xc5c   :  { %v4850_v10 = vpop.eup %3928 }
 0xc62   :  { %v4853_v20 = vpop.eup %3930 }
 0xc63   :  { %v4859_v62 = vpop.eup %3932 }
 0xcb1   :  { %v1777_v63 = vpop.permute.xlu0 %1776 }
 0xcb2   :  { %v1800_v6 = vmul.f32 %v4831_v26, %v1777_v63 }
 0xcb4   :  { %1816 = vrot.lane.b32.xlu0 %v1800_v6, %s4178_s24  ;;  %v1781_v5 = vpop.permute.xlu1 %1780 }
 0xcb5   :  { %v1779_v8 = vpop.permute.xlu0 %1778  ;;  %v1802_v41 = vmul.f32 %v4837_v7, %v1781_v5 }
 0xcb6   :  { %v1801_v30 = vmul.f32 %v4835_v43, %v1779_v8  ;;  %v1760_v8 = vmul.f32 %v4831_v26, %v4731_v3  ;;  %v1764_v3 = vmul.f32 %v4842_v14, %v4748_v44  ;;  %v1765_v44 = vmul.f32 %v4853_v20, %v4761_v48 }
 0xcb7   :  { %1820 = vrot.lane.b32.xlu1 %v1802_v41, %s4178_s24  ;;  %v1761_v41 = vmul.f32 %v4835_v43, %v4738_v23  ;;  %v1763_v23 = vmul.f32 %v4845_v11, %v4751_v0 }
 0xcb8   :  { %1818 = vrot.lane.b32.xlu0 %v1801_v30, %s4178_s24  ;;  %v1783_v60 = vpop.permute.xlu1 %1782 }
 0xcb9   :  { %v1785_v15 = vpop.permute.xlu0 %1784  ;;  %v1803_v13 = vmul.f32 %v4845_v11, %v1783_v60 }
 0xcba   :  { %v1804_v51 = vmul.f32 %v4842_v14, %v1785_v15  ;;  %v1762_v15 = vmul.f32 %v4837_v7, %v4740_v29 }
 0xcbb   :  { %1822 = vrot.lane.b32.xlu1 %v1803_v13, %s4178_s24 }
 0xcbc   :  { %1824 = vrot.lane.b32.xlu0 %v1804_v51, %s4178_s24  ;;  %v1787_v18 = vpop.permute.xlu1 %1786 }
 0xcbd   :  { %v1789_v63 = vpop.permute.xlu0 %1788  ;;  %v1805_v16 = vmul.f32 %v4853_v20, %v1787_v18 }
 0xcbe   :  { %v1806_v6 = vmul.f32 %v4850_v10, %v1789_v63 }
 0xcbf   :  { %1826 = vrot.lane.b32.xlu1 %v1805_v16, %s4178_s24 }
 0xcc0   :  { %1828 = vrot.lane.b32.xlu0 %v1806_v6, %s4178_s24  ;;  %v1791_v27 = vpop.permute.xlu1 %1790 }
 0xcc1   :  { %v1807_v28 = vmul.f32 %v4859_v62, %v1791_v27 }
 0xcc3   :  { %1830 = vrot.lane.b32.xlu1 %v1807_v28, %s4178_s24  ;;  %v1766_v28 = vmul.f32 %v4850_v10, %v4759_v36 }
 0xd26   :  { %v1817_v5 = vpop.permute.xlu0 %1816 }
 0xd27   :  { %v4865_v30 = vadd.f32 %v1817_v5, %v1760_v8 }
 0xd29   :  { %3934 = vtanh.f32 %v4865_v30  ;;  %v1821_v51 = vpop.permute.xlu1 %1820 }
 0xd2a   :  { %v1819_v60 = vpop.permute.xlu0 %1818  ;;  %v4874_v63 = vadd.f32 %v1821_v51, %v1762_v15  ;;  %v1767_v15 = vmul.f32 %v4859_v62, %v4767_v12 }
 0xd2b   :  { %v4872_v13 = vadd.f32 %v1819_v60, %v1761_v41 }
 0xd2d   :  { %3936 = vtanh.f32 %v4872_v13  ;;  %v1823_v16 = vpop.permute.xlu1 %1822 }
 0xd2e   :  { %3938 = vtanh.f32 %v4874_v63  ;;  %v1825_v6 = vpop.permute.xlu0 %1824  ;;  %v4885_v27 = vadd.f32 %v1823_v16, %v1763_v23 }
 0xd2f   :  { %v4882_v29 = vadd.f32 %v1825_v6, %v1764_v3 }
 0xd31   :  { %3940 = vtanh.f32 %v4882_v29  ;;  %v1827_v0 = vpop.permute.xlu1 %1826 }
 0xd32   :  { %3942 = vtanh.f32 %v4885_v27  ;;  %v1829_v8 = vpop.permute.xlu0 %1828  ;;  %v4895_v41 = vadd.f32 %v1827_v0, %v1765_v44 }
 0xd33   :  { %v3935_v18 = vpop.eup %3934  ;;  %v4893_v5 = vadd.f32 %v1829_v8, %v1766_v28 }
 0xd34   :  { %1864 = vrot.lane.b32.xlu0 %v3935_v18, %s4177_s3 }
 0xd35   :  { %3944 = vtanh.f32 %v4893_v5  ;;  %v1831_v36 = vpop.permute.xlu1 %1830 }
 0xd36   :  { %3946 = vtanh.f32 %v4895_v41  ;;  %v4901_v3 = vadd.f32 %v1831_v36, %v1767_v15 }
 0xd37   :  { %v3937_v60 = vpop.eup %3936 }
 0xd38   :  { %v3939_v51 = vpop.eup %3938  ;;  %1866 = vrot.lane.b32.xlu0 %v3937_v60, %s4177_s3  ;;  %3948 = vtanh.f32 %v4901_v3 }
 0xd39   :  { %1868 = vrot.lane.b32.xlu1 %v3939_v51, %s4177_s3 }
 0xd3b   :  { %v3941_v48 = vpop.eup %3940 }
 0xd3c   :  { %v3943_v18 = vpop.eup %3942  ;;  %1872 = vrot.lane.b32.xlu0 %v3941_v48, %s4177_s3 }
 0xd3d   :  { %1870 = vrot.lane.b32.xlu1 %v3943_v18, %s4177_s3 }
 0xd3f   :  { %v3945_v23 = vpop.eup %3944 }
 0xd40   :  { %v3947_v6 = vpop.eup %3946  ;;  %1876 = vrot.lane.b32.xlu0 %v3945_v23, %s4177_s3 }
 0xd41   :  { %1874 = vrot.lane.b32.xlu1 %v3947_v6, %s4177_s3 }
 0xd42   :  { %v3949_v12 = vpop.eup %3948 }
 0xd45   :  { %1878 = vrot.lane.b32.xlu1 %v3949_v12, %s4177_s3 }
 0xda6   :  { %v1865_v16 = vpop.permute.xlu0 %1864 }
 0xda7   :  { %v4918_v15 = vmul.f32 %v4831_v26, %v1865_v16 }
 0xdaa   :  { %v1867_v28 = vpop.permute.xlu0 %1866 }
 0xdab   :  { %v1869_v44 = vpop.permute.xlu1 %1868  ;;  %v4912_v8 = vmul.f32 %v4835_v43, %v1867_v28 }
 0xdac   :  { %v4915_v0 = vmul.f32 %v4837_v7, %v1869_v44 }
 0xdad   :  { %v1944_v60 = vrot.slane %v4912_v8, 7 }
 0xdae   :  { %v1873_v36 = vpop.permute.xlu0 %1872  ;;  %v1946_v51 = vrot.slane %v4915_v0, 6 }
 0xdaf   :  { %v1945_v48 = vsel %vm530_vm2, %v1944_v60, %v4918_v15  ;;  %v1871_v18 = vpop.permute.xlu1 %1870  ;;  %v4925_v23 = vmul.f32 %v4842_v14, %v1873_v36 }
 0xdb0   :  { %v4928_v43 = vmul.f32 %v4845_v11, %v1871_v18  ;;  %v1947_v7 = vsel %vm533_vm3, %v1946_v51, %v1945_v48 }
 0xdb1   :  { %v1950_v26 = vrot.slane %v4925_v23, 4 }
 0xdb2   :  { %v1948_v6 = vrot.slane %v4928_v43, 5  ;;  %v1877_v12 = vpop.permute.xlu0 %1876 }
 0xdb3   :  { %v1875_v16 = vpop.permute.xlu1 %1874  ;;  %v4934_v28 = vmul.f32 %v4850_v10, %v1877_v12 }
 0xdb4   :  { %v1949_v44 = vsel %vm536_vm4, %v1948_v6, %v1947_v7  ;;  %v4938_v60 = vmul.f32 %v4853_v20, %v1875_v16  ;;  %v1936_v16 = vld [vmem:[#allocation2 + $0x5] sm:$0x1] }
 0xdb5   :  { %5591 = vst [vmem:[#allocation16_spill] sm:$0xff] %v4934_v28  ;;  %v1951_v14 = vsel %vm539_vm5, %v1950_v26, %v1949_v44  ;;  %v1954_v11 = vrot.slane %v4934_v28, 2  ;;  %v5594_v26 = vmov 0.0  }
 0xdb6   :  { %5592 = vst [vmem:[#allocation17_spill] sm:$0xff] %v4938_v60  ;;  %v1952_v36 = vrot.slane %v4938_v60, 3 }
 0xdb7   :  { %v1879_v51 = vpop.permute.xlu1 %1878 }
 0xdb8   :  { %v4944_v48 = vmul.f32 %v4859_v62, %v1879_v51  ;;  %v1953_v18 = vsel %vm542_vm6, %v1952_v36, %v1951_v14  ;;  %v5595_v62 = vmov 0.0|0.0   ;;  %v1937_v51 = vld [vmem:[#allocation2 + $0xd] sm:$0x1] }
 0xdb9   :  { %v1955_v10 = vsel %vm545_vm7, %v1954_v11, %v1953_v18  ;;  %v1938_v18 = vld [vmem:[#allocation2 + $0x15] sm:$0x1] }
 0xdba   :  { %5593 = vst [vmem:[#allocation18_spill] sm:$0xff] %v4944_v48  ;;  %v1956_v12 = vrot.slane %v4944_v48, 1  ;;  %v1939_v48 = vld [vmem:[#allocation2 + $0x1d] sm:$0x1] }
 0xdbc   :  { %v1957_v7 = vsel %vm548_vm8, %v1956_v12, %v1955_v10 }
 0xdbd   :  { %1958 = vrot.lane.b32.xlu0 %v1957_v7, %s4178_s24 }
 0xe2f   :  { %v1959_v20 = vpop.permute.xlu0 %1958 }
 0xe30   :  { %3519 = vmatmul.mubr.msk.f32.vlgmr.msra.gmra.mrb[10].mxu1 %vm190_vm9, %v1959_v20  ;;  %v1940_v20 = vld [vmem:[#allocation2 + $0x25] sm:$0x1] }
 0xe31   :  { %3611 = vmatpush3.bf16.msra.mxu1 %v4240_v9  ;;  %3540 = vmatprep.mubr.msk.f32.mxu1 %vm4175_vm1, %v5594_v26 }
 0xe32   :  { %3612 = vmatprep.subr.bf16.mxu1 %v5595_v62 }
 0xe35   :  { %3614 = vmatpush3.bf16.msra.mxu1 %v4266_v17 }
 0xf03   :  { %v2028_v6 = vpop.f32.mrb[10].mxu1 }
 0xf04   :  { %v3520_v44 = vpop.f32.mrb[11].mxu1  ;;  %v2048_v14 = vadd.f32 %v2028_v6, %v1936_v16  ;;  %v2033_v11 = vrot.slane %v2028_v6, 1  ;;  %v2034_v36 = vrot.slane %v2028_v6, 2  ;;  %v2036_v10 = vrot.slane %v2028_v6, 4  ;;  %v1942_v16 = vld [vmem:[#allocation2 + $0x35] sm:$0x1] }
 0xf05   :  { %v2035_v7 = vrot.slane %v2028_v6, 3  ;;  %v2038_v26 = vrot.slane %v2028_v6, 6  ;;  %v2037_v17 = vrot.slane %v2028_v6, 5  ;;  %v1941_v44 = vld [vmem:[#allocation2 + $0x2d] sm:$0x1]  ;;  %v2039_v28 = vrot.slane %v2028_v6, 7 }
 0xf06   :  { %3950 = vtanh.f32 %v2048_v14  ;;  %v2049_v12 = vadd.f32 %v2033_v11, %v1937_v51  ;;  %v2050_v9 = vadd.f32 %v2034_v36, %v1938_v18  ;;  %v2052_v2 = vadd.f32 %v2036_v10, %v1940_v20  ;;  %v1943_v11 = vld [vmem:[#allocation2 + $0x3d] sm:$0x1] }
 0xf07   :  { %v2051_v56 = vadd.f32 %v2035_v7, %v1939_v48  ;;  %v2054_v21 = vadd.f32 %v2038_v26, %v1942_v16  ;;  %v2053_v59 = vadd.f32 %v2037_v17, %v1941_v44  ;;  %v2055_v36 = vadd.f32 %v2039_v28, %v1943_v11 }
 0xf08   :  { %3952 = vtanh.f32 %v2049_v12  ;;  %v3342_v20 = vmul.f32 -1.442695, %v2048_v14  ;;  %v3343_v26 = vmul.f32 -1.442695, %v2049_v12  ;;  %v3346_v17 = vmul.f32 -1.442695, %v2052_v2 }
 0xf09   :  { %3954 = vtanh.f32 %v2050_v9  ;;  %v3345_v44 = vmul.f32 -1.442695, %v2051_v56  ;;  %v3348_v11 = vmul.f32 -1.442695, %v2054_v21 }
 0xf0a   :  { %3956 = vtanh.f32 %v2052_v2 }
 0xf0b   :  { %3958 = vtanh.f32 %v2051_v56 }
 0xf0c   :  { %3960 = vtanh.f32 %v2054_v21 }
 0xf0d   :  { %3962 = vtanh.f32 %v2053_v59 }
 0xf0e   :  { %3964 = vtanh.f32 %v2055_v36 }
 0xf0f   :  { %3966 = vpow2.f32 %v3342_v20 }
 0xf10   :  { %v3951_v62 = vpop.eup %3950  ;;  %3968 = vpow2.f32 %v3343_v26 }
 0xf11   :  { %2128 = vrot.lane.b32.xlu1 %v3951_v62, %s4177_s3  ;;  %v3344_v62 = vmul.f32 -1.442695, %v2050_v9 }
 0xf12   :  { %v3953_v51 = vpop.eup %3952 }
 0xf13   :  { %v3955_v18 = vpop.eup %3954  ;;  %3970 = vpow2.f32 %v3344_v62 }
 0xf14   :  { %2132 = vrot.lane.b32.xlu0 %v3955_v18, %s4177_s3  ;;  %v3957_v48 = vpop.eup %3956  ;;  %3972 = vpow2.f32 %v3346_v17  ;;  %v3347_v18 = vmul.f32 -1.442695, %v2053_v59 }
 0xf15   :  { %2130 = vrot.lane.b32.xlu1 %v3953_v51, %s4177_s3  ;;  %v3959_v10 = vpop.eup %3958  ;;  %3974 = vpow2.f32 %v3345_v44 }
 0xf16   :  { %v3961_v6 = vpop.eup %3960  ;;  %3976 = vpow2.f32 %v3348_v11 }
 0xf17   :  { %v3963_v7 = vpop.eup %3962 }
 0xf18   :  { %2134 = vrot.lane.b32.xlu0 %v3959_v10, %s4177_s3  ;;  %v3965_v28 = vpop.eup %3964 }
 0xf19   :  { %2136 = vrot.lane.b32.xlu1 %v3957_v48, %s4177_s3  ;;  %v3967_v16 = vpop.eup %3966  ;;  %v3349_v48 = vmul.f32 -1.442695, %v2055_v36 }
 0xf1a   :  { %v2080_v51 = vadd.f32 1.0, %v3967_v16  ;;  %v3969_v10 = vpop.eup %3968 }
 0xf1b   :  { %v2081_v14 = vadd.f32 1.0, %v3969_v10 }
 0xf1c   :  { %2138 = vrot.lane.b32.xlu0 %v3963_v7, %s4177_s3  ;;  %3978 = vrcp.f32 %v2080_v51 }
 0xf1d   :  { %2140 = vrot.lane.b32.xlu1 %v3961_v6, %s4177_s3  ;;  %3980 = vpow2.f32 %v3347_v18  ;;  %v3971_v6 = vpop.eup %3970 }
 0xf1e   :  { %3982 = vpow2.f32 %v3349_v48  ;;  %v3973_v12 = vpop.eup %3972  ;;  %v2082_v9 = vadd.f32 1.0, %v3971_v6 }
 0xf1f   :  { %v3975_v7 = vpop.eup %3974  ;;  %3984 = vrcp.f32 %v2081_v14 }
 0xf20   :  { %2142 = vrot.lane.b32.xlu0 %v3965_v28, %s4177_s3  ;;  %v3977_v2 = vpop.eup %3976  ;;  %v2084_v28 = vadd.f32 1.0, %v3973_v12  ;;  %3986 = vrcp.f32 %v2082_v9  ;;  %v2083_v20 = vadd.f32 1.0, %v3975_v7 }
 0xf21   :  { %v2086_v36 = vadd.f32 1.0, %v3977_v2 }
 0xf22   :  { %3988 = vrcp.f32 %v2084_v28 }
 0xf23   :  { %3990 = vrcp.f32 %v2083_v20 }
 0xf24   :  { %3992 = vrcp.f32 %v2086_v36 }
 0xf26   :  { %v4965_v56 = vpop.eup %3978 }
 0xf27   :  { %v3981_v59 = vpop.eup %3980 }
 0xf28   :  { %v2085_v62 = vadd.f32 1.0, %v3981_v59  ;;  %v3983_v17 = vpop.eup %3982 }
 0xf29   :  { %v2087_v16 = vadd.f32 1.0, %v3983_v17  ;;  %v4969_v44 = vpop.eup %3984 }
 0xf2a   :  { %3994 = vrcp.f32 %v2085_v62  ;;  %v4971_v51 = vpop.eup %3986 }
 0xf2b   :  { %3996 = vrcp.f32 %v2087_v16 }
 0xf2c   :  { %v4976_v6 = vpop.eup %3988 }
 0xf2d   :  { %v4979_v12 = vpop.eup %3990 }
 0xf2e   :  { %v4984_v28 = vpop.eup %3992 }
 0xf34   :  { %v4987_v20 = vpop.eup %3994 }
 0xf35   :  { %v4993_v62 = vpop.eup %3996 }
 0xf83   :  { %v2129_v21 = vpop.permute.xlu1 %2128 }
 0xf84   :  { %v2152_v26 = vmul.f32 %v4965_v56, %v2129_v21 }
 0xf86   :  { %2168 = vrot.lane.b32.xlu1 %v2152_v26, %s4178_s24  ;;  %v2133_v18 = vpop.permute.xlu0 %2132 }
 0xf87   :  { %v2131_v11 = vpop.permute.xlu1 %2130  ;;  %v2154_v10 = vmul.f32 %v4971_v51, %v2133_v18 }
 0xf88   :  { %v2153_v48 = vmul.f32 %v4969_v44, %v2131_v11  ;;  %v2112_v11 = vmul.f32 %v4965_v56, %v4865_v30  ;;  %v2116_v30 = vmul.f32 %v4976_v6, %v4882_v29  ;;  %v2117_v29 = vmul.f32 %v4987_v20, %v4895_v41 }
 0xf89   :  { %2172 = vrot.lane.b32.xlu0 %v2154_v10, %s4178_s24  ;;  %v2113_v10 = vmul.f32 %v4969_v44, %v4872_v13  ;;  %v2115_v13 = vmul.f32 %v4979_v12, %v4885_v27 }
 0xf8a   :  { %2170 = vrot.lane.b32.xlu1 %v2153_v48, %s4178_s24  ;;  %v2135_v9 = vpop.permute.xlu0 %2134 }
 0xf8b   :  { %v2137_v14 = vpop.permute.xlu1 %2136  ;;  %v2155_v2 = vmul.f32 %v4979_v12, %v2135_v9 }
 0xf8c   :  { %v2156_v7 = vmul.f32 %v4976_v6, %v2137_v14  ;;  %v2114_v14 = vmul.f32 %v4971_v51, %v4874_v63 }
 0xf8d   :  { %2174 = vrot.lane.b32.xlu0 %v2155_v2, %s4178_s24 }
 0xf8e   :  { %2176 = vrot.lane.b32.xlu1 %v2156_v7, %s4178_s24  ;;  %v2139_v59 = vpop.permute.xlu0 %2138 }
 0xf8f   :  { %v2141_v21 = vpop.permute.xlu1 %2140  ;;  %v2157_v36 = vmul.f32 %v4987_v20, %v2139_v59 }
 0xf90   :  { %v2158_v26 = vmul.f32 %v4984_v28, %v2141_v21 }
 0xf91   :  { %2178 = vrot.lane.b32.xlu0 %v2157_v36, %s4178_s24 }
 0xf92   :  { %2180 = vrot.lane.b32.xlu1 %v2158_v26, %s4178_s24  ;;  %v2143_v17 = vpop.permute.xlu0 %2142 }
 0xf93   :  { %v2159_v16 = vmul.f32 %v4993_v62, %v2143_v17 }
 0xf95   :  { %2182 = vrot.lane.b32.xlu0 %v2159_v16, %s4178_s24  ;;  %v2118_v16 = vmul.f32 %v4984_v28, %v4893_v5 }
 0xff8   :  { %v2169_v18 = vpop.permute.xlu1 %2168 }
 0xff9   :  { %v4999_v48 = vadd.f32 %v2169_v18, %v2112_v11 }
 0xffb   :  { %3998 = vtanh.f32 %v4999_v48  ;;  %v2173_v7 = vpop.permute.xlu0 %2172 }
 0xffc   :  { %v2171_v9 = vpop.permute.xlu1 %2170  ;;  %v5008_v21 = vadd.f32 %v2173_v7, %v2114_v14  ;;  %v2119_v14 = vmul.f32 %v4993_v62, %v4901_v3 }
 0xffd   :  { %v5006_v2 = vadd.f32 %v2171_v9, %v2113_v10 }
 0xfff   :  { %4000 = vtanh.f32 %v5006_v2  ;;  %v2175_v36 = vpop.permute.xlu0 %2174 }
0x1000   :  { %4002 = vtanh.f32 %v5008_v21  ;;  %v2177_v26 = vpop.permute.xlu1 %2176  ;;  %v5019_v17 = vadd.f32 %v2175_v36, %v2115_v13 }
0x1001   :  { %v5016_v63 = vadd.f32 %v2177_v26, %v2116_v30 }
0x1003   :  { %4004 = vtanh.f32 %v5016_v63  ;;  %v2179_v27 = vpop.permute.xlu0 %2178 }
0x1004   :  { %4006 = vtanh.f32 %v5019_v17  ;;  %v2181_v11 = vpop.permute.xlu1 %2180  ;;  %v5029_v10 = vadd.f32 %v2179_v27, %v2117_v29 }
0x1005   :  { %v3999_v59 = vpop.eup %3998  ;;  %v5027_v18 = vadd.f32 %v2181_v11, %v2118_v16 }
0x1006   :  { %2216 = vrot.lane.b32.xlu1 %v3999_v59, %s4177_s3 }
0x1007   :  { %4008 = vtanh.f32 %v5027_v18  ;;  %v2183_v5 = vpop.permute.xlu0 %2182 }
0x1008   :  { %4010 = vtanh.f32 %v5029_v10  ;;  %v5035_v30 = vadd.f32 %v2183_v5, %v2119_v14 }
0x1009   :  { %v4001_v9 = vpop.eup %4000 }
0x100a   :  { %v4003_v7 = vpop.eup %4002  ;;  %2218 = vrot.lane.b32.xlu1 %v4001_v9, %s4177_s3  ;;  %4012 = vtanh.f32 %v5035_v30 }
0x100b   :  { %2220 = vrot.lane.b32.xlu0 %v4003_v7, %s4177_s3 }
0x100d   :  { %v4005_v41 = vpop.eup %4004 }
0x100e   :  { %v4007_v59 = vpop.eup %4006  ;;  %2224 = vrot.lane.b32.xlu1 %v4005_v41, %s4177_s3 }
0x100f   :  { %2222 = vrot.lane.b32.xlu0 %v4007_v59, %s4177_s3 }
0x1011   :  { %v4009_v13 = vpop.eup %4008 }
0x1012   :  { %v4011_v26 = vpop.eup %4010  ;;  %2228 = vrot.lane.b32.xlu1 %v4009_v13, %s4177_s3 }
0x1013   :  { %2226 = vrot.lane.b32.xlu0 %v4011_v26, %s4177_s3 }
0x1014   :  { %v4013_v3 = vpop.eup %4012 }
0x1017   :  { %2230 = vrot.lane.b32.xlu0 %v4013_v3, %s4177_s3 }
0x1078   :  { %v2217_v36 = vpop.permute.xlu1 %2216 }
0x1079   :  { %v5052_v14 = vmul.f32 %v4965_v56, %v2217_v36 }
0x107c   :  { %v2219_v16 = vpop.permute.xlu1 %2218 }
0x107d   :  { %v2221_v29 = vpop.permute.xlu0 %2220  ;;  %v5046_v11 = vmul.f32 %v4969_v44, %v2219_v16 }
0x107e   :  { %v5049_v27 = vmul.f32 %v4971_v51, %v2221_v29 }
0x107f   :  { %v2296_v9 = vrot.slane %v5046_v11, 7 }
0x1080   :  { %v2225_v5 = vpop.permute.xlu1 %2224  ;;  %v2298_v7 = vrot.slane %v5049_v27, 6 }
0x1081   :  { %v2297_v41 = vsel %vm530_vm2, %v2296_v9, %v5052_v14  ;;  %v2223_v59 = vpop.permute.xlu0 %2222  ;;  %v5059_v13 = vmul.f32 %v4976_v6, %v2225_v5 }
0x1082   :  { %v5062_v44 = vmul.f32 %v4979_v12, %v2223_v59  ;;  %v2299_v51 = vsel %vm533_vm3, %v2298_v7, %v2297_v41 }
0x1083   :  { %v2302_v56 = vrot.slane %v5059_v13, 4 }
0x1084   :  { %v2300_v26 = vrot.slane %v5062_v44, 5  ;;  %v2229_v3 = vpop.permute.xlu1 %2228 }
0x1085   :  { %v2227_v36 = vpop.permute.xlu0 %2226  ;;  %v5068_v16 = vmul.f32 %v4984_v28, %v2229_v3 }
0x1086   :  { %v2301_v29 = vsel %vm536_vm4, %v2300_v26, %v2299_v51  ;;  %v5072_v9 = vmul.f32 %v4987_v20, %v2227_v36  ;;  %v2288_v26 = vld [vmem:[#allocation2 + $0x6] sm:$0x1] }
0x1087   :  { %5596 = vst [vmem:[#allocation19_spill] sm:$0xff] %v5068_v16  ;;  %v2303_v6 = vsel %vm539_vm5, %v2302_v56, %v2301_v29  ;;  %v2306_v12 = vrot.slane %v5068_v16, 2  ;;  %v2292_v16 = vld [vmem:[#allocation2 + $0x26] sm:$0x1] }
0x1088   :  { %5597 = vst [vmem:[#allocation20_spill] sm:$0xff] %v5072_v9  ;;  %v2304_v5 = vrot.slane %v5072_v9, 3 }
0x1089   :  { %v2231_v7 = vpop.permute.xlu0 %2230 }
0x108a   :  { %v5078_v41 = vmul.f32 %v4993_v62, %v2231_v7  ;;  %v2305_v59 = vsel %vm542_vm6, %v2304_v5, %v2303_v6  ;;  %v2290_v6 = vld [vmem:[#allocation2 + $0x16] sm:$0x1] }
0x108b   :  { %v2307_v28 = vsel %vm545_vm7, %v2306_v12, %v2305_v59 }
0x108c   :  { %5598 = vst [vmem:[#allocation21_spill] sm:$0xff] %v5078_v41  ;;  %v2308_v3 = vrot.slane %v5078_v41, 1 }
0x108e   :  { %v2309_v51 = vsel %vm548_vm8, %v2308_v3, %v2307_v28  ;;  %v2291_v28 = vld [vmem:[#allocation2 + $0x1e] sm:$0x1] }
0x108f   :  { %2310 = vrot.lane.b32.xlu1 %v2309_v51, %s4178_s24 }
0x1101   :  { %v2311_v20 = vpop.permute.xlu1 %2310 }
0x1102   :  { %3530 = vmatmul.mubr.msk.f32.vlgmr.msra.gmra.mrb[8].mxu0 %vm190_vm9, %v2311_v20 }
0x11d5   :  { %v2380_v56 = vpop.f32.mrb[8].mxu0 }
0x11d6   :  { %v3531_v36 = vpop.f32.mrb[9].mxu0  ;;  %v2400_v29 = vadd.f32 %v2380_v56, %v2288_v26  ;;  %v2385_v62 = vrot.slane %v2380_v56, 1  ;;  %v2386_v7 = vrot.slane %v2380_v56, 2  ;;  %v2388_v5 = vrot.slane %v2380_v56, 4  ;;  %v2294_v26 = vld [vmem:[#allocation2 + $0x36] sm:$0x1] }
0x11d7   :  { %v2387_v59 = vrot.slane %v2380_v56, 3  ;;  %v2390_v3 = vrot.slane %v2380_v56, 6  ;;  %v2389_v20 = vrot.slane %v2380_v56, 5  ;;  %v2293_v36 = vld [vmem:[#allocation2 + $0x2e] sm:$0x1]  ;;  %v2391_v60 = vrot.slane %v2380_v56, 7 }
0x11d8   :  { %4014 = vtanh.f32 %v2400_v29  ;;  %v2401_v12 = vadd.f32 %v2385_v62, %v2289_v54  ;;  %v2402_v41 = vadd.f32 %v2386_v7, %v2290_v6  ;;  %v2404_v51 = vadd.f32 %v2388_v5, %v2292_v16  ;;  %v2295_v54 = vld [vmem:[#allocation2 + $0x3e] sm:$0x1] }
0x11d9   :  { %v2403_v34 = vadd.f32 %v2387_v59, %v2291_v28  ;;  %v2406_v49 = vadd.f32 %v2390_v3, %v2294_v26  ;;  %v2405_v9 = vadd.f32 %v2389_v20, %v2293_v36  ;;  %v2407_v62 = vadd.f32 %v2391_v60, %v2295_v54 }
0x11da   :  { %4016 = vtanh.f32 %v2401_v12  ;;  %v3351_v59 = vmul.f32 -1.442695, %v2400_v29  ;;  %v3352_v28 = vmul.f32 -1.442695, %v2401_v12  ;;  %v3353_v3 = vmul.f32 -1.442695, %v2402_v41 }
0x11db   :  { %4018 = vtanh.f32 %v2402_v41  ;;  %v3355_v20 = vmul.f32 -1.442695, %v2404_v51  ;;  %v3354_v36 = vmul.f32 -1.442695, %v2403_v34  ;;  %v3357_v54 = vmul.f32 -1.442695, %v2406_v49 }
0x11dc   :  { %4020 = vtanh.f32 %v2404_v51 }
0x11dd   :  { %4022 = vtanh.f32 %v2403_v34 }
0x11de   :  { %4024 = vtanh.f32 %v2406_v49 }
0x11df   :  { %4026 = vtanh.f32 %v2405_v9 }
0x11e0   :  { %4028 = vtanh.f32 %v2407_v62 }
0x11e1   :  { %4030 = vpow2.f32 %v3351_v59 }
0x11e2   :  { %v4015_v50 = vpop.eup %4014  ;;  %4032 = vpow2.f32 %v3352_v28 }
0x11e3   :  { %2480 = vrot.lane.b32.xlu0 %v4015_v50, %s4177_s3  ;;  %4034 = vpow2.f32 %v3353_v3 }
0x11e4   :  { %v4017_v7 = vpop.eup %4016  ;;  %4036 = vpow2.f32 %v3355_v20 }
0x11e5   :  { %v4019_v16 = vpop.eup %4018  ;;  %4038 = vpow2.f32 %v3354_v36 }
0x11e6   :  { %2484 = vrot.lane.b32.xlu1 %v4019_v16, %s4177_s3  ;;  %v4021_v6 = vpop.eup %4020  ;;  %v3356_v16 = vmul.f32 -1.442695, %v2405_v9  ;;  %4040 = vpow2.f32 %v3357_v54 }
0x11e7   :  { %2482 = vrot.lane.b32.xlu0 %v4017_v7, %s4177_s3  ;;  %v4023_v50 = vpop.eup %4022 }
0x11e8   :  { %v4025_v56 = vpop.eup %4024 }
0x11e9   :  { %v4027_v5 = vpop.eup %4026 }
0x11ea   :  { %2486 = vrot.lane.b32.xlu1 %v4023_v50, %s4177_s3  ;;  %v4029_v60 = vpop.eup %4028 }
0x11eb   :  { %2488 = vrot.lane.b32.xlu0 %v4021_v6, %s4177_s3  ;;  %v4031_v26 = vpop.eup %4030  ;;  %v3358_v6 = vmul.f32 -1.442695, %v2407_v62 }
0x11ec   :  { %v2432_v7 = vadd.f32 1.0, %v4031_v26  ;;  %v4033_v50 = vpop.eup %4032 }
0x11ed   :  { %v2433_v29 = vadd.f32 1.0, %v4033_v50 }
0x11ee   :  { %2490 = vrot.lane.b32.xlu1 %v4027_v5, %s4177_s3  ;;  %4042 = vrcp.f32 %v2432_v7 }
0x11ef   :  { %2492 = vrot.lane.b32.xlu0 %v4025_v56, %s4177_s3  ;;  %4044 = vpow2.f32 %v3356_v16  ;;  %v4035_v56 = vpop.eup %4034 }
0x11f0   :  { %4046 = vpow2.f32 %v3358_v6  ;;  %v4037_v12 = vpop.eup %4036  ;;  %v2434_v41 = vadd.f32 1.0, %v4035_v56 }
0x11f1   :  { %v4039_v5 = vpop.eup %4038  ;;  %4048 = vrcp.f32 %v2433_v29 }
0x11f2   :  { %2494 = vrot.lane.b32.xlu1 %v4029_v60, %s4177_s3  ;;  %v4041_v51 = vpop.eup %4040  ;;  %v2436_v60 = vadd.f32 1.0, %v4037_v12  ;;  %4050 = vrcp.f32 %v2434_v41  ;;  %v2435_v59 = vadd.f32 1.0, %v4039_v5 }
0x11f3   :  { %v2438_v62 = vadd.f32 1.0, %v4041_v51 }
0x11f4   :  { %4052 = vrcp.f32 %v2436_v60 }
0x11f5   :  { %4054 = vrcp.f32 %v2435_v59 }
0x11f6   :  { %4056 = vrcp.f32 %v2438_v62 }
0x11f8   :  { %v5094_v34 = vpop.eup %4042 }
0x11f9   :  { %v4045_v9 = vpop.eup %4044 }
0x11fa   :  { %v2437_v3 = vadd.f32 1.0, %v4045_v9  ;;  %v4047_v20 = vpop.eup %4046 }
0x11fb   :  { %v2439_v26 = vadd.f32 1.0, %v4047_v20  ;;  %v5098_v36 = vpop.eup %4048 }
0x11fc   :  { %4058 = vrcp.f32 %v2437_v3  ;;  %v5100_v7 = vpop.eup %4050 }
0x11fd   :  { %4060 = vrcp.f32 %v2439_v26 }
0x11fe   :  { %v5105_v56 = vpop.eup %4052 }
0x11ff   :  { %v5108_v12 = vpop.eup %4054 }
0x1200   :  { %v5113_v60 = vpop.eup %4056 }
0x1206   :  { %v5116_v59 = vpop.eup %4058 }
0x1207   :  { %v5122_v3 = vpop.eup %4060 }
0x1255   :  { %v2481_v49 = vpop.permute.xlu0 %2480 }
0x1256   :  { %v2504_v28 = vmul.f32 %v5094_v34, %v2481_v49 }
0x1258   :  { %2520 = vrot.lane.b32.xlu0 %v2504_v28, %s4178_s24  ;;  %v2485_v16 = vpop.permute.xlu1 %2484 }
0x1259   :  { %v2483_v54 = vpop.permute.xlu0 %2482  ;;  %v2506_v50 = vmul.f32 %v5100_v7, %v2485_v16 }
0x125a   :  { %v2505_v6 = vmul.f32 %v5098_v36, %v2483_v54  ;;  %v2464_v54 = vmul.f32 %v5094_v34, %v4999_v48  ;;  %v2468_v48 = vmul.f32 %v5105_v56, %v5016_v63  ;;  %v2469_v63 = vmul.f32 %v5116_v59, %v5029_v10 }
0x125b   :  { %2524 = vrot.lane.b32.xlu1 %v2506_v50, %s4178_s24  ;;  %v2465_v50 = vmul.f32 %v5098_v36, %v5006_v2  ;;  %v2467_v2 = vmul.f32 %v5108_v12, %v5019_v17 }
0x125c   :  { %2522 = vrot.lane.b32.xlu0 %v2505_v6, %s4178_s24  ;;  %v2487_v41 = vpop.permute.xlu1 %2486 }
0x125d   :  { %v2489_v29 = vpop.permute.xlu0 %2488  ;;  %v2507_v51 = vmul.f32 %v5108_v12, %v2487_v41 }
0x125e   :  { %v2508_v5 = vmul.f32 %v5105_v56, %v2489_v29  ;;  %v2466_v29 = vmul.f32 %v5100_v7, %v5008_v21 }
0x125f   :  { %2526 = vrot.lane.b32.xlu1 %v2507_v51, %s4178_s24 }
0x1260   :  { %2528 = vrot.lane.b32.xlu0 %v2508_v5, %s4178_s24  ;;  %v2491_v9 = vpop.permute.xlu1 %2490 }
0x1261   :  { %v2493_v49 = vpop.permute.xlu0 %2492  ;;  %v2509_v62 = vmul.f32 %v5116_v59, %v2491_v9 }
0x1262   :  { %v2510_v28 = vmul.f32 %v5113_v60, %v2493_v49 }
0x1263   :  { %2530 = vrot.lane.b32.xlu1 %v2509_v62, %s4178_s24 }
0x1264   :  { %2532 = vrot.lane.b32.xlu0 %v2510_v28, %s4178_s24  ;;  %v2495_v20 = vpop.permute.xlu1 %2494 }
0x1265   :  { %v2511_v26 = vmul.f32 %v5122_v3, %v2495_v20 }
0x1267   :  { %2534 = vrot.lane.b32.xlu1 %v2511_v26, %s4178_s24  ;;  %v2470_v26 = vmul.f32 %v5113_v60, %v5027_v18 }
0x12ca   :  { %v2521_v16 = vpop.permute.xlu0 %2520 }
0x12cb   :  { %v5128_v6 = vadd.f32 %v2521_v16, %v2464_v54 }
0x12cd   :  { %4062 = vtanh.f32 %v5128_v6  ;;  %v2525_v5 = vpop.permute.xlu1 %2524 }
0x12ce   :  { %v2523_v41 = vpop.permute.xlu0 %2522  ;;  %v5137_v49 = vadd.f32 %v2525_v5, %v2466_v29  ;;  %v2471_v29 = vmul.f32 %v5122_v3, %v5035_v30 }
0x12cf   :  { %v5135_v51 = vadd.f32 %v2523_v41, %v2465_v50 }
0x12d1   :  { %4064 = vtanh.f32 %v5135_v51  ;;  %v2527_v62 = vpop.permute.xlu1 %2526 }
0x12d2   :  { %4066 = vtanh.f32 %v5137_v49  ;;  %v2529_v28 = vpop.permute.xlu0 %2528  ;;  %v5148_v20 = vadd.f32 %v2527_v62, %v2467_v2 }
0x12d3   :  { %v5145_v21 = vadd.f32 %v2529_v28, %v2468_v48 }
0x12d5   :  { %4068 = vtanh.f32 %v5145_v21  ;;  %v2531_v17 = vpop.permute.xlu1 %2530 }
0x12d6   :  { %4070 = vtanh.f32 %v5148_v20  ;;  %v2533_v54 = vpop.permute.xlu0 %2532  ;;  %v5158_v50 = vadd.f32 %v2531_v17, %v2469_v63 }
0x12d7   :  { %v4063_v9 = vpop.eup %4062  ;;  %v5156_v16 = vadd.f32 %v2533_v54, %v2470_v26 }
0x12d8   :  { %2568 = vrot.lane.b32.xlu0 %v4063_v9, %s4177_s3 }
0x12d9   :  { %4072 = vtanh.f32 %v5156_v16  ;;  %v2535_v18 = vpop.permute.xlu1 %2534 }
0x12da   :  { %4074 = vtanh.f32 %v5158_v50  ;;  %v5164_v48 = vadd.f32 %v2535_v18, %v2471_v29 }
0x12db   :  { %v4065_v41 = vpop.eup %4064 }
0x12dc   :  { %v4067_v5 = vpop.eup %4066  ;;  %2570 = vrot.lane.b32.xlu0 %v4065_v41, %s4177_s3  ;;  %4076 = vtanh.f32 %v5164_v48 }
0x12dd   :  { %2572 = vrot.lane.b32.xlu1 %v4067_v5, %s4177_s3 }
0x12df   :  { %v4069_v10 = vpop.eup %4068 }
0x12e0   :  { %v4071_v9 = vpop.eup %4070  ;;  %2576 = vrot.lane.b32.xlu0 %v4069_v10, %s4177_s3 }
0x12e1   :  { %2574 = vrot.lane.b32.xlu1 %v4071_v9, %s4177_s3 }
0x12e3   :  { %v4073_v2 = vpop.eup %4072 }
0x12e4   :  { %v4075_v28 = vpop.eup %4074  ;;  %2580 = vrot.lane.b32.xlu0 %v4073_v2, %s4177_s3 }
0x12e5   :  { %2578 = vrot.lane.b32.xlu1 %v4075_v28, %s4177_s3 }
0x12e6   :  { %v4077_v30 = vpop.eup %4076 }
0x12e9   :  { %2582 = vrot.lane.b32.xlu1 %v4077_v30, %s4177_s3 }
0x134a   :  { %v2569_v62 = vpop.permute.xlu0 %2568 }
0x134b   :  { %v5181_v29 = vmul.f32 %v5094_v34, %v2569_v62 }
0x134e   :  { %v2571_v26 = vpop.permute.xlu0 %2570 }
0x134f   :  { %v2573_v63 = vpop.permute.xlu1 %2572  ;;  %v5175_v54 = vmul.f32 %v5098_v36, %v2571_v26 }
0x1350   :  { %v5178_v17 = vmul.f32 %v5100_v7, %v2573_v63 }
0x1351   :  { %v2648_v41 = vrot.slane %v5175_v54, 7 }
0x1352   :  { %v2577_v18 = vpop.permute.xlu0 %2576  ;;  %v2650_v5 = vrot.slane %v5178_v17, 6 }
0x1353   :  { %v2649_v10 = vsel %vm530_vm2, %v2648_v41, %v5181_v29  ;;  %v2575_v9 = vpop.permute.xlu1 %2574  ;;  %v5188_v2 = vmul.f32 %v5105_v56, %v2577_v18 }
0x1354   :  { %v5191_v36 = vmul.f32 %v5108_v12, %v2575_v9  ;;  %v2651_v7 = vsel %vm533_vm3, %v2650_v5, %v2649_v10 }
0x1355   :  { %5599 = vst [vmem:[#allocation22_spill] sm:$0xff] %v5188_v2  ;;  %v2654_v34 = vrot.slane %v5188_v2, 4 }
0x1356   :  { %v2652_v28 = vrot.slane %v5191_v36, 5  ;;  %v2581_v30 = vpop.permute.xlu0 %2580 }
0x1357   :  { %v2579_v62 = vpop.permute.xlu1 %2578  ;;  %v5197_v26 = vmul.f32 %v5113_v60, %v2581_v30 }
0x1358   :  { %v2653_v63 = vsel %vm536_vm4, %v2652_v28, %v2651_v7  ;;  %v5201_v41 = vmul.f32 %v5116_v59, %v2579_v62  ;;  %v2640_v28 = vld [vmem:[#allocation2 + $0x7] sm:$0x1] }
0x1359   :  { %5600 = vst [vmem:[#allocation23_spill] sm:$0xff] %v5197_v26  ;;  %v2655_v56 = vsel %vm539_vm5, %v2654_v34, %v2653_v63  ;;  %v2658_v12 = vrot.slane %v5197_v26, 2 }
0x135a   :  { %5601 = vst [vmem:[#allocation24_spill] sm:$0xff] %v5201_v41  ;;  %v2656_v18 = vrot.slane %v5201_v41, 3  ;;  %v2643_v41 = vld [vmem:[#allocation2 + $0x1f] sm:$0x1] }
0x135b   :  { %v2583_v5 = vpop.permute.xlu1 %2582 }
0x135c   :  { %v2657_v10 = vsel %vm542_vm6, %v2656_v18, %v2655_v56  ;;  %v5208_v9 = vmul.f32 %v5122_v3, %v2583_v5  ;;  %v2641_v3 = vld [vmem:[#allocation2 + $0xf] sm:$0x1]  ;;  %v2642_v5 = vld [vmem:[#allocation2 + $0x17] sm:$0x1] }
0x135d   :  { %v2659_v60 = vsel %vm545_vm7, %v2658_v12, %v2657_v10 }
0x135e   :  { %5602 = vst [vmem:[#allocation25_spill] sm:$0xff] %v5208_v9  ;;  %v2660_v30 = vrot.slane %v5208_v9, 1 }
0x1360   :  { %v2661_v7 = vsel %vm548_vm8, %v2660_v30, %v2659_v60  ;;  %v2644_v60 = vld [vmem:[#allocation2 + $0x27] sm:$0x1] }
0x1361   :  { %2662 = vrot.lane.b32.xlu0 %v2661_v7, %s4178_s24 }
0x13d3   :  { %v2663_v59 = vpop.permute.xlu0 %2662 }
0x13d4   :  { %3541 = vmatmul.mubr.msk.f32.vlgmr.msra.gmra.mrb[12].mxu1 %vm190_vm9, %v2663_v59 }
0x14a7   :  { %v2732_v34 = vpop.f32.mrb[12].mxu1 }
0x14a8   :  { %v3542_v62 = vpop.f32.mrb[13].mxu1  ;;  %v2752_v63 = vadd.f32 %v2732_v34, %v2640_v28  ;;  %v2737_v56 = vrot.slane %v2732_v34, 1  ;;  %v2738_v18 = vrot.slane %v2732_v34, 2  ;;  %v2739_v26 = vrot.slane %v2732_v34, 3  ;;  %v2645_v28 = vld [vmem:[#allocation2 + $0x2f] sm:$0x1] }
0x14a9   :  { %v2740_v10 = vrot.slane %v2732_v34, 4  ;;  %v2741_v30 = vrot.slane %v2732_v34, 5  ;;  %v2742_v59 = vrot.slane %v2732_v34, 6  ;;  %v2646_v62 = vld [vmem:[#allocation2 + $0x37] sm:$0x1]  ;;  %v2743_v4 = vrot.slane %v2732_v34, 7 }
0x14aa   :  { %4078 = vtanh.f32 %v2752_v63  ;;  %v2753_v12 = vadd.f32 %v2737_v56, %v2641_v3  ;;  %v2754_v9 = vadd.f32 %v2738_v18, %v2642_v5  ;;  %v2755_v7 = vadd.f32 %v2739_v26, %v2643_v41  ;;  %v2647_v56 = vld [vmem:[#allocation2 + $0x3f] sm:$0x1] }
0x14ab   :  { %v2756_v47 = vadd.f32 %v2740_v10, %v2644_v60  ;;  %v2757_v2 = vadd.f32 %v2741_v30, %v2645_v28  ;;  %v2758_v61 = vadd.f32 %v2742_v59, %v2646_v62  ;;  %v2759_v18 = vadd.f32 %v2743_v4, %v2647_v56 }
0x14ac   :  { %4080 = vtanh.f32 %v2753_v12  ;;  %v3360_v10 = vmul.f32 -1.442695, %v2752_v63  ;;  %v3361_v60 = vmul.f32 -1.442695, %v2753_v12  ;;  %v3362_v30 = vmul.f32 -1.442695, %v2754_v9 }
0x14ad   :  { %4082 = vtanh.f32 %v2754_v9  ;;  %v3365_v28 = vmul.f32 -1.442695, %v2757_v2  ;;  %v3367_v62 = vmul.f32 -1.442695, %v2759_v18 }
0x14ae   :  { %4084 = vtanh.f32 %v2755_v7 }
0x14af   :  { %4086 = vtanh.f32 %v2756_v47 }
0x14b0   :  { %4088 = vtanh.f32 %v2757_v2 }
0x14b1   :  { %4090 = vtanh.f32 %v2758_v61 }
0x14b2   :  { %4092 = vtanh.f32 %v2759_v18 }
0x14b3   :  { %4094 = vpow2.f32 %v3360_v10 }
0x14b4   :  { %v4079_v58 = vpop.eup %4078  ;;  %4096 = vpow2.f32 %v3361_v60 }
0x14b5   :  { %2832 = vrot.lane.b32.xlu1 %v4079_v58, %s4177_s3  ;;  %4098 = vpow2.f32 %v3362_v30 }
0x14b6   :  { %v4081_v3 = vpop.eup %4080 }
0x14b7   :  { %v4083_v26 = vpop.eup %4082  ;;  %2834 = vrot.lane.b32.xlu0 %v4081_v3, %s4177_s3 }
0x14b8   :  { %v4085_v41 = vpop.eup %4084 }
0x14b9   :  { %2836 = vrot.lane.b32.xlu1 %v4083_v26, %s4177_s3  ;;  %v4087_v58 = vpop.eup %4086 }
0x14ba   :  { %v4089_v34 = vpop.eup %4088 }
0x14bb   :  { %2838 = vrot.lane.b32.xlu0 %v4085_v41, %s4177_s3  ;;  %v4091_v5 = vpop.eup %4090 }
0x14bc   :  { %v4093_v4 = vpop.eup %4092 }
0x14bd   :  { %2840 = vrot.lane.b32.xlu1 %v4087_v58, %s4177_s3  ;;  %v4095_v59 = vpop.eup %4094 }
0x14bf   :  { %2842 = vrot.lane.b32.xlu0 %v4089_v34, %s4177_s3 }
0x14c1   :  { %2844 = vrot.lane.b32.xlu1 %v4091_v5, %s4177_s3 }
0x14c3   :  { %2846 = vrot.lane.b32.xlu0 %v4093_v4, %s4177_s3 }
0x14c5   :  { %488 = vrot.lane.b32.xlu1 %v4376_v35, %s4178_s24  ;;  %v3363_v35 = vmul.f32 -1.442695, %v2755_v7 }
0x14c7   :  { %848 = vrot.lane.b32.xlu0 %v4514_v31, %s4178_s24  ;;  %v3364_v31 = vmul.f32 -1.442695, %v2756_v47  ;;  %4100 = vpow2.f32 %v3363_v35 }
0x14c9   :  { %1200 = vrot.lane.b32.xlu1 %v4649_v22, %s4178_s24  ;;  %v2784_v22 = vadd.f32 1.0, %v4095_v59  ;;  %4102 = vpow2.f32 %v3364_v31 }
0x14ca   :  { %4104 = vpow2.f32 %v3365_v28 }
0x14cb   :  { %1552 = vrot.lane.b32.xlu0 %v4784_v32, %s4178_s24  ;;  %v3366_v32 = vmul.f32 -1.442695, %v2758_v61  ;;  %4106 = vrcp.f32 %v2784_v22 }
0x14cd   :  { %1904 = vrot.lane.b32.xlu1 %v4918_v15, %s4178_s24  ;;  %4108 = vpow2.f32 %v3366_v32  ;;  %v4097_v15 = vpop.eup %4096 }
0x14ce   :  { %4110 = vpow2.f32 %v3367_v62  ;;  %v2785_v63 = vadd.f32 1.0, %v4097_v15 }
0x14cf   :  { %2256 = vrot.lane.b32.xlu0 %v5052_v14, %s4178_s24  ;;  %v4099_v14 = vpop.eup %4098 }
0x14d0   :  { %v2786_v9 = vadd.f32 1.0, %v4099_v14  ;;  %4112 = vrcp.f32 %v2785_v63 }
0x14d1   :  { %v4101_v12 = vpop.eup %4100 }
0x14d2   :  { %v2787_v3 = vadd.f32 1.0, %v4101_v12  ;;  %4114 = vrcp.f32 %v2786_v9 }
0x14d3   :  { %v4103_v56 = vpop.eup %4102 }
0x14d4   :  { %v4105_v7 = vpop.eup %4104  ;;  %v2788_v26 = vadd.f32 1.0, %v4103_v56  ;;  %4116 = vrcp.f32 %v2787_v3 }
0x14d5   :  { %v5235_v47 = vpop.eup %4106  ;;  %v2789_v41 = vadd.f32 1.0, %v4105_v7 }
0x14d6   :  { %4118 = vrcp.f32 %v2788_v26 }
0x14d7   :  { %v4109_v61 = vpop.eup %4108  ;;  %4120 = vrcp.f32 %v2789_v41 }
0x14d8   :  { %v4111_v58 = vpop.eup %4110  ;;  %v2790_v34 = vadd.f32 1.0, %v4109_v61 }
0x14d9   :  { %v2791_v5 = vadd.f32 1.0, %v4111_v58 }
0x14da   :  { %4122 = vrcp.f32 %v2790_v34  ;;  %v5239_v4 = vpop.eup %4112 }
0x14db   :  { %4124 = vrcp.f32 %v2791_v5 }
0x14dc   :  { %v5241_v60 = vpop.eup %4114 }
0x14de   :  { %v5246_v31 = vpop.eup %4116 }
0x14e0   :  { %v5249_v22 = vpop.eup %4118 }
0x14e1   :  { %v5254_v14 = vpop.eup %4120 }
0x14e4   :  { %v5257_v12 = vpop.eup %4122 }
0x14e5   :  { %v5262_v3 = vpop.eup %4124 }
0x1527   :  { %v2833_v2 = vpop.permute.xlu1 %2832 }
0x1528   :  { %v2856_v18 = vmul.f32 %v5235_v47, %v2833_v2 }
0x1529   :  { %v2835_v10 = vpop.permute.xlu0 %2834 }
0x152a   :  { %2872 = vrot.lane.b32.xlu1 %v2856_v18, %s4178_s24  ;;  %v2857_v30 = vmul.f32 %v5239_v4, %v2835_v10 }
0x152b   :  { %v2837_v35 = vpop.permute.xlu1 %2836 }
0x152c   :  { %v2858_v59 = vmul.f32 %v5241_v60, %v2837_v35  ;;  %2874 = vrot.lane.b32.xlu0 %v2857_v30, %s4178_s24 }
0x152d   :  { %v2839_v28 = vpop.permute.xlu0 %2838 }
0x152e   :  { %2876 = vrot.lane.b32.xlu1 %v2858_v59, %s4178_s24  ;;  %v2859_v32 = vmul.f32 %v5246_v31, %v2839_v28 }
0x152f   :  { %v2841_v62 = vpop.permute.xlu1 %2840 }
0x1530   :  { %v2860_v15 = vmul.f32 %v5249_v22, %v2841_v62  ;;  %2878 = vrot.lane.b32.xlu0 %v2859_v32, %s4178_s24 }
0x1531   :  { %v2843_v63 = vpop.permute.xlu0 %2842 }
0x1532   :  { %2880 = vrot.lane.b32.xlu1 %v2860_v15, %s4178_s24  ;;  %v2861_v9 = vmul.f32 %v5254_v14, %v2843_v63  ;;  %v2823_v63 = vmul.f32 %v5262_v3, %v5164_v48 }
0x1533   :  { %v2845_v56 = vpop.permute.xlu1 %2844 }
0x1534   :  { %v2862_v7 = vmul.f32 %v5257_v12, %v2845_v56  ;;  %2882 = vrot.lane.b32.xlu0 %v2861_v9, %s4178_s24 }
0x1535   :  { %v2847_v2 = vpop.permute.xlu0 %2846 }
0x1536   :  { %2884 = vrot.lane.b32.xlu1 %v2862_v7, %s4178_s24  ;;  %v2863_v26 = vmul.f32 %v5262_v3, %v2847_v2  ;;  %v5604_v7 = vld [vmem:[#allocation22_spill] sm:$0xff] }
0x1537   :  { %v489_v61 = vpop.permute.xlu1 %488 }
0x1538   :  { %513 = vst.msk [vmem:[#allocation3] sm:$0x1] %vm512_vm10, %v489_v61  ;;  %2886 = vrot.lane.b32.xlu0 %v2863_v26, %s4178_s24  ;;  %v5606_v26 = vld [vmem:[#allocation4_spill] sm:$0xff] }
0x1539   :  { %v849_v18 = vpop.permute.xlu0 %848 }
0x153a   :  { %2608 = vrot.lane.b32.xlu1 %v5181_v29, %s4178_s24  ;;  %872 = vst.msk [vmem:[#allocation3 + $0x1] sm:$0x1] %vm512_vm10, %v849_v18 }
0x153b   :  { %v1201_v41 = vpop.permute.xlu1 %1200 }
0x153c   :  { %1224 = vst.msk [vmem:[#allocation3 + $0x2] sm:$0x1] %vm512_vm10, %v1201_v41  ;;  %850 = vrot.lane.b32.xlu0 %v4508_v38, %s4178_s24 }
0x153d   :  { %v1553_v58 = vpop.permute.xlu0 %1552 }
0x153e   :  { %490 = vrot.lane.b32.xlu1 %v4373_v33, %s4178_s24  ;;  %1576 = vst.msk [vmem:[#allocation3 + $0x3] sm:$0x1] %vm512_vm10, %v1553_v58  ;;  %v2816_v33 = vmul.f32 %v5235_v47, %v5128_v6  ;;  %v2822_v6 = vmul.f32 %v5257_v12, %v5156_v16  ;;  %v5607_v58 = vld [vmem:[#allocation11_spill] sm:$0xff] }
0x153f   :  { %v1905_v34 = vpop.permute.xlu1 %1904 }
0x1540   :  { %1928 = vst.msk [vmem:[#allocation3 + $0x4] sm:$0x1] %vm512_vm10, %v1905_v34  ;;  %1554 = vrot.lane.b32.xlu0 %v4778_v52, %s4178_s24  ;;  %v2819_v52 = vmul.f32 %v5246_v31, %v5148_v20 }
0x1541   :  { %v2257_v29 = vpop.permute.xlu0 %2256 }
0x1542   :  { %1202 = vrot.lane.b32.xlu1 %v4643_v25, %s4178_s24  ;;  %2280 = vst.msk [vmem:[#allocation3 + $0x5] sm:$0x1] %vm512_vm10, %v2257_v29 }
0x1544   :  { %2258 = vrot.lane.b32.xlu0 %v5046_v11, %s4178_s24 }
0x1546   :  { %1906 = vrot.lane.b32.xlu1 %v4912_v8, %s4178_s24  ;;  %v2820_v8 = vmul.f32 %v5249_v22, %v5145_v21 }
0x1548   :  { %852 = vrot.lane.b32.xlu0 %v4511_v42, %s4178_s24  ;;  %v2817_v42 = vmul.f32 %v5239_v4, %v5135_v51 }
0x154a   :  { %2610 = vrot.lane.b32.xlu1 %v5175_v54, %s4178_s24 }
0x154c   :  { %1556 = vrot.lane.b32.xlu0 %v4781_v45, %s4178_s24 }
0x154e   :  { %492 = vrot.lane.b32.xlu1 %v4385_v40, %s4178_s24 }
0x1550   :  { %2260 = vrot.lane.b32.xlu0 %v5049_v27, %s4178_s24  ;;  %v2821_v27 = vmul.f32 %v5254_v14, %v5158_v50 }
0x1552   :  { %1204 = vrot.lane.b32.xlu1 %v4646_v1, %s4178_s24 }
0x1554   :  { %854 = vrot.lane.b32.xlu0 %v4524_v24, %s4178_s24 }
0x1556   :  { %1908 = vrot.lane.b32.xlu1 %v4915_v0, %s4178_s24 }
0x1558   :  { %1558 = vrot.lane.b32.xlu0 %v4794_v19, %s4178_s24 }
0x155a   :  { %2612 = vrot.lane.b32.xlu1 %v5178_v17, %s4178_s24 }
0x155c   :  { %2262 = vrot.lane.b32.xlu0 %v5062_v44, %s4178_s24 }
0x155e   :  { %494 = vrot.lane.b32.xlu1 %v4379_v37, %s4178_s24  ;;  %v2818_v37 = vmul.f32 %v5241_v60, %v5137_v49 }
0x1562   :  { %1206 = vrot.lane.b32.xlu1 %v4659_v57, %s4178_s24 }
0x1566   :  { %1910 = vrot.lane.b32.xlu1 %v4928_v43, %s4178_s24 }
0x156a   :  { %2614 = vrot.lane.b32.xlu1 %v5191_v36, %s4178_s24 }
0x159c   :  { %v2873_v40 = vpop.permute.xlu1 %2872 }
0x159d   :  { %v2896_v38 = vadd.f32 %v2873_v40, %v2816_v33  ;;  %v5608_v33 = vld [vmem:[#allocation20_spill] sm:$0xff]  ;;  %v5609_v40 = vld [vmem:[#allocation17_spill] sm:$0xff] }
0x159e   :  { %v2875_v24 = vpop.permute.xlu0 %2874 }
0x159f   :  { %4126 = vtanh.f32 %v2896_v38  ;;  %v2897_v25 = vadd.f32 %v2875_v24, %v2817_v42  ;;  %v5610_v42 = vld [vmem:[#allocation7_spill] sm:$0xff]  ;;  %v5611_v24 = vld [vmem:[#allocation24_spill] sm:$0xff] }
0x15a0   :  { %v2877_v1 = vpop.permute.xlu1 %2876 }
0x15a1   :  { %v2898_v57 = vadd.f32 %v2877_v1, %v2818_v37  ;;  %4128 = vtanh.f32 %v2897_v25  ;;  %v5612_v25 = vld [vmem:[#allocation13_spill] sm:$0xff] }
0x15a2   :  { %v2879_v19 = vpop.permute.xlu0 %2878  ;;  %v5613_v1 = vld [vmem:[#allocation5_spill] sm:$0xff] }
0x15a3   :  { %4130 = vtanh.f32 %v2898_v57  ;;  %v2899_v0 = vadd.f32 %v2879_v19, %v2819_v52  ;;  %v5614_v52 = vld [vmem:[#allocation19_spill] sm:$0xff]  ;;  %v5616_v19 = vld [vmem:[#allocation9_spill] sm:$0xff] }
0x15a4   :  { %v2881_v43 = vpop.permute.xlu1 %2880 }
0x15a5   :  { %v2900_v11 = vadd.f32 %v2881_v43, %v2820_v8  ;;  %4132 = vtanh.f32 %v2899_v0  ;;  %v5617_v8 = vld [vmem:[#allocation16_spill] sm:$0xff]  ;;  %v5618_v0 = vld [vmem:[#allocation15_spill] sm:$0xff] }
0x15a6   :  { %v2883_v44 = vpop.permute.xlu0 %2882  ;;  %v5619_v43 = vld [vmem:[#allocation23_spill] sm:$0xff] }
0x15a7   :  { %4134 = vtanh.f32 %v2900_v11  ;;  %v2901_v51 = vadd.f32 %v2883_v44, %v2821_v27  ;;  %v5620_v11 = vld [vmem:[#allocation21_spill] sm:$0xff]  ;;  %v5621_v27 = vld [vmem:[#allocation6_spill] sm:$0xff]  ;;  %v5622_v44 = vld [vmem:[#allocation12_spill] sm:$0xff] }
0x15a8   :  { %v2885_v49 = vpop.permute.xlu1 %2884 }
0x15a9   :  { %v4127_v45 = vpop.eup %4126  ;;  %v2902_v20 = vadd.f32 %v2885_v49, %v2822_v6  ;;  %4136 = vtanh.f32 %v2901_v51  ;;  %v5623_v6 = vld [vmem:[#allocation18_spill] sm:$0xff]  ;;  %v5624_v51 = vld [vmem:[#allocation25_spill] sm:$0xff] }
0x15aa   :  { %2920 = vrot.lane.b32.xlu1 %v4127_v45, %s4177_s3  ;;  %v2887_v21 = vpop.permute.xlu0 %2886  ;;  %v5615_v45 = vld [vmem:[#allocation10_spill] sm:$0xff] }
0x15ab   :  { %4138 = vtanh.f32 %v2902_v20  ;;  %v4129_v54 = vpop.eup %4128  ;;  %v2903_v56 = vadd.f32 %v2887_v21, %v2823_v63  ;;  %v3000_v20 = vld [vmem:[%s5552_s4] sm:$0xff]  ;;  %v3001_v21 = vld [vmem:[%s5552_s4 + $0x8] sm:$0xff] }
0x15ac   :  { %v2609_v17 = vpop.permute.xlu1 %2608  ;;  %2922 = vrot.lane.b32.xlu0 %v4129_v54, %s4177_s3 }
0x15ad   :  { %v4131_v36 = vpop.eup %4130  ;;  %2632 = vst.msk [vmem:[#allocation3 + $0x6] sm:$0x1] %vm512_vm10, %v2609_v17  ;;  %4140 = vtanh.f32 %v2903_v56  ;;  %v3615_v17 = vpack.c.bf16 %v3001_v21, %v3000_v20  ;;  %v5494_v21 = vld [vmem:[%s5553_s5] ss:$0 sm:$0xff] }
0x15ae   :  { %2924 = vrot.lane.b32.xlu1 %v4131_v36, %s4177_s3  ;;  %v851_v50 = vpop.permute.xlu0 %850  ;;  %v3002_v36 = vld [vmem:[%s5552_s4 + $0x10] sm:$0xff] }
0x15af   :  { %v4133_v5 = vpop.eup %4132  ;;  %873 = vst.msk [vmem:[#allocation3 + $0x9] sm:$0x1] %vm512_vm10, %v851_v50  ;;  %3616 = vmatprep.subr.bf16.mxu0 %v3615_v17  ;;  %v3003_v50 = vld [vmem:[%s5552_s4 + $0x18] sm:$0xff] }
0x15b0   :  { %v491_v16 = vpop.permute.xlu1 %490  ;;  %2926 = vrot.lane.b32.xlu0 %v4133_v5, %s4177_s3  ;;  %3618 = vmatpush3.bf16.msra.mxu0 %v3615_v17  ;;  %v3619_v5 = vpack.c.bf16 %v3003_v50, %v3002_v36 }
0x15b1   :  { %v4135_v10 = vpop.eup %4134  ;;  %514 = vst.msk [vmem:[#allocation3 + $0x8] sm:$0x1] %vm512_vm10, %v491_v16 }
0x15b2   :  { %2928 = vrot.lane.b32.xlu1 %v4135_v10, %s4177_s3  ;;  %v1555_v30 = vpop.permute.xlu0 %1554  ;;  %3620 = vmatprep.subr.bf16.mxu0 %v3619_v5 }
0x15b3   :  { %v4137_v35 = vpop.eup %4136  ;;  %1577 = vst.msk [vmem:[#allocation3 + $0xb] sm:$0x1] %vm512_vm10, %v1555_v30 }
0x15b4   :  { %v1203_v59 = vpop.permute.xlu1 %1202  ;;  %2930 = vrot.lane.b32.xlu0 %v4137_v35, %s4177_s3  ;;  %3622 = vmatpush3.bf16.msra.mxu0 %v3619_v5 }
0x15b5   :  { %v4139_v28 = vpop.eup %4138  ;;  %1225 = vst.msk [vmem:[#allocation3 + $0xa] sm:$0x1] %vm512_vm10, %v1203_v59 }
0x15b6   :  { %2932 = vrot.lane.b32.xlu1 %v4139_v28, %s4177_s3  ;;  %v2259_v32 = vpop.permute.xlu0 %2258 }
0x15b7   :  { %2281 = vst.msk [vmem:[#allocation3 + $0xd] sm:$0x1] %vm512_vm10, %v2259_v32  ;;  %v4141_v18 = vpop.eup %4140 }
0x15b8   :  { %v1907_v62 = vpop.permute.xlu1 %1906  ;;  %856 = vrot.lane.b32.xlu0 %v4521_v53, %s4178_s24 }
0x15b9   :  { %1929 = vst.msk [vmem:[#allocation3 + $0xc] sm:$0x1] %vm512_vm10, %v1907_v62 }
0x15ba   :  { %496 = vrot.lane.b32.xlu1 %v4382_v39, %s4178_s24  ;;  %v853_v15 = vpop.permute.xlu0 %852 }
0x15bb   :  { %874 = vst.msk [vmem:[#allocation3 + $0x11] sm:$0x1] %vm512_vm10, %v853_v15 }
0x15bc   :  { %v2611_v9 = vpop.permute.xlu1 %2610  ;;  %1560 = vrot.lane.b32.xlu0 %v4791_v55, %s4178_s24 }
0x15bd   :  { %2633 = vst.msk [vmem:[#allocation3 + $0xe] sm:$0x1] %vm512_vm10, %v2611_v9 }
0x15be   :  { %1208 = vrot.lane.b32.xlu1 %v4656_v46, %s4178_s24  ;;  %v1557_v53 = vpop.permute.xlu0 %1556  ;;  %v5603_v46 = vld [vmem:[#allocation8_spill] sm:$0xff] }
0x15bf   :  { %1578 = vst.msk [vmem:[#allocation3 + $0x13] sm:$0x1] %vm512_vm10, %v1557_v53 }
0x15c0   :  { %v493_v39 = vpop.permute.xlu1 %492  ;;  %2264 = vrot.lane.b32.xlu0 %v5059_v13, %s4178_s24 }
0x15c1   :  { %515 = vst.msk [vmem:[#allocation3 + $0x10] sm:$0x1] %vm512_vm10, %v493_v39 }
0x15c2   :  { %1912 = vrot.lane.b32.xlu1 %v4925_v23, %s4178_s24  ;;  %v2261_v48 = vpop.permute.xlu0 %2260  ;;  %v5605_v23 = vld [vmem:[#allocation14_spill] sm:$0xff] }
0x15c3   :  { %2282 = vst.msk [vmem:[#allocation3 + $0x15] sm:$0x1] %vm512_vm10, %v2261_v48 }
0x15c4   :  { %v1205_v55 = vpop.permute.xlu1 %1204  ;;  %858 = vrot.lane.b32.xlu0 %v5603_v46, %s4178_s24 }
0x15c5   :  { %1226 = vst.msk [vmem:[#allocation3 + $0x12] sm:$0x1] %vm512_vm10, %v1205_v55 }
0x15c6   :  { %2616 = vrot.lane.b32.xlu1 %v5604_v7, %s4178_s24  ;;  %v855_v2 = vpop.permute.xlu0 %854 }
0x15c7   :  { %875 = vst.msk [vmem:[#allocation3 + $0x19] sm:$0x1] %vm512_vm10, %v855_v2 }
0x15c8   :  { %v1909_v13 = vpop.permute.xlu1 %1908  ;;  %1562 = vrot.lane.b32.xlu0 %v5605_v23, %s4178_s24 }
0x15c9   :  { %1930 = vst.msk [vmem:[#allocation3 + $0x14] sm:$0x1] %vm512_vm10, %v1909_v13 }
0x15ca   :  { %498 = vrot.lane.b32.xlu1 %v5606_v26, %s4178_s24  ;;  %v1559_v61 = vpop.permute.xlu0 %1558 }
0x15cb   :  { %1579 = vst.msk [vmem:[#allocation3 + $0x1b] sm:$0x1] %vm512_vm10, %v1559_v61 }
0x15cc   :  { %v2613_v41 = vpop.permute.xlu1 %2612  ;;  %2934 = vrot.lane.b32.xlu0 %v4141_v18, %s4177_s3 }
0x15cd   :  { %2634 = vst.msk [vmem:[#allocation3 + $0x16] sm:$0x1] %vm512_vm10, %v2613_v41 }
0x15ce   :  { %1210 = vrot.lane.b32.xlu1 %v5607_v58, %s4178_s24  ;;  %v2263_v34 = vpop.permute.xlu0 %2262 }
0x15cf   :  { %2283 = vst.msk [vmem:[#allocation3 + $0x1d] sm:$0x1] %vm512_vm10, %v2263_v34 }
0x15d0   :  { %v495_v29 = vpop.permute.xlu1 %494  ;;  %2266 = vrot.lane.b32.xlu0 %v5608_v33, %s4178_s24 }
0x15d1   :  { %516 = vst.msk [vmem:[#allocation3 + $0x18] sm:$0x1] %vm512_vm10, %v495_v29 }
0x15d2   :  { %1914 = vrot.lane.b32.xlu1 %v5609_v40, %s4178_s24 }
0x15d4   :  { %v1207_v38 = vpop.permute.xlu1 %1206  ;;  %860 = vrot.lane.b32.xlu0 %v5610_v42, %s4178_s24 }
0x15d5   :  { %1227 = vst.msk [vmem:[#allocation3 + $0x1a] sm:$0x1] %vm512_vm10, %v1207_v38 }
0x15d6   :  { %2618 = vrot.lane.b32.xlu1 %v5611_v24, %s4178_s24 }
0x15d8   :  { %v1911_v37 = vpop.permute.xlu1 %1910  ;;  %1564 = vrot.lane.b32.xlu0 %v5612_v25, %s4178_s24 }
0x15d9   :  { %1931 = vst.msk [vmem:[#allocation3 + $0x1c] sm:$0x1] %vm512_vm10, %v1911_v37 }
0x15da   :  { %500 = vrot.lane.b32.xlu1 %v5613_v1, %s4178_s24 }
0x15dc   :  { %v2615_v57 = vpop.permute.xlu1 %2614  ;;  %2268 = vrot.lane.b32.xlu0 %v5614_v52, %s4178_s24 }
0x15dd   :  { %2635 = vst.msk [vmem:[#allocation3 + $0x1e] sm:$0x1] %vm512_vm10, %v2615_v57 }
0x15de   :  { %1212 = vrot.lane.b32.xlu1 %v5615_v45, %s4178_s24 }
0x15e0   :  { %862 = vrot.lane.b32.xlu0 %v5616_v19, %s4178_s24 }
0x15e2   :  { %1916 = vrot.lane.b32.xlu1 %v5617_v8, %s4178_s24 }
0x15e4   :  { %1566 = vrot.lane.b32.xlu0 %v5618_v0, %s4178_s24 }
0x15e6   :  { %2620 = vrot.lane.b32.xlu1 %v5619_v43, %s4178_s24 }
0x15e8   :  { %2270 = vrot.lane.b32.xlu0 %v5620_v11, %s4178_s24 }
0x15ea   :  { %502 = vrot.lane.b32.xlu1 %v5621_v27, %s4178_s24 }
0x15ee   :  { %1214 = vrot.lane.b32.xlu1 %v5622_v44, %s4178_s24 }
0x15f2   :  { %1918 = vrot.lane.b32.xlu1 %v5623_v6, %s4178_s24 }
0x15f6   :  { %2622 = vrot.lane.b32.xlu1 %v5624_v51, %s4178_s24 }
0x161c   :  { %v2921_v49 = vpop.permute.xlu1 %2920 }
0x161d   :  { %v2944_v54 = vmul.f32 %v5235_v47, %v2921_v49 }
0x161e   :  { %v2923_v16 = vpop.permute.xlu0 %2922 }
0x161f   :  { %2960 = vrot.lane.b32.xlu0 %v2944_v54, %s4178_s24  ;;  %v2945_v10 = vmul.f32 %v5239_v4, %v2923_v16 }
0x1620   :  { %v2925_v47 = vpop.permute.xlu1 %2924 }
0x1621   :  { %v2946_v35 = vmul.f32 %v5241_v60, %v2925_v47 }
0x1622   :  { %v2927_v30 = vpop.permute.xlu0 %2926 }
0x1623   :  { %2962 = vrot.lane.b32.xlu0 %v2945_v10, %s4178_s24  ;;  %v2947_v32 = vmul.f32 %v5246_v31, %v2927_v30 }
0x1624   :  { %v2929_v59 = vpop.permute.xlu1 %2928 }
0x1625   :  { %v2948_v63 = vmul.f32 %v5249_v22, %v2929_v59 }
0x1626   :  { %v2931_v28 = vpop.permute.xlu0 %2930 }
0x1627   :  { %2964 = vrot.lane.b32.xlu0 %v2946_v35, %s4178_s24  ;;  %v2949_v9 = vmul.f32 %v5254_v14, %v2931_v28 }
0x1628   :  { %v2933_v62 = vpop.permute.xlu1 %2932 }
0x1629   :  { %v2950_v22 = vmul.f32 %v5257_v12, %v2933_v62 }
0x162a   :  { %v857_v15 = vpop.permute.xlu0 %856 }
0x162b   :  { %2966 = vrot.lane.b32.xlu0 %v2947_v32, %s4178_s24  ;;  %876 = vst.msk [vmem:[#allocation3 + $0x21] sm:$0x1] %vm512_vm10, %v857_v15 }
0x162c   :  { %v497_v4 = vpop.permute.xlu1 %496 }
0x162d   :  { %517 = vst.msk [vmem:[#allocation3 + $0x20] sm:$0x1] %vm512_vm10, %v497_v4 }
0x162e   :  { %v1561_v60 = vpop.permute.xlu0 %1560 }
0x162f   :  { %2968 = vrot.lane.b32.xlu0 %v2948_v63, %s4178_s24  ;;  %1580 = vst.msk [vmem:[#allocation3 + $0x23] sm:$0x1] %vm512_vm10, %v1561_v60 }
0x1630   :  { %v1209_v56 = vpop.permute.xlu1 %1208 }
0x1631   :  { %1228 = vst.msk [vmem:[#allocation3 + $0x22] sm:$0x1] %vm512_vm10, %v1209_v56 }
0x1632   :  { %v2265_v31 = vpop.permute.xlu0 %2264 }
0x1633   :  { %2970 = vrot.lane.b32.xlu0 %v2949_v9, %s4178_s24  ;;  %2284 = vst.msk [vmem:[#allocation3 + $0x25] sm:$0x1] %vm512_vm10, %v2265_v31 }
0x1634   :  { %v1913_v53 = vpop.permute.xlu1 %1912 }
0x1635   :  { %1932 = vst.msk [vmem:[#allocation3 + $0x24] sm:$0x1] %vm512_vm10, %v1913_v53 }
0x1636   :  { %v859_v39 = vpop.permute.xlu0 %858 }
0x1637   :  { %2972 = vrot.lane.b32.xlu0 %v2950_v22, %s4178_s24  ;;  %877 = vst.msk [vmem:[#allocation3 + $0x29] sm:$0x1] %vm512_vm10, %v859_v39 }
0x1638   :  { %v2617_v14 = vpop.permute.xlu1 %2616 }
0x1639   :  { %2636 = vst.msk [vmem:[#allocation3 + $0x26] sm:$0x1] %vm512_vm10, %v2617_v14 }
0x163a   :  { %v1563_v48 = vpop.permute.xlu0 %1562 }
0x163b   :  { %1581 = vst.msk [vmem:[#allocation3 + $0x2b] sm:$0x1] %vm512_vm10, %v1563_v48 }
0x163c   :  { %v499_v55 = vpop.permute.xlu1 %498 }
0x163d   :  { %518 = vst.msk [vmem:[#allocation3 + $0x28] sm:$0x1] %vm512_vm10, %v499_v55 }
0x163e   :  { %v2935_v12 = vpop.permute.xlu0 %2934 }
0x163f   :  { %v2951_v46 = vmul.f32 %v5262_v3, %v2935_v12 }
0x1640   :  { %v1211_v7 = vpop.permute.xlu1 %1210 }
0x1641   :  { %1229 = vst.msk [vmem:[#allocation3 + $0x2a] sm:$0x1] %vm512_vm10, %v1211_v7  ;;  %2974 = vrot.lane.b32.xlu0 %v2951_v46, %s4178_s24 }
0x1642   :  { %v2267_v2 = vpop.permute.xlu0 %2266 }
0x1643   :  { %2285 = vst.msk [vmem:[#allocation3 + $0x2d] sm:$0x1] %vm512_vm10, %v2267_v2 }
0x1644   :  { %v1915_v13 = vpop.permute.xlu1 %1914 }
0x1645   :  { %1933 = vst.msk [vmem:[#allocation3 + $0x2c] sm:$0x1] %vm512_vm10, %v1915_v13 }
0x1646   :  { %v861_v23 = vpop.permute.xlu0 %860 }
0x1647   :  { %878 = vst.msk [vmem:[#allocation3 + $0x31] sm:$0x1] %vm512_vm10, %v861_v23 }
0x1648   :  { %v2619_v26 = vpop.permute.xlu1 %2618 }
0x1649   :  { %2637 = vst.msk [vmem:[#allocation3 + $0x2e] sm:$0x1] %vm512_vm10, %v2619_v26 }
0x164a   :  { %v1565_v61 = vpop.permute.xlu0 %1564 }
0x164b   :  { %1582 = vst.msk [vmem:[#allocation3 + $0x33] sm:$0x1] %vm512_vm10, %v1565_v61 }
0x164c   :  { %v501_v3 = vpop.permute.xlu1 %500 }
0x164d   :  { %519 = vst.msk [vmem:[#allocation3 + $0x30] sm:$0x1] %vm512_vm10, %v501_v3 }
0x164e   :  { %v2269_v18 = vpop.permute.xlu0 %2268 }
0x164f   :  { %2286 = vst.msk [vmem:[#allocation3 + $0x35] sm:$0x1] %vm512_vm10, %v2269_v18 }
0x1650   :  { %v1213_v41 = vpop.permute.xlu1 %1212 }
0x1651   :  { %1230 = vst.msk [vmem:[#allocation3 + $0x32] sm:$0x1] %vm512_vm10, %v1213_v41 }
0x1652   :  { %v863_v58 = vpop.permute.xlu0 %862 }
0x1653   :  { %879 = vst.msk [vmem:[#allocation3 + $0x39] sm:$0x1] %vm512_vm10, %v863_v58 }
0x1654   :  { %v1917_v34 = vpop.permute.xlu1 %1916 }
0x1655   :  { %1934 = vst.msk [vmem:[#allocation3 + $0x34] sm:$0x1] %vm512_vm10, %v1917_v34 }
0x1656   :  { %v1567_v29 = vpop.permute.xlu0 %1566 }
0x1657   :  { %1583 = vst.msk [vmem:[#allocation3 + $0x3b] sm:$0x1] %vm512_vm10, %v1567_v29 }
0x1658   :  { %v2621_v33 = vpop.permute.xlu1 %2620 }
0x1659   :  { %2638 = vst.msk [vmem:[#allocation3 + $0x36] sm:$0x1] %vm512_vm10, %v2621_v33 }
0x165a   :  { %v2271_v40 = vpop.permute.xlu0 %2270 }
0x165b   :  { %2287 = vst.msk [vmem:[#allocation3 + $0x3d] sm:$0x1] %vm512_vm10, %v2271_v40 }
0x165c   :  { %v503_v38 = vpop.permute.xlu1 %502 }
0x165d   :  { %520 = vst.msk [vmem:[#allocation3 + $0x38] sm:$0x1] %vm512_vm10, %v503_v38 }
0x1660   :  { %v1215_v42 = vpop.permute.xlu1 %1214 }
0x1661   :  { %1231 = vst.msk [vmem:[#allocation3 + $0x3a] sm:$0x1] %vm512_vm10, %v1215_v42 }
0x1664   :  { %v1919_v24 = vpop.permute.xlu1 %1918 }
0x1665   :  { %1935 = vst.msk [vmem:[#allocation3 + $0x3c] sm:$0x1] %vm512_vm10, %v1919_v24 }
0x1668   :  { %v2623_v37 = vpop.permute.xlu1 %2622 }
0x1669   :  { %2639 = vst.msk [vmem:[#allocation3 + $0x3e] sm:$0x1] %vm512_vm10, %v2623_v37 }
0x1691   :  { %v2961_v25 = vpop.permute.xlu0 %2960 }
0x1692   :  { %2984 = vst.msk [vmem:[#allocation3 + $0x7] sm:$0x1] %vm512_vm10, %v2961_v25 }
0x1695   :  { %v2963_v57 = vpop.permute.xlu0 %2962 }
0x1696   :  { %2985 = vst.msk [vmem:[#allocation3 + $0xf] sm:$0x1] %vm512_vm10, %v2963_v57 }
0x1699   :  { %v2992_v1 = vld [vmem:[#allocation3] sm:$0xff]  ;;  %v2965_v52 = vpop.permute.xlu0 %2964 }
0x169a   :  { %3551 = vmatprep.mubr.msk.f32.mxu0 %vm190_vm9, %v2992_v1  ;;  %2986 = vst.msk [vmem:[#allocation3 + $0x17] sm:$0x1] %vm512_vm10, %v2965_v52 }
0x169d   :  { %v2967_v45 = vpop.permute.xlu0 %2966  ;;  %v2993_v19 = vld [vmem:[#allocation3 + $0x8] sm:$0xff] }
0x169e   :  { %2987 = vst.msk [vmem:[#allocation3 + $0x1f] sm:$0x1] %vm512_vm10, %v2967_v45  ;;  %3552 = vmatmul.mubr.msk.f32.vlgmr.msra.gmra.mrb[10].mxu0 %vm190_vm9, %v2993_v19 }
0x16a1   :  { %v2969_v8 = vpop.permute.xlu0 %2968  ;;  %v2994_v0 = vld [vmem:[#allocation3 + $0x10] sm:$0xff] }
0x16a2   :  { %2988 = vst.msk [vmem:[#allocation3 + $0x27] sm:$0x1] %vm512_vm10, %v2969_v8  ;;  %3554 = vmatprep.mubr.msk.f32.mxu0 %vm190_vm9, %v2994_v0 }
0x16a5   :  { %v2971_v43 = vpop.permute.xlu0 %2970  ;;  %v2995_v11 = vld [vmem:[#allocation3 + $0x18] sm:$0xff] }
0x16a6   :  { %2989 = vst.msk [vmem:[#allocation3 + $0x2f] sm:$0x1] %vm512_vm10, %v2971_v43  ;;  %3555 = vmatmul.mubr.msk.f32.gmra.mrb[12].mxu0 %vm190_vm9, %v2995_v11 }
0x16a9   :  { %v2973_v27 = vpop.permute.xlu0 %2972  ;;  %v2996_v44 = vld [vmem:[#allocation3 + $0x20] sm:$0xff] }
0x16aa   :  { %2990 = vst.msk [vmem:[#allocation3 + $0x37] sm:$0x1] %vm512_vm10, %v2973_v27  ;;  %3557 = vmatprep.mubr.msk.f32.mxu0 %vm190_vm9, %v2996_v44 }
0x16ad   :  { %v2997_v6 = vld [vmem:[#allocation3 + $0x28] sm:$0xff] }
0x16ae   :  { %3558 = vmatmul.mubr.msk.f32.gmra.mrb[14].mxu0 %vm190_vm9, %v2997_v6 }
0x16b1   :  { %v2998_v51 = vld [vmem:[#allocation3 + $0x30] sm:$0xff] }
0x16b2   :  { %3560 = vmatprep.mubr.msk.f32.mxu0 %vm190_vm9, %v2998_v51 }
0x16b3   :  { %v2975_v49 = vpop.permute.xlu0 %2974 }
0x16b4   :  { %2991 = vst.msk [vmem:[#allocation3 + $0x3f] sm:$0x1] %vm512_vm10, %v2975_v49 }
0x16bb   :  { %v2999_v20 = vld [vmem:[#allocation3 + $0x38] sm:$0xff] }
0x16bc   :  { %3561 = vmatmul.mubr.msk.f32.gmra.mrb[16].mxu0 %vm190_vm9, %v2999_v20 }
0x1771   :  { %v3553_v54 = vpop.f32.mrb[10].mxu0 }
0x1772   :  { %v3107_v17 = vadd.f32 %v3553_v54, %v5494_v21  ;;  %v3101_v36 = vpop.f32.mrb[11].mxu0 }
0x1773   :  { %v3102_v50 = vadd.f32 %v5494_v21, %v3101_v36 }
0x1774   :  { %v3146_v5 = vrot.slane %v3107_v17, 4 }
0x1775   :  { %v3140_v16 = vrot.slane %v3102_v50, 4 }
0x1776   :  { %v3147_v10 = vmax.f32 %v3107_v17, %v3146_v5 }
0x1777   :  { %v3141_v47 = vmax.f32 %v3102_v50, %v3140_v16 }
0x1778   :  { %v3148_v30 = vrot.slane %v3147_v10, 2 }
0x1779   :  { %v3142_v35 = vrot.slane %v3141_v47, 2  ;;  %v3556_v59 = vpop.f32.mrb[12].mxu0 }
0x177a   :  { %v3149_v28 = vmax.f32 %v3147_v10, %v3148_v30  ;;  %v3117_v32 = vadd.f32 %v3556_v59, %v5494_v21  ;;  %v3111_v62 = vpop.f32.mrb[13].mxu0 }
0x177b   :  { %v3143_v15 = vmax.f32 %v3141_v47, %v3142_v35  ;;  %v3112_v63 = vadd.f32 %v5494_v21, %v3111_v62 }
0x177c   :  { %v3150_v4 = vrot.slane %v3149_v28, 1  ;;  %v3158_v60 = vrot.slane %v3117_v32, 4 }
0x177d   :  { %v3144_v9 = vrot.slane %v3143_v15, 1  ;;  %v3152_v56 = vrot.slane %v3112_v63, 4 }
0x177e   :  { %v3151_v31 = vmax.f32 %v3149_v28, %v3150_v4  ;;  %v3159_v22 = vmax.f32 %v3117_v32, %v3158_v60 }
0x177f   :  { %v3145_v53 = vmax.f32 %v3143_v15, %v3144_v9  ;;  %v3153_v39 = vmax.f32 %v3112_v63, %v3152_v56 }
0x1780   :  { %v3189_v14 = vsub.f32 %v3107_v17, %v3151_v31  ;;  %v3160_v48 = vrot.slane %v3159_v22, 2 }
0x1781   :  { %v3188_v55 = vsub.f32 %v3102_v50, %v3145_v53  ;;  %v3154_v12 = vrot.slane %v3153_v39, 2  ;;  %v3559_v46 = vpop.f32.mrb[14].mxu0 }
0x1782   :  { %v3198_v7 = vmul.f32 1.442695, %v3189_v14  ;;  %v3161_v2 = vmax.f32 %v3159_v22, %v3160_v48  ;;  %v3127_v13 = vadd.f32 %v3559_v46, %v5494_v21  ;;  %v3121_v23 = vpop.f32.mrb[15].mxu0 }
0x1783   :  { %v3196_v26 = vmul.f32 1.442695, %v3188_v55  ;;  %v3155_v61 = vmax.f32 %v3153_v39, %v3154_v12  ;;  %v3122_v3 = vadd.f32 %v5494_v21, %v3121_v23 }
0x1784   :  { %4142 = vpow2.f32 %v3198_v7  ;;  %v3162_v18 = vrot.slane %v3161_v2, 1  ;;  %v3170_v41 = vrot.slane %v3127_v13, 4 }
0x1785   :  { %4144 = vpow2.f32 %v3196_v26  ;;  %v3156_v58 = vrot.slane %v3155_v61, 1  ;;  %v3164_v34 = vrot.slane %v3122_v3, 4 }
0x1786   :  { %v3163_v29 = vmax.f32 %v3161_v2, %v3162_v18  ;;  %v3171_v33 = vmax.f32 %v3127_v13, %v3170_v41 }
0x1787   :  { %v3157_v40 = vmax.f32 %v3155_v61, %v3156_v58  ;;  %v3165_v38 = vmax.f32 %v3122_v3, %v3164_v34 }
0x1788   :  { %v3191_v42 = vsub.f32 %v3117_v32, %v3163_v29  ;;  %v3172_v24 = vrot.slane %v3171_v33, 2 }
0x1789   :  { %v3190_v37 = vsub.f32 %v3112_v63, %v3157_v40  ;;  %v3166_v25 = vrot.slane %v3165_v38, 2 }
0x178a   :  { %v3202_v1 = vmul.f32 1.442695, %v3191_v42  ;;  %v3173_v57 = vmax.f32 %v3171_v33, %v3172_v24 }
0x178b   :  { %v3200_v52 = vmul.f32 1.442695, %v3190_v37  ;;  %v3167_v45 = vmax.f32 %v3165_v38, %v3166_v25 }
0x178c   :  { %4146 = vpow2.f32 %v3202_v1  ;;  %v3174_v19 = vrot.slane %v3173_v57, 1 }
0x178d   :  { %4148 = vpow2.f32 %v3200_v52  ;;  %v3168_v8 = vrot.slane %v3167_v45, 1 }
0x178e   :  { %v5502_v0 = vpop.eup %4142  ;;  %v3175_v43 = vmax.f32 %v3173_v57, %v3174_v19 }
0x178f   :  { %v5504_v11 = vpop.eup %4144  ;;  %v3218_v27 = vrot.slane %v5502_v0, 4  ;;  %v3169_v44 = vmax.f32 %v3167_v45, %v3168_v8  ;;  %v3562_v54 = vpop.f32.mrb[16].mxu0 }
0x1790   :  { %v3212_v6 = vrot.slane %v5504_v11, 4  ;;  %v3193_v51 = vsub.f32 %v3127_v13, %v3175_v43  ;;  %v3137_v50 = vadd.f32 %v3562_v54, %v5494_v21  ;;  %v3131_v5 = vpop.f32.mrb[17].mxu0 }
0x1791   :  { %v3219_v49 = vadd.f32 %v5502_v0, %v3218_v27  ;;  %v3192_v20 = vsub.f32 %v3122_v3, %v3169_v44  ;;  %v3132_v47 = vadd.f32 %v5494_v21, %v3131_v5 }
0x1792   :  { %v3213_v17 = vadd.f32 %v5504_v11, %v3212_v6  ;;  %v3206_v36 = vmul.f32 1.442695, %v3193_v51  ;;  %v3182_v35 = vrot.slane %v3137_v50, 4 }
0x1793   :  { %v3220_v16 = vrot.slane %v3219_v49, 2  ;;  %v3204_v10 = vmul.f32 1.442695, %v3192_v20  ;;  %v3176_v28 = vrot.slane %v3132_v47, 4 }
0x1794   :  { %v3214_v30 = vrot.slane %v3213_v17, 2  ;;  %4150 = vpow2.f32 %v3206_v36  ;;  %v3183_v15 = vmax.f32 %v3137_v50, %v3182_v35 }
0x1795   :  { %v3221_v59 = vadd.f32 %v3220_v16, %v3219_v49  ;;  %4152 = vpow2.f32 %v3204_v10  ;;  %v3177_v9 = vmax.f32 %v3132_v47, %v3176_v28 }
0x1796   :  { %v5512_v32 = vpop.eup %4146  ;;  %v3215_v62 = vadd.f32 %v3214_v30, %v3213_v17  ;;  %v3184_v21 = vrot.slane %v3183_v15, 2 }
0x1797   :  { %v5514_v63 = vpop.eup %4148  ;;  %v3222_v4 = vrot.slane %v3221_v59, 1  ;;  %v3230_v60 = vrot.slane %v5512_v32, 4  ;;  %v3178_v39 = vrot.slane %v3177_v9, 2 }
0x1798   :  { %v3216_v56 = vrot.slane %v3215_v62, 1  ;;  %v3224_v31 = vrot.slane %v5514_v63, 4  ;;  %v3185_v55 = vmax.f32 %v3183_v15, %v3184_v21 }
0x1799   :  { %v3223_v22 = vadd.f32 %v3222_v4, %v3221_v59  ;;  %v3231_v53 = vadd.f32 %v5512_v32, %v3230_v60  ;;  %v3179_v46 = vmax.f32 %v3177_v9, %v3178_v39 }
0x179a   :  { %v3217_v14 = vadd.f32 %v3216_v56, %v3215_v62  ;;  %v3225_v48 = vadd.f32 %v5514_v63, %v3224_v31  ;;  %v3186_v2 = vrot.slane %v3185_v55, 1 }
0x179b   :  { %4154 = vrcp.f32 %v3223_v22  ;;  %v3232_v12 = vrot.slane %v3231_v53, 2  ;;  %v3180_v23 = vrot.slane %v3179_v46, 1 }
0x179c   :  { %4156 = vrcp.f32 %v3217_v14  ;;  %v3226_v7 = vrot.slane %v3225_v48, 2  ;;  %v3187_v3 = vmax.f32 %v3185_v55, %v3186_v2 }
0x179d   :  { %v3233_v13 = vadd.f32 %v3232_v12, %v3231_v53  ;;  %v3181_v34 = vmax.f32 %v3179_v46, %v3180_v23 }
0x179e   :  { %v4151_v26 = vpop.eup %4150  ;;  %v3227_v61 = vadd.f32 %v3226_v7, %v3225_v48  ;;  %v3195_v40 = vsub.f32 %v3137_v50, %v3187_v3 }
0x179f   :  { %v4153_v18 = vpop.eup %4152  ;;  %v3234_v41 = vrot.slane %v3233_v13, 1  ;;  %v3242_v58 = vrot.slane %v4151_v26, 4  ;;  %v3194_v24 = vsub.f32 %v3132_v47, %v3181_v34 }
0x17a0   :  { %v3228_v29 = vrot.slane %v3227_v61, 1  ;;  %v3236_v33 = vrot.slane %v4153_v18, 4  ;;  %v3210_v1 = vmul.f32 1.442695, %v3195_v40 }
0x17a1   :  { %v3235_v38 = vadd.f32 %v3234_v41, %v3233_v13  ;;  %v3243_v42 = vadd.f32 %v4151_v26, %v3242_v58  ;;  %v3208_v52 = vmul.f32 1.442695, %v3194_v24 }
0x17a2   :  { %v3229_v37 = vadd.f32 %v3228_v29, %v3227_v61  ;;  %v3237_v25 = vadd.f32 %v4153_v18, %v3236_v33 }
0x17a3   :  { %4158 = vrcp.f32 %v3235_v38  ;;  %v3244_v57 = vrot.slane %v3243_v42, 2 }
0x17a4   :  { %4160 = vrcp.f32 %v3229_v37  ;;  %v3238_v45 = vrot.slane %v3237_v25, 2 }
0x17a5   :  { %v4155_v19 = vpop.eup %4154  ;;  %v3245_v8 = vadd.f32 %v3244_v57, %v3243_v42  ;;  %4162 = vpow2.f32 %v3210_v1 }
0x17a6   :  { %v4157_v43 = vpop.eup %4156  ;;  %v3263_v27 = vmul.f32 %v4155_v19, %v5502_v0  ;;  %v3239_v44 = vadd.f32 %v3238_v45, %v3237_v25  ;;  %4164 = vpow2.f32 %v3208_v52 }
0x17a7   :  { %v3261_v6 = vmul.f32 %v4157_v43, %v5504_v11  ;;  %v3246_v51 = vrot.slane %v3245_v8, 1 }
0x17a8   :  { %3277 = vst [vmem:[%s5554_s6 + $0x8] sm:$0xff] %v3263_v27  ;;  %v3240_v49 = vrot.slane %v3239_v44, 1 }
0x17a9   :  { %3276 = vst [vmem:[%s5554_s6] sm:$0xff] %v3261_v6  ;;  %v3247_v20 = vadd.f32 %v3246_v51, %v3245_v8 }
0x17aa   :  { %v3241_v54 = vadd.f32 %v3240_v49, %v3239_v44 }
0x17ab   :  { %4166 = vrcp.f32 %v3247_v20 }
0x17ac   :  { %4168 = vrcp.f32 %v3241_v54 }
0x17ad   :  { %v4159_v17 = vpop.eup %4158 }
0x17ae   :  { %v4161_v0 = vpop.eup %4160  ;;  %v3267_v36 = vmul.f32 %v4159_v17, %v5512_v32 }
0x17af   :  { %v4163_v50 = vpop.eup %4162  ;;  %v3265_v11 = vmul.f32 %v4161_v0, %v5514_v63 }
0x17b0   :  { %v4165_v5 = vpop.eup %4164  ;;  %3279 = vst [vmem:[%s5554_s6 + $0x18] sm:$0xff] %v3267_v36  ;;  %v3254_v16 = vrot.slane %v4163_v50, 4 }
0x17b1   :  { %3278 = vst [vmem:[%s5554_s6 + $0x10] sm:$0xff] %v3265_v11  ;;  %v3248_v10 = vrot.slane %v4165_v5, 4 }
0x17b2   :  { %v3255_v47 = vadd.f32 %v4163_v50, %v3254_v16 }
0x17b3   :  { %v3249_v30 = vadd.f32 %v4165_v5, %v3248_v10 }
0x17b4   :  { %v3256_v35 = vrot.slane %v3255_v47, 2 }
0x17b5   :  { %v4167_v59 = vpop.eup %4166  ;;  %v3250_v28 = vrot.slane %v3249_v30, 2 }
0x17b6   :  { %v4169_v32 = vpop.eup %4168  ;;  %v3271_v62 = vmul.f32 %v4167_v59, %v4151_v26  ;;  %v3257_v15 = vadd.f32 %v3256_v35, %v3255_v47 }
0x17b7   :  { %v3269_v63 = vmul.f32 %v4169_v32, %v4153_v18  ;;  %v3251_v4 = vadd.f32 %v3250_v28, %v3249_v30 }
0x17b8   :  { %3281 = vst [vmem:[%s5554_s6 + $0x28] sm:$0xff] %v3271_v62  ;;  %v3258_v60 = vrot.slane %v3257_v15, 1 }
0x17b9   :  { %3280 = vst [vmem:[%s5554_s6 + $0x20] sm:$0xff] %v3269_v63  ;;  %v3252_v9 = vrot.slane %v3251_v4, 1 }
0x17ba   :  { %v3259_v56 = vadd.f32 %v3258_v60, %v3257_v15 }
0x17bb   :  { %v3253_v31 = vadd.f32 %v3252_v9, %v3251_v4 }
0x17bc   :  { %4170 = vrcp.f32 %v3259_v56 }
0x17bd   :  { %4172 = vrcp.f32 %v3253_v31 }
0x17c6   :  { %v4171_v21 = vpop.eup %4170 }
0x17c7   :  { %v4173_v22 = vpop.eup %4172  ;;  %v3275_v53 = vmul.f32 %v4171_v21, %v4163_v50 }
0x17c8   :  { %v3273_v39 = vmul.f32 %v4173_v22, %v4165_v5 }
0x17c9   :  { %3283 = vst [vmem:[%s5554_s6 + $0x38] sm:$0xff] %v3275_v53 }
0x17ca   :  { %3282 = vst [vmem:[%s5554_s6 + $0x30] sm:$0xff] %v3273_v39 }

</bundles_post_ra>
